<compile_context>
chip_gen: v7x
topology: tpu7x:2x2x1
jax: 0.10.0
libtpu: 0.0.40
codegen_flags: <defaults>
</compile_context>

<pallas_src>
import functools

import jax
import jax.numpy as jnp
from jax import lax
from jax.experimental import pallas as pl
from jax.experimental.pallas import tpu as pltpu


# -----------------------------------------------------------------------------
# Pallas kernel: full model forward (all GRU layers + last step + linear head)
# -----------------------------------------------------------------------------
def fused_gru_kernel(T, B, H, n_layers, *refs):
    """refs = [x, (w_ih, b_i, w_hh, b_hn) * n_layers, out_w, out_b,   # inputs
               o,                                                      # output
               gi_r, gi_z, gi_n, seq_a, seq_b]                         # VMEM scratch

    Shapes:
      x     : (T*B, E)        time-major, flattened
      w_ih  : (3, in_dim, H)  gate-major (r, z, n), pre-transposed
      b_i   : (3, 1, H)       r/z slots hold b_ih+b_hh (folded), n slot holds b_in
      w_hh  : (3, H, H)
      b_hn  : (1, H)
      out_w : (H, C), out_b : (1, C), o : (B, C)
    """
    idx = 0
    x_ref = refs[idx]; idx += 1
    layer_refs = []
    for _ in range(n_layers):
        layer_refs.append(refs[idx:idx + 4]); idx += 4
    out_w_ref = refs[idx]; idx += 1
    out_b_ref = refs[idx]; idx += 1
    o_ref = refs[idx]; idx += 1
    gi_r, gi_z, gi_n, seq_a, seq_b = refs[idx:idx + 5]
    gi = (gi_r, gi_z, gi_n)
    seq_bufs = (seq_a, seq_b)

    h_last = jnp.zeros((B, H), jnp.float32)
    for layer in range(n_layers):
        w_ih, b_i, w_hh, b_hn = layer_refs[layer]
        last = layer == n_layers - 1

        # ---- (1) Hoisted input projection: one GEMM per gate over ALL T steps ----
        acts = x_ref[...] if layer == 0 else seq_bufs[(layer - 1) % 2][...]
        for g in range(3):
            gi[g][...] = (
                jnp.dot(acts, w_ih[g], preferred_element_type=jnp.float32) + b_i[g]
            )

        # Hidden-side weights / bias loaded once per layer (loop invariant).
        whh_r, whh_z, whh_n = w_hh[0], w_hh[1], w_hh[2]
        bhn = b_hn[...]
        out_seq = seq_bufs[layer % 2]

        # ---- (2) Recurrence: only the (B,H)x(H,H) hidden matmuls stay serial ----
        def step(t, h):
            row = t * B
            r = jax.nn.sigmoid(
                gi_r[pl.ds(row, B), :]
                + jnp.dot(h, whh_r, preferred_element_type=jnp.float32))
            z = jax.nn.sigmoid(
                gi_z[pl.ds(row, B), :]
                + jnp.dot(h, whh_z, preferred_element_type=jnp.float32))
            n = jnp.tanh(
                gi_n[pl.ds(row, B), :]
                + r * (jnp.dot(h, whh_n, preferred_element_type=jnp.float32) + bhn))
            h_new = (1.0 - z) * n + z * h
            if not last:
                out_seq[pl.ds(row, B), :] = h_new   # feeds next layer, VMEM only
            return h_new

        h_last = lax.fori_loop(0, T, step, jnp.zeros((B, H), jnp.float32),
                               unroll=True)

    # ---- (3) Last time step -> dropout (eval: identity) -> linear head ----
    o_ref[...] = (
        jnp.dot(h_last, out_w_ref[...], preferred_element_type=jnp.float32)
        + out_b_ref[...]
    ).astype(o_ref.dtype)


# -----------------------------------------------------------------------------
# Wrapper
# -----------------------------------------------------------------------------
def gru_model_forward(params, tokens):
    """tokens: (B, T) int32 -> logits (B, n_classes)."""
    B, T = tokens.shape
    E = params["embed"].shape[1]
    H = params["gru_layers"][0]["w_hh_t"].shape[-1]
    C = params["out_w_t"].shape[1]
    n_layers = len(params["gru_layers"])

    # Embedding gather (glue). Transpose the *token ids* (tiny) so the gather
    # emits time-major (T, B, E) directly; flatten to (T*B, E) for the kernel.
    x = jnp.take(params["embed"], tokens.T, axis=0).reshape(T * B, E)

    flat_inputs = [x]
    in_specs = [pl.BlockSpec((T * B, E), lambda i: (0, 0))]
    for layer in params["gru_layers"]:
        w_ih, w_hh = layer["w_ih_t"], layer["w_hh_t"]        # (3,in,H), (3,H,H)
        b_ih, b_hh = layer["b_ih"], layer["b_hh"]            # (3,H) each
        # Pre-fold r/z biases into the hoisted input projection; keep b_hn alone.
        b_fold = jnp.stack(
            [b_ih[0] + b_hh[0], b_ih[1] + b_hh[1], b_ih[2]])[:, None, :]   # (3,1,H)
        b_hn = b_hh[2][None, :]                                            # (1,H)
        in_dim = w_ih.shape[1]
        flat_inputs += [w_ih, b_fold, w_hh, b_hn]
        in_specs += [
            pl.BlockSpec((3, in_dim, H), lambda i: (0, 0, 0)),
            pl.BlockSpec((3, 1, H), lambda i: (0, 0, 0)),
            pl.BlockSpec((3, H, H), lambda i: (0, 0, 0)),
            pl.BlockSpec((1, H), lambda i: (0, 0)),
        ]
    flat_inputs += [params["out_w_t"], params["out_b"]]
    in_specs += [pl.BlockSpec((H, C), lambda i: (0, 0)),
                 pl.BlockSpec((1, C), lambda i: (0, 0))]

    # Advisory cost hint so XLA schedules neighbors around the serial recurrence.
    flops, in_dim = 2 * B * H * C, E
    for _ in range(n_layers):
        flops += 2 * T * B * (in_dim + H) * 3 * H
        in_dim = H
    bytes_accessed = 4 * (sum(int(a.size) for a in flat_inputs) + B * C)
    transcendentals = n_layers * T * B * 3 * H

    kernel = functools.partial(fused_gru_kernel, T, B, H, n_layers)
    return pl.pallas_call(
        kernel,
        out_shape=jax.ShapeDtypeStruct((B, C), jnp.float32),
        grid_spec=pltpu.PrefetchScalarGridSpec(
            num_scalar_prefetch=0,
            grid=(1,),
            in_specs=in_specs,
            out_specs=pl.BlockSpec((B, C), lambda i: (0, 0)),
            scratch_shapes=[
                pltpu.VMEM((T * B, H), jnp.float32),   # gi_r (all time steps)
                pltpu.VMEM((T * B, H), jnp.float32),   # gi_z
                pltpu.VMEM((T * B, H), jnp.float32),   # gi_n
                pltpu.VMEM((T * B, H), jnp.float32),   # layer acts ping
                pltpu.VMEM((T * B, H), jnp.float32),   # layer acts pong
            ],
        ),
        compiler_params=pltpu.CompilerParams(
            dimension_semantics=("arbitrary",)),
        cost_estimate=pl.CostEstimate(
            flops=flops, transcendentals=transcendentals,
            bytes_accessed=bytes_accessed),
    )(*flat_inputs)


# -----------------------------------------------------------------------------
# Pure-JAX reference (same math) for correctness checking
# -----------------------------------------------------------------------------
def gru_reference(params, tokens):
    x = jnp.take(params["embed"], tokens, axis=0)            # (B, T, E)
    B = x.shape[0]
    h_seq = jnp.swapaxes(x, 0, 1)                            # (T, B, *)
    for layer in params["gru_layers"]:
        w_ih, w_hh = layer["w_ih_t"], layer["w_hh_t"]
        b_ih, b_hh = layer["b_ih"], layer["b_hh"]
        H = w_hh.shape[-1]

        def cell(h, x_t):
            r = jax.nn.sigmoid(x_t @ w_ih[0] + b_ih[0] + h @ w_hh[0] + b_hh[0])
            z = jax.nn.sigmoid(x_t @ w_ih[1] + b_ih[1] + h @ w_hh[1] + b_hh[1])
            n = jnp.tanh(x_t @ w_ih[2] + b_ih[2] + r * (h @ w_hh[2] + b_hh[2]))
            h_new = (1.0 - z) * n + z * h
            return h_new, h_new

        _, h_seq = lax.scan(cell, jnp.zeros((B, H), jnp.float32), h_seq)
    h_t = h_seq[-1]                                          # last step, last layer
    return h_t @ params["out_w_t"] + params["out_b"]


def init_params(key, n_layers, hidden_dim, n_vocab, embed_dim, n_classes):
    keys = jax.random.split(key, 1 + 4 * n_layers + 2)
    k = iter(keys)
    bound = 1.0 / float(hidden_dim) ** 0.5

    params = {
        "embed": jax.random.normal(next(k), (n_vocab, embed_dim), jnp.float32),
        "gru_layers": [],
    }
    in_dim = embed_dim
    for _ in range(n_layers):
        params["gru_layers"].append(
            {
                # gate-major & pre-transposed: (3, in, H) so kernel does x @ W_g^T
                "w_ih_t": jax.random.uniform(next(k), (3, in_dim, hidden_dim),
                                             jnp.float32, -bound, bound),
                "w_hh_t": jax.random.uniform(next(k), (3, hidden_dim, hidden_dim),
                                             jnp.float32, -bound, bound),
                "b_ih": jax.random.uniform(next(k), (3, hidden_dim),
                                           jnp.float32, -bound, bound),
                "b_hh": jax.random.uniform(next(k), (3, hidden_dim),
                                           jnp.float32, -bound, bound),
            }
        )
        in_dim = hidden_dim

    params["out_w_t"] = jax.random.uniform(next(k), (hidden_dim, n_classes),
                                           jnp.float32, -bound, bound)
    params["out_b"] = jax.random.uniform(next(k), (1, n_classes),
                                         jnp.float32, -bound, bound)
    return params


if __name__ == "__main__":
    # Small, deterministic config.
    n_layers, hidden_dim, n_vocab, embed_dim, n_classes = 2, 32, 50, 16, 4
    B, T = 8, 8

    key = jax.random.PRNGKey(0)
    pkey, tkey = jax.random.split(key)
    params = init_params(pkey, n_layers, hidden_dim, n_vocab, embed_dim, n_classes)
    tokens = jax.random.randint(tkey, (B, T), 0, n_vocab, dtype=jnp.int32)

    fwd = jax.jit(functools.partial(gru_model_forward, params))
    logits = fwd(tokens)
    jax.block_until_ready(logits)
    assert logits.shape == (B, n_classes)

    ref = jax.jit(functools.partial(gru_reference, params))(tokens)
    err = float(jnp.max(jnp.abs(logits - ref)))
    assert err < 1e-3, f"kernel/reference mismatch: max|diff|={err}"

    print("KERNEL_OK")
</pallas_src>

<mosaic_0001>
module attributes {stable_mosaic.version = 11 : i64} {
  func.func @fused_gru_kernel(%arg0: i32, %arg1: memref<64x16xf32, #tpu.memory_space<vmem>>, %arg2: memref<3x16x32xf32, #tpu.memory_space<vmem>>, %arg3: memref<3x1x32xf32, #tpu.memory_space<vmem>>, %arg4: memref<3x32x32xf32, #tpu.memory_space<vmem>>, %arg5: memref<1x32xf32, #tpu.memory_space<vmem>>, %arg6: memref<3x32x32xf32, #tpu.memory_space<vmem>>, %arg7: memref<3x1x32xf32, #tpu.memory_space<vmem>>, %arg8: memref<3x32x32xf32, #tpu.memory_space<vmem>>, %arg9: memref<1x32xf32, #tpu.memory_space<vmem>>, %arg10: memref<32x4xf32, #tpu.memory_space<vmem>>, %arg11: memref<1x4xf32, #tpu.memory_space<vmem>>, %arg12: memref<8x4xf32, #tpu.memory_space<vmem>>, %arg13: memref<64x32xf32, #tpu.memory_space<vmem>>, %arg14: memref<64x32xf32, #tpu.memory_space<vmem>>, %arg15: memref<64x32xf32, #tpu.memory_space<vmem>>, %arg16: memref<64x32xf32, #tpu.memory_space<vmem>>, %arg17: memref<64x32xf32, #tpu.memory_space<vmem>>) attributes {dimension_semantics = [#tpu.dimension_semantics<arbitrary>], iteration_bounds = array<i64: 1>, scalar_prefetch = 0 : i64, scratch_operands = 5 : i64, tpu.core_type = #tpu.core_type<tc>, window_params = [{pipeline_mode = #tpu.pipeline_mode<synchronous>, transform_indices = @transform_0, window_bounds = array<i64: 64, 16>}, {pipeline_mode = #tpu.pipeline_mode<synchronous>, transform_indices = @transform_1, window_bounds = array<i64: 3, 16, 32>}, {pipeline_mode = #tpu.pipeline_mode<synchronous>, transform_indices = @transform_2, window_bounds = array<i64: 3, 1, 32>}, {pipeline_mode = #tpu.pipeline_mode<synchronous>, transform_indices = @transform_3, window_bounds = array<i64: 3, 32, 32>}, {pipeline_mode = #tpu.pipeline_mode<synchronous>, transform_indices = @transform_4, window_bounds = array<i64: 1, 32>}, {pipeline_mode = #tpu.pipeline_mode<synchronous>, transform_indices = @transform_5, window_bounds = array<i64: 3, 32, 32>}, {pipeline_mode = #tpu.pipeline_mode<synchronous>, transform_indices = @transform_6, window_bounds = array<i64: 3, 1, 32>}, {pipeline_mode = #tpu.pipeline_mode<synchronous>, transform_indices = @transform_7, window_bounds = array<i64: 3, 32, 32>}, {pipeline_mode = #tpu.pipeline_mode<synchronous>, transform_indices = @transform_8, window_bounds = array<i64: 1, 32>}, {pipeline_mode = #tpu.pipeline_mode<synchronous>, transform_indices = @transform_9, window_bounds = array<i64: 32, 4>}, {pipeline_mode = #tpu.pipeline_mode<synchronous>, transform_indices = @transform_10, window_bounds = array<i64: 1, 4>}, {pipeline_mode = #tpu.pipeline_mode<synchronous>, transform_indices = @transform_11, window_bounds = array<i64: 8, 4>}]} {
    %c0 = arith.constant 0 : index
    %c0_0 = arith.constant 0 : index
    %0 = vector.load %arg1[%c0, %c0_0] : memref<64x16xf32, #tpu.memory_space<vmem>>, vector<64x16xf32>
    %c0_1 = arith.constant 0 : index
    %c0_2 = arith.constant 0 : index
    %c0_3 = arith.constant 0 : index
    %1 = vector.load %arg2[%c0_1, %c0_2, %c0_3] : memref<3x16x32xf32, #tpu.memory_space<vmem>>, vector<1x16x32xf32>
    %2 = vector.shape_cast %1 : vector<1x16x32xf32> to vector<16x32xf32>
    %cst = arith.constant dense<0.000000e+00> : vector<64x32xf32>
    %3 = tpu.matmul %0, %2, %cst {dimension_numbers = #tpu.dot_dimension_numbers<[1], [0], [0], [1], [0, 0, 1, 1], [], []>} : vector<64x16xf32>, vector<16x32xf32>, vector<64x32xf32> -> vector<64x32xf32>
    %c0_4 = arith.constant 0 : index
    %c0_5 = arith.constant 0 : index
    %c0_6 = arith.constant 0 : index
    %4 = vector.load %arg3[%c0_4, %c0_5, %c0_6] : memref<3x1x32xf32, #tpu.memory_space<vmem>>, vector<1x1x32xf32>
    %5 = vector.shape_cast %4 : vector<1x1x32xf32> to vector<1x32xf32>
    %6 = vector.broadcast %5 : vector<1x32xf32> to vector<64x32xf32>
    %7 = arith.addf %3, %6 : vector<64x32xf32>
    %c0_7 = arith.constant 0 : index
    %c0_8 = arith.constant 0 : index
    %8 = vector.load %arg13[%c0_7, %c0_8] : memref<64x32xf32, #tpu.memory_space<vmem>>, vector<64x32xf32>
    tpu.vector_store %arg13[%c0_7, %c0_8], %7 {strides = array<i32>} : memref<64x32xf32, #tpu.memory_space<vmem>>, vector<64x32xf32>,
    %c1 = arith.constant 1 : index
    %c0_9 = arith.constant 0 : index
    %c0_10 = arith.constant 0 : index
    %9 = vector.load %arg2[%c1, %c0_9, %c0_10] : memref<3x16x32xf32, #tpu.memory_space<vmem>>, vector<1x16x32xf32>
    %10 = vector.shape_cast %9 : vector<1x16x32xf32> to vector<16x32xf32>
    %cst_11 = arith.constant dense<0.000000e+00> : vector<64x32xf32>
    %11 = tpu.matmul %0, %10, %cst_11 {dimension_numbers = #tpu.dot_dimension_numbers<[1], [0], [0], [1], [0, 0, 1, 1], [], []>} : vector<64x16xf32>, vector<16x32xf32>, vector<64x32xf32> -> vector<64x32xf32>
    %c1_12 = arith.constant 1 : index
    %c0_13 = arith.constant 0 : index
    %c0_14 = arith.constant 0 : index
    %12 = vector.load %arg3[%c1_12, %c0_13, %c0_14] : memref<3x1x32xf32, #tpu.memory_space<vmem>>, vector<1x1x32xf32>
    %13 = vector.shape_cast %12 : vector<1x1x32xf32> to vector<1x32xf32>
    %14 = vector.broadcast %13 : vector<1x32xf32> to vector<64x32xf32>
    %15 = arith.addf %11, %14 : vector<64x32xf32>
    %c0_15 = arith.constant 0 : index
    %c0_16 = arith.constant 0 : index
    %16 = vector.load %arg14[%c0_15, %c0_16] : memref<64x32xf32, #tpu.memory_space<vmem>>, vector<64x32xf32>
    tpu.vector_store %arg14[%c0_15, %c0_16], %15 {strides = array<i32>} : memref<64x32xf32, #tpu.memory_space<vmem>>, vector<64x32xf32>,
    %c2 = arith.constant 2 : index
    %c0_17 = arith.constant 0 : index
    %c0_18 = arith.constant 0 : index
    %17 = vector.load %arg2[%c2, %c0_17, %c0_18] : memref<3x16x32xf32, #tpu.memory_space<vmem>>, vector<1x16x32xf32>
    %18 = vector.shape_cast %17 : vector<1x16x32xf32> to vector<16x32xf32>
    %cst_19 = arith.constant dense<0.000000e+00> : vector<64x32xf32>
    %19 = tpu.matmul %0, %18, %cst_19 {dimension_numbers = #tpu.dot_dimension_numbers<[1], [0], [0], [1], [0, 0, 1, 1], [], []>} : vector<64x16xf32>, vector<16x32xf32>, vector<64x32xf32> -> vector<64x32xf32>
    %c2_20 = arith.constant 2 : index
    %c0_21 = arith.constant 0 : index
    %c0_22 = arith.constant 0 : index
    %20 = vector.load %arg3[%c2_20, %c0_21, %c0_22] : memref<3x1x32xf32, #tpu.memory_space<vmem>>, vector<1x1x32xf32>
    %21 = vector.shape_cast %20 : vector<1x1x32xf32> to vector<1x32xf32>
    %22 = vector.broadcast %21 : vector<1x32xf32> to vector<64x32xf32>
    %23 = arith.addf %19, %22 : vector<64x32xf32>
    %c0_23 = arith.constant 0 : index
    %c0_24 = arith.constant 0 : index
    %24 = vector.load %arg15[%c0_23, %c0_24] : memref<64x32xf32, #tpu.memory_space<vmem>>, vector<64x32xf32>
    tpu.vector_store %arg15[%c0_23, %c0_24], %23 {strides = array<i32>} : memref<64x32xf32, #tpu.memory_space<vmem>>, vector<64x32xf32>,
    %c0_25 = arith.constant 0 : index
    %c0_26 = arith.constant 0 : index
    %c0_27 = arith.constant 0 : index
    %25 = vector.load %arg4[%c0_25, %c0_26, %c0_27] : memref<3x32x32xf32, #tpu.memory_space<vmem>>, vector<1x32x32xf32>
    %26 = vector.shape_cast %25 : vector<1x32x32xf32> to vector<32x32xf32>
    %c1_28 = arith.constant 1 : index
    %c0_29 = arith.constant 0 : index
    %c0_30 = arith.constant 0 : index
    %27 = vector.load %arg4[%c1_28, %c0_29, %c0_30] : memref<3x32x32xf32, #tpu.memory_space<vmem>>, vector<1x32x32xf32>
    %28 = vector.shape_cast %27 : vector<1x32x32xf32> to vector<32x32xf32>
    %c2_31 = arith.constant 2 : index
    %c0_32 = arith.constant 0 : index
    %c0_33 = arith.constant 0 : index
    %29 = vector.load %arg4[%c2_31, %c0_32, %c0_33] : memref<3x32x32xf32, #tpu.memory_space<vmem>>, vector<1x32x32xf32>
    %30 = vector.shape_cast %29 : vector<1x32x32xf32> to vector<32x32xf32>
    %c0_34 = arith.constant 0 : index
    %c0_35 = arith.constant 0 : index
    %31 = vector.load %arg5[%c0_34, %c0_35] : memref<1x32xf32, #tpu.memory_space<vmem>>, vector<1x32xf32>
    %cst_36 = arith.constant 0.000000e+00 : f32
    %32 = vector.broadcast %cst_36 : f32 to vector<8x32xf32>
    %c0_i32 = arith.constant 0 : i32
    %c8_i32 = arith.constant 8 : i32
    %33 = arith.muli %c0_i32, %c8_i32 : i32
    %34 = arith.index_cast %33 : i32 to index
    %c0_37 = arith.constant 0 : index
    %35 = vector.load %arg13[%34, %c0_37] : memref<64x32xf32, #tpu.memory_space<vmem>>, vector<8x32xf32>
    %cst_38 = arith.constant dense<0.000000e+00> : vector<8x32xf32>
    %36 = tpu.matmul %32, %26, %cst_38 {dimension_numbers = #tpu.dot_dimension_numbers<[1], [0], [0], [1], [0, 0, 1, 1], [], []>} : vector<8x32xf32>, vector<32x32xf32>, vector<8x32xf32> -> vector<8x32xf32>
    %37 = arith.addf %35, %36 : vector<8x32xf32>
    %38 = arith.negf %37 : vector<8x32xf32>
    %39 = math.exp %38 : vector<8x32xf32>
    %cst_39 = arith.constant 1.000000e+00 : f32
    %40 = vector.broadcast %cst_39 : f32 to vector<8x32xf32>
    %41 = arith.addf %40, %39 : vector<8x32xf32>
    %42 = arith.divf %40, %41 : vector<8x32xf32>
    %43 = arith.index_cast %33 : i32 to index
    %c0_40 = arith.constant 0 : index
    %44 = vector.load %arg14[%43, %c0_40] : memref<64x32xf32, #tpu.memory_space<vmem>>, vector<8x32xf32>
    %cst_41 = arith.constant dense<0.000000e+00> : vector<8x32xf32>
    %45 = tpu.matmul %32, %28, %cst_41 {dimension_numbers = #tpu.dot_dimension_numbers<[1], [0], [0], [1], [0, 0, 1, 1], [], []>} : vector<8x32xf32>, vector<32x32xf32>, vector<8x32xf32> -> vector<8x32xf32>
    %46 = arith.addf %44, %45 : vector<8x32xf32>
    %47 = arith.negf %46 : vector<8x32xf32>
    %48 = math.exp %47 : vector<8x32xf32>
    %cst_42 = arith.constant 1.000000e+00 : f32
    %49 = vector.broadcast %cst_42 : f32 to vector<8x32xf32>
    %50 = arith.addf %49, %48 : vector<8x32xf32>
    %51 = arith.divf %49, %50 : vector<8x32xf32>
    %52 = arith.index_cast %33 : i32 to index
    %c0_43 = arith.constant 0 : index
    %53 = vector.load %arg15[%52, %c0_43] : memref<64x32xf32, #tpu.memory_space<vmem>>, vector<8x32xf32>
    %cst_44 = arith.constant dense<0.000000e+00> : vector<8x32xf32>
    %54 = tpu.matmul %32, %30, %cst_44 {dimension_numbers = #tpu.dot_dimension_numbers<[1], [0], [0], [1], [0, 0, 1, 1], [], []>} : vector<8x32xf32>, vector<32x32xf32>, vector<8x32xf32> -> vector<8x32xf32>
    %55 = vector.broadcast %31 : vector<1x32xf32> to vector<8x32xf32>
    %56 = arith.addf %54, %55 : vector<8x32xf32>
    %57 = arith.mulf %42, %56 : vector<8x32xf32>
    %58 = arith.addf %53, %57 : vector<8x32xf32>
    %59 = math.tanh %58 : vector<8x32xf32>
    %cst_45 = arith.constant 1.000000e+00 : f32
    %60 = vector.broadcast %cst_45 : f32 to vector<8x32xf32>
    %61 = arith.subf %60, %51 : vector<8x32xf32>
    %62 = arith.mulf %61, %59 : vector<8x32xf32>
    %63 = arith.mulf %51, %32 : vector<8x32xf32>
    %64 = arith.addf %62, %63 : vector<8x32xf32>
    %65 = arith.index_cast %33 : i32 to index
    %c0_46 = arith.constant 0 : index
    %66 = vector.load %arg16[%65, %c0_46] : memref<64x32xf32, #tpu.memory_space<vmem>>, vector<8x32xf32>
    tpu.vector_store %arg16[%65, %c0_46], %64 {strides = array<i32>} : memref<64x32xf32, #tpu.memory_space<vmem>>, vector<8x32xf32>,
    %c1_i32 = arith.constant 1 : i32
    %c8_i32_47 = arith.constant 8 : i32
    %67 = arith.muli %c1_i32, %c8_i32_47 : i32
    %68 = arith.index_cast %67 : i32 to index
    %c0_48 = arith.constant 0 : index
    %69 = vector.load %arg13[%68, %c0_48] : memref<64x32xf32, #tpu.memory_space<vmem>>, vector<8x32xf32>
    %cst_49 = arith.constant dense<0.000000e+00> : vector<8x32xf32>
    %70 = tpu.matmul %64, %26, %cst_49 {dimension_numbers = #tpu.dot_dimension_numbers<[1], [0], [0], [1], [0, 0, 1, 1], [], []>} : vector<8x32xf32>, vector<32x32xf32>, vector<8x32xf32> -> vector<8x32xf32>
    %71 = arith.addf %69, %70 : vector<8x32xf32>
    %72 = arith.negf %71 : vector<8x32xf32>
    %73 = math.exp %72 : vector<8x32xf32>
    %cst_50 = arith.constant 1.000000e+00 : f32
    %74 = vector.broadcast %cst_50 : f32 to vector<8x32xf32>
    %75 = arith.addf %74, %73 : vector<8x32xf32>
    %76 = arith.divf %74, %75 : vector<8x32xf32>
    %77 = arith.index_cast %67 : i32 to index
    %c0_51 = arith.constant 0 : index
    %78 = vector.load %arg14[%77, %c0_51] : memref<64x32xf32, #tpu.memory_space<vmem>>, vector<8x32xf32>
    %cst_52 = arith.constant dense<0.000000e+00> : vector<8x32xf32>
    %79 = tpu.matmul %64, %28, %cst_52 {dimension_numbers = #tpu.dot_dimension_numbers<[1], [0], [0], [1], [0, 0, 1, 1], [], []>} : vector<8x32xf32>, vector<32x32xf32>, vector<8x32xf32> -> vector<8x32xf32>
    %80 = arith.addf %78, %79 : vector<8x32xf32>
    %81 = arith.negf %80 : vector<8x32xf32>
    %82 = math.exp %81 : vector<8x32xf32>
    %cst_53 = arith.constant 1.000000e+00 : f32
    %83 = vector.broadcast %cst_53 : f32 to vector<8x32xf32>
    %84 = arith.addf %83, %82 : vector<8x32xf32>
    %85 = arith.divf %83, %84 : vector<8x32xf32>
    %86 = arith.index_cast %67 : i32 to index
    %c0_54 = arith.constant 0 : index
    %87 = vector.load %arg15[%86, %c0_54] : memref<64x32xf32, #tpu.memory_space<vmem>>, vector<8x32xf32>
    %cst_55 = arith.constant dense<0.000000e+00> : vector<8x32xf32>
    %88 = tpu.matmul %64, %30, %cst_55 {dimension_numbers = #tpu.dot_dimension_numbers<[1], [0], [0], [1], [0, 0, 1, 1], [], []>} : vector<8x32xf32>, vector<32x32xf32>, vector<8x32xf32> -> vector<8x32xf32>
    %89 = vector.broadcast %31 : vector<1x32xf32> to vector<8x32xf32>
    %90 = arith.addf %88, %89 : vector<8x32xf32>
    %91 = arith.mulf %76, %90 : vector<8x32xf32>
    %92 = arith.addf %87, %91 : vector<8x32xf32>
    %93 = math.tanh %92 : vector<8x32xf32>
    %cst_56 = arith.constant 1.000000e+00 : f32
    %94 = vector.broadcast %cst_56 : f32 to vector<8x32xf32>
    %95 = arith.subf %94, %85 : vector<8x32xf32>
    %96 = arith.mulf %95, %93 : vector<8x32xf32>
    %97 = arith.mulf %85, %64 : vector<8x32xf32>
    %98 = arith.addf %96, %97 : vector<8x32xf32>
    %99 = arith.index_cast %67 : i32 to index
    %c0_57 = arith.constant 0 : index
    %100 = vector.load %arg16[%99, %c0_57] : memref<64x32xf32, #tpu.memory_space<vmem>>, vector<8x32xf32>
    tpu.vector_store %arg16[%99, %c0_57], %98 {strides = array<i32>} : memref<64x32xf32, #tpu.memory_space<vmem>>, vector<8x32xf32>,
    %c2_i32 = arith.constant 2 : i32
    %c8_i32_58 = arith.constant 8 : i32
    %101 = arith.muli %c2_i32, %c8_i32_58 : i32
    %102 = arith.index_cast %101 : i32 to index
    %c0_59 = arith.constant 0 : index
    %103 = vector.load %arg13[%102, %c0_59] : memref<64x32xf32, #tpu.memory_space<vmem>>, vector<8x32xf32>
    %cst_60 = arith.constant dense<0.000000e+00> : vector<8x32xf32>
    %104 = tpu.matmul %98, %26, %cst_60 {dimension_numbers = #tpu.dot_dimension_numbers<[1], [0], [0], [1], [0, 0, 1, 1], [], []>} : vector<8x32xf32>, vector<32x32xf32>, vector<8x32xf32> -> vector<8x32xf32>
    %105 = arith.addf %103, %104 : vector<8x32xf32>
    %106 = arith.negf %105 : vector<8x32xf32>
    %107 = math.exp %106 : vector<8x32xf32>
    %cst_61 = arith.constant 1.000000e+00 : f32
    %108 = vector.broadcast %cst_61 : f32 to vector<8x32xf32>
    %109 = arith.addf %108, %107 : vector<8x32xf32>
    %110 = arith.divf %108, %109 : vector<8x32xf32>
    %111 = arith.index_cast %101 : i32 to index
    %c0_62 = arith.constant 0 : index
    %112 = vector.load %arg14[%111, %c0_62] : memref<64x32xf32, #tpu.memory_space<vmem>>, vector<8x32xf32>
    %cst_63 = arith.constant dense<0.000000e+00> : vector<8x32xf32>
    %113 = tpu.matmul %98, %28, %cst_63 {dimension_numbers = #tpu.dot_dimension_numbers<[1], [0], [0], [1], [0, 0, 1, 1], [], []>} : vector<8x32xf32>, vector<32x32xf32>, vector<8x32xf32> -> vector<8x32xf32>
    %114 = arith.addf %112, %113 : vector<8x32xf32>
    %115 = arith.negf %114 : vector<8x32xf32>
    %116 = math.exp %115 : vector<8x32xf32>
    %cst_64 = arith.constant 1.000000e+00 : f32
    %117 = vector.broadcast %cst_64 : f32 to vector<8x32xf32>
    %118 = arith.addf %117, %116 : vector<8x32xf32>
    %119 = arith.divf %117, %118 : vector<8x32xf32>
    %120 = arith.index_cast %101 : i32 to index
    %c0_65 = arith.constant 0 : index
    %121 = vector.load %arg15[%120, %c0_65] : memref<64x32xf32, #tpu.memory_space<vmem>>, vector<8x32xf32>
    %cst_66 = arith.constant dense<0.000000e+00> : vector<8x32xf32>
    %122 = tpu.matmul %98, %30, %cst_66 {dimension_numbers = #tpu.dot_dimension_numbers<[1], [0], [0], [1], [0, 0, 1, 1], [], []>} : vector<8x32xf32>, vector<32x32xf32>, vector<8x32xf32> -> vector<8x32xf32>
    %123 = vector.broadcast %31 : vector<1x32xf32> to vector<8x32xf32>
    %124 = arith.addf %122, %123 : vector<8x32xf32>
    %125 = arith.mulf %110, %124 : vector<8x32xf32>
    %126 = arith.addf %121, %125 : vector<8x32xf32>
    %127 = math.tanh %126 : vector<8x32xf32>
    %cst_67 = arith.constant 1.000000e+00 : f32
    %128 = vector.broadcast %cst_67 : f32 to vector<8x32xf32>
    %129 = arith.subf %128, %119 : vector<8x32xf32>
    %130 = arith.mulf %129, %127 : vector<8x32xf32>
    %131 = arith.mulf %119, %98 : vector<8x32xf32>
    %132 = arith.addf %130, %131 : vector<8x32xf32>
    %133 = arith.index_cast %101 : i32 to index
    %c0_68 = arith.constant 0 : index
    %134 = vector.load %arg16[%133, %c0_68] : memref<64x32xf32, #tpu.memory_space<vmem>>, vector<8x32xf32>
    tpu.vector_store %arg16[%133, %c0_68], %132 {strides = array<i32>} : memref<64x32xf32, #tpu.memory_space<vmem>>, vector<8x32xf32>,
    %c3_i32 = arith.constant 3 : i32
    %c8_i32_69 = arith.constant 8 : i32
    %135 = arith.muli %c3_i32, %c8_i32_69 : i32
    %136 = arith.index_cast %135 : i32 to index
    %c0_70 = arith.constant 0 : index
    %137 = vector.load %arg13[%136, %c0_70] : memref<64x32xf32, #tpu.memory_space<vmem>>, vector<8x32xf32>
    %cst_71 = arith.constant dense<0.000000e+00> : vector<8x32xf32>
    %138 = tpu.matmul %132, %26, %cst_71 {dimension_numbers = #tpu.dot_dimension_numbers<[1], [0], [0], [1], [0, 0, 1, 1], [], []>} : vector<8x32xf32>, vector<32x32xf32>, vector<8x32xf32> -> vector<8x32xf32>
    %139 = arith.addf %137, %138 : vector<8x32xf32>
    %140 = arith.negf %139 : vector<8x32xf32>
    %141 = math.exp %140 : vector<8x32xf32>
    %cst_72 = arith.constant 1.000000e+00 : f32
    %142 = vector.broadcast %cst_72 : f32 to vector<8x32xf32>
    %143 = arith.addf %142, %141 : vector<8x32xf32>
    %144 = arith.divf %142, %143 : vector<8x32xf32>
    %145 = arith.index_cast %135 : i32 to index
    %c0_73 = arith.constant 0 : index
    %146 = vector.load %arg14[%145, %c0_73] : memref<64x32xf32, #tpu.memory_space<vmem>>, vector<8x32xf32>
    %cst_74 = arith.constant dense<0.000000e+00> : vector<8x32xf32>
    %147 = tpu.matmul %132, %28, %cst_74 {dimension_numbers = #tpu.dot_dimension_numbers<[1], [0], [0], [1], [0, 0, 1, 1], [], []>} : vector<8x32xf32>, vector<32x32xf32>, vector<8x32xf32> -> vector<8x32xf32>
    %148 = arith.addf %146, %147 : vector<8x32xf32>
    %149 = arith.negf %148 : vector<8x32xf32>
    %150 = math.exp %149 : vector<8x32xf32>
    %cst_75 = arith.constant 1.000000e+00 : f32
    %151 = vector.broadcast %cst_75 : f32 to vector<8x32xf32>
    %152 = arith.addf %151, %150 : vector<8x32xf32>
    %153 = arith.divf %151, %152 : vector<8x32xf32>
    %154 = arith.index_cast %135 : i32 to index
    %c0_76 = arith.constant 0 : index
    %155 = vector.load %arg15[%154, %c0_76] : memref<64x32xf32, #tpu.memory_space<vmem>>, vector<8x32xf32>
    %cst_77 = arith.constant dense<0.000000e+00> : vector<8x32xf32>
    %156 = tpu.matmul %132, %30, %cst_77 {dimension_numbers = #tpu.dot_dimension_numbers<[1], [0], [0], [1], [0, 0, 1, 1], [], []>} : vector<8x32xf32>, vector<32x32xf32>, vector<8x32xf32> -> vector<8x32xf32>
    %157 = vector.broadcast %31 : vector<1x32xf32> to vector<8x32xf32>
    %158 = arith.addf %156, %157 : vector<8x32xf32>
    %159 = arith.mulf %144, %158 : vector<8x32xf32>
    %160 = arith.addf %155, %159 : vector<8x32xf32>
    %161 = math.tanh %160 : vector<8x32xf32>
    %cst_78 = arith.constant 1.000000e+00 : f32
    %162 = vector.broadcast %cst_78 : f32 to vector<8x32xf32>
    %163 = arith.subf %162, %153 : vector<8x32xf32>
    %164 = arith.mulf %163, %161 : vector<8x32xf32>
    %165 = arith.mulf %153, %132 : vector<8x32xf32>
    %166 = arith.addf %164, %165 : vector<8x32xf32>
    %167 = arith.index_cast %135 : i32 to index
    %c0_79 = arith.constant 0 : index
    %168 = vector.load %arg16[%167, %c0_79] : memref<64x32xf32, #tpu.memory_space<vmem>>, vector<8x32xf32>
    tpu.vector_store %arg16[%167, %c0_79], %166 {strides = array<i32>} : memref<64x32xf32, #tpu.memory_space<vmem>>, vector<8x32xf32>,
    %c4_i32 = arith.constant 4 : i32
    %c8_i32_80 = arith.constant 8 : i32
    %169 = arith.muli %c4_i32, %c8_i32_80 : i32
    %170 = arith.index_cast %169 : i32 to index
    %c0_81 = arith.constant 0 : index
    %171 = vector.load %arg13[%170, %c0_81] : memref<64x32xf32, #tpu.memory_space<vmem>>, vector<8x32xf32>
    %cst_82 = arith.constant dense<0.000000e+00> : vector<8x32xf32>
    %172 = tpu.matmul %166, %26, %cst_82 {dimension_numbers = #tpu.dot_dimension_numbers<[1], [0], [0], [1], [0, 0, 1, 1], [], []>} : vector<8x32xf32>, vector<32x32xf32>, vector<8x32xf32> -> vector<8x32xf32>
    %173 = arith.addf %171, %172 : vector<8x32xf32>
    %174 = arith.negf %173 : vector<8x32xf32>
    %175 = math.exp %174 : vector<8x32xf32>
    %cst_83 = arith.constant 1.000000e+00 : f32
    %176 = vector.broadcast %cst_83 : f32 to vector<8x32xf32>
    %177 = arith.addf %176, %175 : vector<8x32xf32>
    %178 = arith.divf %176, %177 : vector<8x32xf32>
    %179 = arith.index_cast %169 : i32 to index
    %c0_84 = arith.constant 0 : index
    %180 = vector.load %arg14[%179, %c0_84] : memref<64x32xf32, #tpu.memory_space<vmem>>, vector<8x32xf32>
    %cst_85 = arith.constant dense<0.000000e+00> : vector<8x32xf32>
    %181 = tpu.matmul %166, %28, %cst_85 {dimension_numbers = #tpu.dot_dimension_numbers<[1], [0], [0], [1], [0, 0, 1, 1], [], []>} : vector<8x32xf32>, vector<32x32xf32>, vector<8x32xf32> -> vector<8x32xf32>
    %182 = arith.addf %180, %181 : vector<8x32xf32>
    %183 = arith.negf %182 : vector<8x32xf32>
    %184 = math.exp %183 : vector<8x32xf32>
    %cst_86 = arith.constant 1.000000e+00 : f32
    %185 = vector.broadcast %cst_86 : f32 to vector<8x32xf32>
    %186 = arith.addf %185, %184 : vector<8x32xf32>
    %187 = arith.divf %185, %186 : vector<8x32xf32>
    %188 = arith.index_cast %169 : i32 to index
    %c0_87 = arith.constant 0 : index
    %189 = vector.load %arg15[%188, %c0_87] : memref<64x32xf32, #tpu.memory_space<vmem>>, vector<8x32xf32>
    %cst_88 = arith.constant dense<0.000000e+00> : vector<8x32xf32>
    %190 = tpu.matmul %166, %30, %cst_88 {dimension_numbers = #tpu.dot_dimension_numbers<[1], [0], [0], [1], [0, 0, 1, 1], [], []>} : vector<8x32xf32>, vector<32x32xf32>, vector<8x32xf32> -> vector<8x32xf32>
    %191 = vector.broadcast %31 : vector<1x32xf32> to vector<8x32xf32>
    %192 = arith.addf %190, %191 : vector<8x32xf32>
    %193 = arith.mulf %178, %192 : vector<8x32xf32>
    %194 = arith.addf %189, %193 : vector<8x32xf32>
    %195 = math.tanh %194 : vector<8x32xf32>
    %cst_89 = arith.constant 1.000000e+00 : f32
    %196 = vector.broadcast %cst_89 : f32 to vector<8x32xf32>
    %197 = arith.subf %196, %187 : vector<8x32xf32>
    %198 = arith.mulf %197, %195 : vector<8x32xf32>
    %199 = arith.mulf %187, %166 : vector<8x32xf32>
    %200 = arith.addf %198, %199 : vector<8x32xf32>
    %201 = arith.index_cast %169 : i32 to index
    %c0_90 = arith.constant 0 : index
    %202 = vector.load %arg16[%201, %c0_90] : memref<64x32xf32, #tpu.memory_space<vmem>>, vector<8x32xf32>
    tpu.vector_store %arg16[%201, %c0_90], %200 {strides = array<i32>} : memref<64x32xf32, #tpu.memory_space<vmem>>, vector<8x32xf32>,
    %c5_i32 = arith.constant 5 : i32
    %c8_i32_91 = arith.constant 8 : i32
    %203 = arith.muli %c5_i32, %c8_i32_91 : i32
    %204 = arith.index_cast %203 : i32 to index
    %c0_92 = arith.constant 0 : index
    %205 = vector.load %arg13[%204, %c0_92] : memref<64x32xf32, #tpu.memory_space<vmem>>, vector<8x32xf32>
    %cst_93 = arith.constant dense<0.000000e+00> : vector<8x32xf32>
    %206 = tpu.matmul %200, %26, %cst_93 {dimension_numbers = #tpu.dot_dimension_numbers<[1], [0], [0], [1], [0, 0, 1, 1], [], []>} : vector<8x32xf32>, vector<32x32xf32>, vector<8x32xf32> -> vector<8x32xf32>
    %207 = arith.addf %205, %206 : vector<8x32xf32>
    %208 = arith.negf %207 : vector<8x32xf32>
    %209 = math.exp %208 : vector<8x32xf32>
    %cst_94 = arith.constant 1.000000e+00 : f32
    %210 = vector.broadcast %cst_94 : f32 to vector<8x32xf32>
    %211 = arith.addf %210, %209 : vector<8x32xf32>
    %212 = arith.divf %210, %211 : vector<8x32xf32>
    %213 = arith.index_cast %203 : i32 to index
    %c0_95 = arith.constant 0 : index
    %214 = vector.load %arg14[%213, %c0_95] : memref<64x32xf32, #tpu.memory_space<vmem>>, vector<8x32xf32>
    %cst_96 = arith.constant dense<0.000000e+00> : vector<8x32xf32>
    %215 = tpu.matmul %200, %28, %cst_96 {dimension_numbers = #tpu.dot_dimension_numbers<[1], [0], [0], [1], [0, 0, 1, 1], [], []>} : vector<8x32xf32>, vector<32x32xf32>, vector<8x32xf32> -> vector<8x32xf32>
    %216 = arith.addf %214, %215 : vector<8x32xf32>
    %217 = arith.negf %216 : vector<8x32xf32>
    %218 = math.exp %217 : vector<8x32xf32>
    %cst_97 = arith.constant 1.000000e+00 : f32
    %219 = vector.broadcast %cst_97 : f32 to vector<8x32xf32>
    %220 = arith.addf %219, %218 : vector<8x32xf32>
    %221 = arith.divf %219, %220 : vector<8x32xf32>
    %222 = arith.index_cast %203 : i32 to index
    %c0_98 = arith.constant 0 : index
    %223 = vector.load %arg15[%222, %c0_98] : memref<64x32xf32, #tpu.memory_space<vmem>>, vector<8x32xf32>
    %cst_99 = arith.constant dense<0.000000e+00> : vector<8x32xf32>
    %224 = tpu.matmul %200, %30, %cst_99 {dimension_numbers = #tpu.dot_dimension_numbers<[1], [0], [0], [1], [0, 0, 1, 1], [], []>} : vector<8x32xf32>, vector<32x32xf32>, vector<8x32xf32> -> vector<8x32xf32>
    %225 = vector.broadcast %31 : vector<1x32xf32> to vector<8x32xf32>
    %226 = arith.addf %224, %225 : vector<8x32xf32>
    %227 = arith.mulf %212, %226 : vector<8x32xf32>
    %228 = arith.addf %223, %227 : vector<8x32xf32>
    %229 = math.tanh %228 : vector<8x32xf32>
    %cst_100 = arith.constant 1.000000e+00 : f32
    %230 = vector.broadcast %cst_100 : f32 to vector<8x32xf32>
    %231 = arith.subf %230, %221 : vector<8x32xf32>
    %232 = arith.mulf %231, %229 : vector<8x32xf32>
    %233 = arith.mulf %221, %200 : vector<8x32xf32>
    %234 = arith.addf %232, %233 : vector<8x32xf32>
    %235 = arith.index_cast %203 : i32 to index
    %c0_101 = arith.constant 0 : index
    %236 = vector.load %arg16[%235, %c0_101] : memref<64x32xf32, #tpu.memory_space<vmem>>, vector<8x32xf32>
    tpu.vector_store %arg16[%235, %c0_101], %234 {strides = array<i32>} : memref<64x32xf32, #tpu.memory_space<vmem>>, vector<8x32xf32>,
    %c6_i32 = arith.constant 6 : i32
    %c8_i32_102 = arith.constant 8 : i32
    %237 = arith.muli %c6_i32, %c8_i32_102 : i32
    %238 = arith.index_cast %237 : i32 to index
    %c0_103 = arith.constant 0 : index
    %239 = vector.load %arg13[%238, %c0_103] : memref<64x32xf32, #tpu.memory_space<vmem>>, vector<8x32xf32>
    %cst_104 = arith.constant dense<0.000000e+00> : vector<8x32xf32>
    %240 = tpu.matmul %234, %26, %cst_104 {dimension_numbers = #tpu.dot_dimension_numbers<[1], [0], [0], [1], [0, 0, 1, 1], [], []>} : vector<8x32xf32>, vector<32x32xf32>, vector<8x32xf32> -> vector<8x32xf32>
    %241 = arith.addf %239, %240 : vector<8x32xf32>
    %242 = arith.negf %241 : vector<8x32xf32>
    %243 = math.exp %242 : vector<8x32xf32>
    %cst_105 = arith.constant 1.000000e+00 : f32
    %244 = vector.broadcast %cst_105 : f32 to vector<8x32xf32>
    %245 = arith.addf %244, %243 : vector<8x32xf32>
    %246 = arith.divf %244, %245 : vector<8x32xf32>
    %247 = arith.index_cast %237 : i32 to index
    %c0_106 = arith.constant 0 : index
    %248 = vector.load %arg14[%247, %c0_106] : memref<64x32xf32, #tpu.memory_space<vmem>>, vector<8x32xf32>
    %cst_107 = arith.constant dense<0.000000e+00> : vector<8x32xf32>
    %249 = tpu.matmul %234, %28, %cst_107 {dimension_numbers = #tpu.dot_dimension_numbers<[1], [0], [0], [1], [0, 0, 1, 1], [], []>} : vector<8x32xf32>, vector<32x32xf32>, vector<8x32xf32> -> vector<8x32xf32>
    %250 = arith.addf %248, %249 : vector<8x32xf32>
    %251 = arith.negf %250 : vector<8x32xf32>
    %252 = math.exp %251 : vector<8x32xf32>
    %cst_108 = arith.constant 1.000000e+00 : f32
    %253 = vector.broadcast %cst_108 : f32 to vector<8x32xf32>
    %254 = arith.addf %253, %252 : vector<8x32xf32>
    %255 = arith.divf %253, %254 : vector<8x32xf32>
    %256 = arith.index_cast %237 : i32 to index
    %c0_109 = arith.constant 0 : index
    %257 = vector.load %arg15[%256, %c0_109] : memref<64x32xf32, #tpu.memory_space<vmem>>, vector<8x32xf32>
    %cst_110 = arith.constant dense<0.000000e+00> : vector<8x32xf32>
    %258 = tpu.matmul %234, %30, %cst_110 {dimension_numbers = #tpu.dot_dimension_numbers<[1], [0], [0], [1], [0, 0, 1, 1], [], []>} : vector<8x32xf32>, vector<32x32xf32>, vector<8x32xf32> -> vector<8x32xf32>
    %259 = vector.broadcast %31 : vector<1x32xf32> to vector<8x32xf32>
    %260 = arith.addf %258, %259 : vector<8x32xf32>
    %261 = arith.mulf %246, %260 : vector<8x32xf32>
    %262 = arith.addf %257, %261 : vector<8x32xf32>
    %263 = math.tanh %262 : vector<8x32xf32>
    %cst_111 = arith.constant 1.000000e+00 : f32
    %264 = vector.broadcast %cst_111 : f32 to vector<8x32xf32>
    %265 = arith.subf %264, %255 : vector<8x32xf32>
    %266 = arith.mulf %265, %263 : vector<8x32xf32>
    %267 = arith.mulf %255, %234 : vector<8x32xf32>
    %268 = arith.addf %266, %267 : vector<8x32xf32>
    %269 = arith.index_cast %237 : i32 to index
    %c0_112 = arith.constant 0 : index
    %270 = vector.load %arg16[%269, %c0_112] : memref<64x32xf32, #tpu.memory_space<vmem>>, vector<8x32xf32>
    tpu.vector_store %arg16[%269, %c0_112], %268 {strides = array<i32>} : memref<64x32xf32, #tpu.memory_space<vmem>>, vector<8x32xf32>,
    %c7_i32 = arith.constant 7 : i32
    %c8_i32_113 = arith.constant 8 : i32
    %271 = arith.muli %c7_i32, %c8_i32_113 : i32
    %272 = arith.index_cast %271 : i32 to index
    %c0_114 = arith.constant 0 : index
    %273 = vector.load %arg13[%272, %c0_114] : memref<64x32xf32, #tpu.memory_space<vmem>>, vector<8x32xf32>
    %cst_115 = arith.constant dense<0.000000e+00> : vector<8x32xf32>
    %274 = tpu.matmul %268, %26, %cst_115 {dimension_numbers = #tpu.dot_dimension_numbers<[1], [0], [0], [1], [0, 0, 1, 1], [], []>} : vector<8x32xf32>, vector<32x32xf32>, vector<8x32xf32> -> vector<8x32xf32>
    %275 = arith.addf %273, %274 : vector<8x32xf32>
    %276 = arith.negf %275 : vector<8x32xf32>
    %277 = math.exp %276 : vector<8x32xf32>
    %cst_116 = arith.constant 1.000000e+00 : f32
    %278 = vector.broadcast %cst_116 : f32 to vector<8x32xf32>
    %279 = arith.addf %278, %277 : vector<8x32xf32>
    %280 = arith.divf %278, %279 : vector<8x32xf32>
    %281 = arith.index_cast %271 : i32 to index
    %c0_117 = arith.constant 0 : index
    %282 = vector.load %arg14[%281, %c0_117] : memref<64x32xf32, #tpu.memory_space<vmem>>, vector<8x32xf32>
    %cst_118 = arith.constant dense<0.000000e+00> : vector<8x32xf32>
    %283 = tpu.matmul %268, %28, %cst_118 {dimension_numbers = #tpu.dot_dimension_numbers<[1], [0], [0], [1], [0, 0, 1, 1], [], []>} : vector<8x32xf32>, vector<32x32xf32>, vector<8x32xf32> -> vector<8x32xf32>
    %284 = arith.addf %282, %283 : vector<8x32xf32>
    %285 = arith.negf %284 : vector<8x32xf32>
    %286 = math.exp %285 : vector<8x32xf32>
    %cst_119 = arith.constant 1.000000e+00 : f32
    %287 = vector.broadcast %cst_119 : f32 to vector<8x32xf32>
    %288 = arith.addf %287, %286 : vector<8x32xf32>
    %289 = arith.divf %287, %288 : vector<8x32xf32>
    %290 = arith.index_cast %271 : i32 to index
    %c0_120 = arith.constant 0 : index
    %291 = vector.load %arg15[%290, %c0_120] : memref<64x32xf32, #tpu.memory_space<vmem>>, vector<8x32xf32>
    %cst_121 = arith.constant dense<0.000000e+00> : vector<8x32xf32>
    %292 = tpu.matmul %268, %30, %cst_121 {dimension_numbers = #tpu.dot_dimension_numbers<[1], [0], [0], [1], [0, 0, 1, 1], [], []>} : vector<8x32xf32>, vector<32x32xf32>, vector<8x32xf32> -> vector<8x32xf32>
    %293 = vector.broadcast %31 : vector<1x32xf32> to vector<8x32xf32>
    %294 = arith.addf %292, %293 : vector<8x32xf32>
    %295 = arith.mulf %280, %294 : vector<8x32xf32>
    %296 = arith.addf %291, %295 : vector<8x32xf32>
    %297 = math.tanh %296 : vector<8x32xf32>
    %cst_122 = arith.constant 1.000000e+00 : f32
    %298 = vector.broadcast %cst_122 : f32 to vector<8x32xf32>
    %299 = arith.subf %298, %289 : vector<8x32xf32>
    %300 = arith.mulf %299, %297 : vector<8x32xf32>
    %301 = arith.mulf %289, %268 : vector<8x32xf32>
    %302 = arith.addf %300, %301 : vector<8x32xf32>
    %303 = arith.index_cast %271 : i32 to index
    %c0_123 = arith.constant 0 : index
    %304 = vector.load %arg16[%303, %c0_123] : memref<64x32xf32, #tpu.memory_space<vmem>>, vector<8x32xf32>
    tpu.vector_store %arg16[%303, %c0_123], %302 {strides = array<i32>} : memref<64x32xf32, #tpu.memory_space<vmem>>, vector<8x32xf32>,
    %c8_i32_124 = arith.constant 8 : i32
    %c0_125 = arith.constant 0 : index
    %c0_126 = arith.constant 0 : index
    %305 = vector.load %arg16[%c0_125, %c0_126] : memref<64x32xf32, #tpu.memory_space<vmem>>, vector<64x32xf32>
    %c0_127 = arith.constant 0 : index
    %c0_128 = arith.constant 0 : index
    %c0_129 = arith.constant 0 : index
    %306 = vector.load %arg6[%c0_127, %c0_128, %c0_129] : memref<3x32x32xf32, #tpu.memory_space<vmem>>, vector<1x32x32xf32>
    %307 = vector.shape_cast %306 : vector<1x32x32xf32> to vector<32x32xf32>
    %cst_130 = arith.constant dense<0.000000e+00> : vector<64x32xf32>
    %308 = tpu.matmul %305, %307, %cst_130 {dimension_numbers = #tpu.dot_dimension_numbers<[1], [0], [0], [1], [0, 0, 1, 1], [], []>} : vector<64x32xf32>, vector<32x32xf32>, vector<64x32xf32> -> vector<64x32xf32>
    %c0_131 = arith.constant 0 : index
    %c0_132 = arith.constant 0 : index
    %c0_133 = arith.constant 0 : index
    %309 = vector.load %arg7[%c0_131, %c0_132, %c0_133] : memref<3x1x32xf32, #tpu.memory_space<vmem>>, vector<1x1x32xf32>
    %310 = vector.shape_cast %309 : vector<1x1x32xf32> to vector<1x32xf32>
    %311 = vector.broadcast %310 : vector<1x32xf32> to vector<64x32xf32>
    %312 = arith.addf %308, %311 : vector<64x32xf32>
    %c0_134 = arith.constant 0 : index
    %c0_135 = arith.constant 0 : index
    %313 = vector.load %arg13[%c0_134, %c0_135] : memref<64x32xf32, #tpu.memory_space<vmem>>, vector<64x32xf32>
    tpu.vector_store %arg13[%c0_134, %c0_135], %312 {strides = array<i32>} : memref<64x32xf32, #tpu.memory_space<vmem>>, vector<64x32xf32>,
    %c1_136 = arith.constant 1 : index
    %c0_137 = arith.constant 0 : index
    %c0_138 = arith.constant 0 : index
    %314 = vector.load %arg6[%c1_136, %c0_137, %c0_138] : memref<3x32x32xf32, #tpu.memory_space<vmem>>, vector<1x32x32xf32>
    %315 = vector.shape_cast %314 : vector<1x32x32xf32> to vector<32x32xf32>
    %cst_139 = arith.constant dense<0.000000e+00> : vector<64x32xf32>
    %316 = tpu.matmul %305, %315, %cst_139 {dimension_numbers = #tpu.dot_dimension_numbers<[1], [0], [0], [1], [0, 0, 1, 1], [], []>} : vector<64x32xf32>, vector<32x32xf32>, vector<64x32xf32> -> vector<64x32xf32>
    %c1_140 = arith.constant 1 : index
    %c0_141 = arith.constant 0 : index
    %c0_142 = arith.constant 0 : index
    %317 = vector.load %arg7[%c1_140, %c0_141, %c0_142] : memref<3x1x32xf32, #tpu.memory_space<vmem>>, vector<1x1x32xf32>
    %318 = vector.shape_cast %317 : vector<1x1x32xf32> to vector<1x32xf32>
    %319 = vector.broadcast %318 : vector<1x32xf32> to vector<64x32xf32>
    %320 = arith.addf %316, %319 : vector<64x32xf32>
    %c0_143 = arith.constant 0 : index
    %c0_144 = arith.constant 0 : index
    %321 = vector.load %arg14[%c0_143, %c0_144] : memref<64x32xf32, #tpu.memory_space<vmem>>, vector<64x32xf32>
    tpu.vector_store %arg14[%c0_143, %c0_144], %320 {strides = array<i32>} : memref<64x32xf32, #tpu.memory_space<vmem>>, vector<64x32xf32>,
    %c2_145 = arith.constant 2 : index
    %c0_146 = arith.constant 0 : index
    %c0_147 = arith.constant 0 : index
    %322 = vector.load %arg6[%c2_145, %c0_146, %c0_147] : memref<3x32x32xf32, #tpu.memory_space<vmem>>, vector<1x32x32xf32>
    %323 = vector.shape_cast %322 : vector<1x32x32xf32> to vector<32x32xf32>
    %cst_148 = arith.constant dense<0.000000e+00> : vector<64x32xf32>
    %324 = tpu.matmul %305, %323, %cst_148 {dimension_numbers = #tpu.dot_dimension_numbers<[1], [0], [0], [1], [0, 0, 1, 1], [], []>} : vector<64x32xf32>, vector<32x32xf32>, vector<64x32xf32> -> vector<64x32xf32>
    %c2_149 = arith.constant 2 : index
    %c0_150 = arith.constant 0 : index
    %c0_151 = arith.constant 0 : index
    %325 = vector.load %arg7[%c2_149, %c0_150, %c0_151] : memref<3x1x32xf32, #tpu.memory_space<vmem>>, vector<1x1x32xf32>
    %326 = vector.shape_cast %325 : vector<1x1x32xf32> to vector<1x32xf32>
    %327 = vector.broadcast %326 : vector<1x32xf32> to vector<64x32xf32>
    %328 = arith.addf %324, %327 : vector<64x32xf32>
    %c0_152 = arith.constant 0 : index
    %c0_153 = arith.constant 0 : index
    %329 = vector.load %arg15[%c0_152, %c0_153] : memref<64x32xf32, #tpu.memory_space<vmem>>, vector<64x32xf32>
    tpu.vector_store %arg15[%c0_152, %c0_153], %328 {strides = array<i32>} : memref<64x32xf32, #tpu.memory_space<vmem>>, vector<64x32xf32>,
    %c0_154 = arith.constant 0 : index
    %c0_155 = arith.constant 0 : index
    %c0_156 = arith.constant 0 : index
    %330 = vector.load %arg8[%c0_154, %c0_155, %c0_156] : memref<3x32x32xf32, #tpu.memory_space<vmem>>, vector<1x32x32xf32>
    %331 = vector.shape_cast %330 : vector<1x32x32xf32> to vector<32x32xf32>
    %c1_157 = arith.constant 1 : index
    %c0_158 = arith.constant 0 : index
    %c0_159 = arith.constant 0 : index
    %332 = vector.load %arg8[%c1_157, %c0_158, %c0_159] : memref<3x32x32xf32, #tpu.memory_space<vmem>>, vector<1x32x32xf32>
    %333 = vector.shape_cast %332 : vector<1x32x32xf32> to vector<32x32xf32>
    %c2_160 = arith.constant 2 : index
    %c0_161 = arith.constant 0 : index
    %c0_162 = arith.constant 0 : index
    %334 = vector.load %arg8[%c2_160, %c0_161, %c0_162] : memref<3x32x32xf32, #tpu.memory_space<vmem>>, vector<1x32x32xf32>
    %335 = vector.shape_cast %334 : vector<1x32x32xf32> to vector<32x32xf32>
    %c0_163 = arith.constant 0 : index
    %c0_164 = arith.constant 0 : index
    %336 = vector.load %arg9[%c0_163, %c0_164] : memref<1x32xf32, #tpu.memory_space<vmem>>, vector<1x32xf32>
    %cst_165 = arith.constant 0.000000e+00 : f32
    %337 = vector.broadcast %cst_165 : f32 to vector<8x32xf32>
    %c0_i32_166 = arith.constant 0 : i32
    %c8_i32_167 = arith.constant 8 : i32
    %338 = arith.muli %c0_i32_166, %c8_i32_167 : i32
    %339 = arith.index_cast %338 : i32 to index
    %c0_168 = arith.constant 0 : index
    %340 = vector.load %arg13[%339, %c0_168] : memref<64x32xf32, #tpu.memory_space<vmem>>, vector<8x32xf32>
    %cst_169 = arith.constant dense<0.000000e+00> : vector<8x32xf32>
    %341 = tpu.matmul %337, %331, %cst_169 {dimension_numbers = #tpu.dot_dimension_numbers<[1], [0], [0], [1], [0, 0, 1, 1], [], []>} : vector<8x32xf32>, vector<32x32xf32>, vector<8x32xf32> -> vector<8x32xf32>
    %342 = arith.addf %340, %341 : vector<8x32xf32>
    %343 = arith.negf %342 : vector<8x32xf32>
    %344 = math.exp %343 : vector<8x32xf32>
    %cst_170 = arith.constant 1.000000e+00 : f32
    %345 = vector.broadcast %cst_170 : f32 to vector<8x32xf32>
    %346 = arith.addf %345, %344 : vector<8x32xf32>
    %347 = arith.divf %345, %346 : vector<8x32xf32>
    %348 = arith.index_cast %338 : i32 to index
    %c0_171 = arith.constant 0 : index
    %349 = vector.load %arg14[%348, %c0_171] : memref<64x32xf32, #tpu.memory_space<vmem>>, vector<8x32xf32>
    %cst_172 = arith.constant dense<0.000000e+00> : vector<8x32xf32>
    %350 = tpu.matmul %337, %333, %cst_172 {dimension_numbers = #tpu.dot_dimension_numbers<[1], [0], [0], [1], [0, 0, 1, 1], [], []>} : vector<8x32xf32>, vector<32x32xf32>, vector<8x32xf32> -> vector<8x32xf32>
    %351 = arith.addf %349, %350 : vector<8x32xf32>
    %352 = arith.negf %351 : vector<8x32xf32>
    %353 = math.exp %352 : vector<8x32xf32>
    %cst_173 = arith.constant 1.000000e+00 : f32
    %354 = vector.broadcast %cst_173 : f32 to vector<8x32xf32>
    %355 = arith.addf %354, %353 : vector<8x32xf32>
    %356 = arith.divf %354, %355 : vector<8x32xf32>
    %357 = arith.index_cast %338 : i32 to index
    %c0_174 = arith.constant 0 : index
    %358 = vector.load %arg15[%357, %c0_174] : memref<64x32xf32, #tpu.memory_space<vmem>>, vector<8x32xf32>
    %cst_175 = arith.constant dense<0.000000e+00> : vector<8x32xf32>
    %359 = tpu.matmul %337, %335, %cst_175 {dimension_numbers = #tpu.dot_dimension_numbers<[1], [0], [0], [1], [0, 0, 1, 1], [], []>} : vector<8x32xf32>, vector<32x32xf32>, vector<8x32xf32> -> vector<8x32xf32>
    %360 = vector.broadcast %336 : vector<1x32xf32> to vector<8x32xf32>
    %361 = arith.addf %359, %360 : vector<8x32xf32>
    %362 = arith.mulf %347, %361 : vector<8x32xf32>
    %363 = arith.addf %358, %362 : vector<8x32xf32>
    %364 = math.tanh %363 : vector<8x32xf32>
    %cst_176 = arith.constant 1.000000e+00 : f32
    %365 = vector.broadcast %cst_176 : f32 to vector<8x32xf32>
    %366 = arith.subf %365, %356 : vector<8x32xf32>
    %367 = arith.mulf %366, %364 : vector<8x32xf32>
    %368 = arith.mulf %356, %337 : vector<8x32xf32>
    %369 = arith.addf %367, %368 : vector<8x32xf32>
    %c1_i32_177 = arith.constant 1 : i32
    %c8_i32_178 = arith.constant 8 : i32
    %370 = arith.muli %c1_i32_177, %c8_i32_178 : i32
    %371 = arith.index_cast %370 : i32 to index
    %c0_179 = arith.constant 0 : index
    %372 = vector.load %arg13[%371, %c0_179] : memref<64x32xf32, #tpu.memory_space<vmem>>, vector<8x32xf32>
    %cst_180 = arith.constant dense<0.000000e+00> : vector<8x32xf32>
    %373 = tpu.matmul %369, %331, %cst_180 {dimension_numbers = #tpu.dot_dimension_numbers<[1], [0], [0], [1], [0, 0, 1, 1], [], []>} : vector<8x32xf32>, vector<32x32xf32>, vector<8x32xf32> -> vector<8x32xf32>
    %374 = arith.addf %372, %373 : vector<8x32xf32>
    %375 = arith.negf %374 : vector<8x32xf32>
    %376 = math.exp %375 : vector<8x32xf32>
    %cst_181 = arith.constant 1.000000e+00 : f32
    %377 = vector.broadcast %cst_181 : f32 to vector<8x32xf32>
    %378 = arith.addf %377, %376 : vector<8x32xf32>
    %379 = arith.divf %377, %378 : vector<8x32xf32>
    %380 = arith.index_cast %370 : i32 to index
    %c0_182 = arith.constant 0 : index
    %381 = vector.load %arg14[%380, %c0_182] : memref<64x32xf32, #tpu.memory_space<vmem>>, vector<8x32xf32>
    %cst_183 = arith.constant dense<0.000000e+00> : vector<8x32xf32>
    %382 = tpu.matmul %369, %333, %cst_183 {dimension_numbers = #tpu.dot_dimension_numbers<[1], [0], [0], [1], [0, 0, 1, 1], [], []>} : vector<8x32xf32>, vector<32x32xf32>, vector<8x32xf32> -> vector<8x32xf32>
    %383 = arith.addf %381, %382 : vector<8x32xf32>
    %384 = arith.negf %383 : vector<8x32xf32>
    %385 = math.exp %384 : vector<8x32xf32>
    %cst_184 = arith.constant 1.000000e+00 : f32
    %386 = vector.broadcast %cst_184 : f32 to vector<8x32xf32>
    %387 = arith.addf %386, %385 : vector<8x32xf32>
    %388 = arith.divf %386, %387 : vector<8x32xf32>
    %389 = arith.index_cast %370 : i32 to index
    %c0_185 = arith.constant 0 : index
    %390 = vector.load %arg15[%389, %c0_185] : memref<64x32xf32, #tpu.memory_space<vmem>>, vector<8x32xf32>
    %cst_186 = arith.constant dense<0.000000e+00> : vector<8x32xf32>
    %391 = tpu.matmul %369, %335, %cst_186 {dimension_numbers = #tpu.dot_dimension_numbers<[1], [0], [0], [1], [0, 0, 1, 1], [], []>} : vector<8x32xf32>, vector<32x32xf32>, vector<8x32xf32> -> vector<8x32xf32>
    %392 = vector.broadcast %336 : vector<1x32xf32> to vector<8x32xf32>
    %393 = arith.addf %391, %392 : vector<8x32xf32>
    %394 = arith.mulf %379, %393 : vector<8x32xf32>
    %395 = arith.addf %390, %394 : vector<8x32xf32>
    %396 = math.tanh %395 : vector<8x32xf32>
    %cst_187 = arith.constant 1.000000e+00 : f32
    %397 = vector.broadcast %cst_187 : f32 to vector<8x32xf32>
    %398 = arith.subf %397, %388 : vector<8x32xf32>
    %399 = arith.mulf %398, %396 : vector<8x32xf32>
    %400 = arith.mulf %388, %369 : vector<8x32xf32>
    %401 = arith.addf %399, %400 : vector<8x32xf32>
    %c2_i32_188 = arith.constant 2 : i32
    %c8_i32_189 = arith.constant 8 : i32
    %402 = arith.muli %c2_i32_188, %c8_i32_189 : i32
    %403 = arith.index_cast %402 : i32 to index
    %c0_190 = arith.constant 0 : index
    %404 = vector.load %arg13[%403, %c0_190] : memref<64x32xf32, #tpu.memory_space<vmem>>, vector<8x32xf32>
    %cst_191 = arith.constant dense<0.000000e+00> : vector<8x32xf32>
    %405 = tpu.matmul %401, %331, %cst_191 {dimension_numbers = #tpu.dot_dimension_numbers<[1], [0], [0], [1], [0, 0, 1, 1], [], []>} : vector<8x32xf32>, vector<32x32xf32>, vector<8x32xf32> -> vector<8x32xf32>
    %406 = arith.addf %404, %405 : vector<8x32xf32>
    %407 = arith.negf %406 : vector<8x32xf32>
    %408 = math.exp %407 : vector<8x32xf32>
    %cst_192 = arith.constant 1.000000e+00 : f32
    %409 = vector.broadcast %cst_192 : f32 to vector<8x32xf32>
    %410 = arith.addf %409, %408 : vector<8x32xf32>
    %411 = arith.divf %409, %410 : vector<8x32xf32>
    %412 = arith.index_cast %402 : i32 to index
    %c0_193 = arith.constant 0 : index
    %413 = vector.load %arg14[%412, %c0_193] : memref<64x32xf32, #tpu.memory_space<vmem>>, vector<8x32xf32>
    %cst_194 = arith.constant dense<0.000000e+00> : vector<8x32xf32>
    %414 = tpu.matmul %401, %333, %cst_194 {dimension_numbers = #tpu.dot_dimension_numbers<[1], [0], [0], [1], [0, 0, 1, 1], [], []>} : vector<8x32xf32>, vector<32x32xf32>, vector<8x32xf32> -> vector<8x32xf32>
    %415 = arith.addf %413, %414 : vector<8x32xf32>
    %416 = arith.negf %415 : vector<8x32xf32>
    %417 = math.exp %416 : vector<8x32xf32>
    %cst_195 = arith.constant 1.000000e+00 : f32
    %418 = vector.broadcast %cst_195 : f32 to vector<8x32xf32>
    %419 = arith.addf %418, %417 : vector<8x32xf32>
    %420 = arith.divf %418, %419 : vector<8x32xf32>
    %421 = arith.index_cast %402 : i32 to index
    %c0_196 = arith.constant 0 : index
    %422 = vector.load %arg15[%421, %c0_196] : memref<64x32xf32, #tpu.memory_space<vmem>>, vector<8x32xf32>
    %cst_197 = arith.constant dense<0.000000e+00> : vector<8x32xf32>
    %423 = tpu.matmul %401, %335, %cst_197 {dimension_numbers = #tpu.dot_dimension_numbers<[1], [0], [0], [1], [0, 0, 1, 1], [], []>} : vector<8x32xf32>, vector<32x32xf32>, vector<8x32xf32> -> vector<8x32xf32>
    %424 = vector.broadcast %336 : vector<1x32xf32> to vector<8x32xf32>
    %425 = arith.addf %423, %424 : vector<8x32xf32>
    %426 = arith.mulf %411, %425 : vector<8x32xf32>
    %427 = arith.addf %422, %426 : vector<8x32xf32>
    %428 = math.tanh %427 : vector<8x32xf32>
    %cst_198 = arith.constant 1.000000e+00 : f32
    %429 = vector.broadcast %cst_198 : f32 to vector<8x32xf32>
    %430 = arith.subf %429, %420 : vector<8x32xf32>
    %431 = arith.mulf %430, %428 : vector<8x32xf32>
    %432 = arith.mulf %420, %401 : vector<8x32xf32>
    %433 = arith.addf %431, %432 : vector<8x32xf32>
    %c3_i32_199 = arith.constant 3 : i32
    %c8_i32_200 = arith.constant 8 : i32
    %434 = arith.muli %c3_i32_199, %c8_i32_200 : i32
    %435 = arith.index_cast %434 : i32 to index
    %c0_201 = arith.constant 0 : index
    %436 = vector.load %arg13[%435, %c0_201] : memref<64x32xf32, #tpu.memory_space<vmem>>, vector<8x32xf32>
    %cst_202 = arith.constant dense<0.000000e+00> : vector<8x32xf32>
    %437 = tpu.matmul %433, %331, %cst_202 {dimension_numbers = #tpu.dot_dimension_numbers<[1], [0], [0], [1], [0, 0, 1, 1], [], []>} : vector<8x32xf32>, vector<32x32xf32>, vector<8x32xf32> -> vector<8x32xf32>
    %438 = arith.addf %436, %437 : vector<8x32xf32>
    %439 = arith.negf %438 : vector<8x32xf32>
    %440 = math.exp %439 : vector<8x32xf32>
    %cst_203 = arith.constant 1.000000e+00 : f32
    %441 = vector.broadcast %cst_203 : f32 to vector<8x32xf32>
    %442 = arith.addf %441, %440 : vector<8x32xf32>
    %443 = arith.divf %441, %442 : vector<8x32xf32>
    %444 = arith.index_cast %434 : i32 to index
    %c0_204 = arith.constant 0 : index
    %445 = vector.load %arg14[%444, %c0_204] : memref<64x32xf32, #tpu.memory_space<vmem>>, vector<8x32xf32>
    %cst_205 = arith.constant dense<0.000000e+00> : vector<8x32xf32>
    %446 = tpu.matmul %433, %333, %cst_205 {dimension_numbers = #tpu.dot_dimension_numbers<[1], [0], [0], [1], [0, 0, 1, 1], [], []>} : vector<8x32xf32>, vector<32x32xf32>, vector<8x32xf32> -> vector<8x32xf32>
    %447 = arith.addf %445, %446 : vector<8x32xf32>
    %448 = arith.negf %447 : vector<8x32xf32>
    %449 = math.exp %448 : vector<8x32xf32>
    %cst_206 = arith.constant 1.000000e+00 : f32
    %450 = vector.broadcast %cst_206 : f32 to vector<8x32xf32>
    %451 = arith.addf %450, %449 : vector<8x32xf32>
    %452 = arith.divf %450, %451 : vector<8x32xf32>
    %453 = arith.index_cast %434 : i32 to index
    %c0_207 = arith.constant 0 : index
    %454 = vector.load %arg15[%453, %c0_207] : memref<64x32xf32, #tpu.memory_space<vmem>>, vector<8x32xf32>
    %cst_208 = arith.constant dense<0.000000e+00> : vector<8x32xf32>
    %455 = tpu.matmul %433, %335, %cst_208 {dimension_numbers = #tpu.dot_dimension_numbers<[1], [0], [0], [1], [0, 0, 1, 1], [], []>} : vector<8x32xf32>, vector<32x32xf32>, vector<8x32xf32> -> vector<8x32xf32>
    %456 = vector.broadcast %336 : vector<1x32xf32> to vector<8x32xf32>
    %457 = arith.addf %455, %456 : vector<8x32xf32>
    %458 = arith.mulf %443, %457 : vector<8x32xf32>
    %459 = arith.addf %454, %458 : vector<8x32xf32>
    %460 = math.tanh %459 : vector<8x32xf32>
    %cst_209 = arith.constant 1.000000e+00 : f32
    %461 = vector.broadcast %cst_209 : f32 to vector<8x32xf32>
    %462 = arith.subf %461, %452 : vector<8x32xf32>
    %463 = arith.mulf %462, %460 : vector<8x32xf32>
    %464 = arith.mulf %452, %433 : vector<8x32xf32>
    %465 = arith.addf %463, %464 : vector<8x32xf32>
    %c4_i32_210 = arith.constant 4 : i32
    %c8_i32_211 = arith.constant 8 : i32
    %466 = arith.muli %c4_i32_210, %c8_i32_211 : i32
    %467 = arith.index_cast %466 : i32 to index
    %c0_212 = arith.constant 0 : index
    %468 = vector.load %arg13[%467, %c0_212] : memref<64x32xf32, #tpu.memory_space<vmem>>, vector<8x32xf32>
    %cst_213 = arith.constant dense<0.000000e+00> : vector<8x32xf32>
    %469 = tpu.matmul %465, %331, %cst_213 {dimension_numbers = #tpu.dot_dimension_numbers<[1], [0], [0], [1], [0, 0, 1, 1], [], []>} : vector<8x32xf32>, vector<32x32xf32>, vector<8x32xf32> -> vector<8x32xf32>
    %470 = arith.addf %468, %469 : vector<8x32xf32>
    %471 = arith.negf %470 : vector<8x32xf32>
    %472 = math.exp %471 : vector<8x32xf32>
    %cst_214 = arith.constant 1.000000e+00 : f32
    %473 = vector.broadcast %cst_214 : f32 to vector<8x32xf32>
    %474 = arith.addf %473, %472 : vector<8x32xf32>
    %475 = arith.divf %473, %474 : vector<8x32xf32>
    %476 = arith.index_cast %466 : i32 to index
    %c0_215 = arith.constant 0 : index
    %477 = vector.load %arg14[%476, %c0_215] : memref<64x32xf32, #tpu.memory_space<vmem>>, vector<8x32xf32>
    %cst_216 = arith.constant dense<0.000000e+00> : vector<8x32xf32>
    %478 = tpu.matmul %465, %333, %cst_216 {dimension_numbers = #tpu.dot_dimension_numbers<[1], [0], [0], [1], [0, 0, 1, 1], [], []>} : vector<8x32xf32>, vector<32x32xf32>, vector<8x32xf32> -> vector<8x32xf32>
    %479 = arith.addf %477, %478 : vector<8x32xf32>
    %480 = arith.negf %479 : vector<8x32xf32>
    %481 = math.exp %480 : vector<8x32xf32>
    %cst_217 = arith.constant 1.000000e+00 : f32
    %482 = vector.broadcast %cst_217 : f32 to vector<8x32xf32>
    %483 = arith.addf %482, %481 : vector<8x32xf32>
    %484 = arith.divf %482, %483 : vector<8x32xf32>
    %485 = arith.index_cast %466 : i32 to index
    %c0_218 = arith.constant 0 : index
    %486 = vector.load %arg15[%485, %c0_218] : memref<64x32xf32, #tpu.memory_space<vmem>>, vector<8x32xf32>
    %cst_219 = arith.constant dense<0.000000e+00> : vector<8x32xf32>
    %487 = tpu.matmul %465, %335, %cst_219 {dimension_numbers = #tpu.dot_dimension_numbers<[1], [0], [0], [1], [0, 0, 1, 1], [], []>} : vector<8x32xf32>, vector<32x32xf32>, vector<8x32xf32> -> vector<8x32xf32>
    %488 = vector.broadcast %336 : vector<1x32xf32> to vector<8x32xf32>
    %489 = arith.addf %487, %488 : vector<8x32xf32>
    %490 = arith.mulf %475, %489 : vector<8x32xf32>
    %491 = arith.addf %486, %490 : vector<8x32xf32>
    %492 = math.tanh %491 : vector<8x32xf32>
    %cst_220 = arith.constant 1.000000e+00 : f32
    %493 = vector.broadcast %cst_220 : f32 to vector<8x32xf32>
    %494 = arith.subf %493, %484 : vector<8x32xf32>
    %495 = arith.mulf %494, %492 : vector<8x32xf32>
    %496 = arith.mulf %484, %465 : vector<8x32xf32>
    %497 = arith.addf %495, %496 : vector<8x32xf32>
    %c5_i32_221 = arith.constant 5 : i32
    %c8_i32_222 = arith.constant 8 : i32
    %498 = arith.muli %c5_i32_221, %c8_i32_222 : i32
    %499 = arith.index_cast %498 : i32 to index
    %c0_223 = arith.constant 0 : index
    %500 = vector.load %arg13[%499, %c0_223] : memref<64x32xf32, #tpu.memory_space<vmem>>, vector<8x32xf32>
    %cst_224 = arith.constant dense<0.000000e+00> : vector<8x32xf32>
    %501 = tpu.matmul %497, %331, %cst_224 {dimension_numbers = #tpu.dot_dimension_numbers<[1], [0], [0], [1], [0, 0, 1, 1], [], []>} : vector<8x32xf32>, vector<32x32xf32>, vector<8x32xf32> -> vector<8x32xf32>
    %502 = arith.addf %500, %501 : vector<8x32xf32>
    %503 = arith.negf %502 : vector<8x32xf32>
    %504 = math.exp %503 : vector<8x32xf32>
    %cst_225 = arith.constant 1.000000e+00 : f32
    %505 = vector.broadcast %cst_225 : f32 to vector<8x32xf32>
    %506 = arith.addf %505, %504 : vector<8x32xf32>
    %507 = arith.divf %505, %506 : vector<8x32xf32>
    %508 = arith.index_cast %498 : i32 to index
    %c0_226 = arith.constant 0 : index
    %509 = vector.load %arg14[%508, %c0_226] : memref<64x32xf32, #tpu.memory_space<vmem>>, vector<8x32xf32>
    %cst_227 = arith.constant dense<0.000000e+00> : vector<8x32xf32>
    %510 = tpu.matmul %497, %333, %cst_227 {dimension_numbers = #tpu.dot_dimension_numbers<[1], [0], [0], [1], [0, 0, 1, 1], [], []>} : vector<8x32xf32>, vector<32x32xf32>, vector<8x32xf32> -> vector<8x32xf32>
    %511 = arith.addf %509, %510 : vector<8x32xf32>
    %512 = arith.negf %511 : vector<8x32xf32>
    %513 = math.exp %512 : vector<8x32xf32>
    %cst_228 = arith.constant 1.000000e+00 : f32
    %514 = vector.broadcast %cst_228 : f32 to vector<8x32xf32>
    %515 = arith.addf %514, %513 : vector<8x32xf32>
    %516 = arith.divf %514, %515 : vector<8x32xf32>
    %517 = arith.index_cast %498 : i32 to index
    %c0_229 = arith.constant 0 : index
    %518 = vector.load %arg15[%517, %c0_229] : memref<64x32xf32, #tpu.memory_space<vmem>>, vector<8x32xf32>
    %cst_230 = arith.constant dense<0.000000e+00> : vector<8x32xf32>
    %519 = tpu.matmul %497, %335, %cst_230 {dimension_numbers = #tpu.dot_dimension_numbers<[1], [0], [0], [1], [0, 0, 1, 1], [], []>} : vector<8x32xf32>, vector<32x32xf32>, vector<8x32xf32> -> vector<8x32xf32>
    %520 = vector.broadcast %336 : vector<1x32xf32> to vector<8x32xf32>
    %521 = arith.addf %519, %520 : vector<8x32xf32>
    %522 = arith.mulf %507, %521 : vector<8x32xf32>
    %523 = arith.addf %518, %522 : vector<8x32xf32>
    %524 = math.tanh %523 : vector<8x32xf32>
    %cst_231 = arith.constant 1.000000e+00 : f32
    %525 = vector.broadcast %cst_231 : f32 to vector<8x32xf32>
    %526 = arith.subf %525, %516 : vector<8x32xf32>
    %527 = arith.mulf %526, %524 : vector<8x32xf32>
    %528 = arith.mulf %516, %497 : vector<8x32xf32>
    %529 = arith.addf %527, %528 : vector<8x32xf32>
    %c6_i32_232 = arith.constant 6 : i32
    %c8_i32_233 = arith.constant 8 : i32
    %530 = arith.muli %c6_i32_232, %c8_i32_233 : i32
    %531 = arith.index_cast %530 : i32 to index
    %c0_234 = arith.constant 0 : index
    %532 = vector.load %arg13[%531, %c0_234] : memref<64x32xf32, #tpu.memory_space<vmem>>, vector<8x32xf32>
    %cst_235 = arith.constant dense<0.000000e+00> : vector<8x32xf32>
    %533 = tpu.matmul %529, %331, %cst_235 {dimension_numbers = #tpu.dot_dimension_numbers<[1], [0], [0], [1], [0, 0, 1, 1], [], []>} : vector<8x32xf32>, vector<32x32xf32>, vector<8x32xf32> -> vector<8x32xf32>
    %534 = arith.addf %532, %533 : vector<8x32xf32>
    %535 = arith.negf %534 : vector<8x32xf32>
    %536 = math.exp %535 : vector<8x32xf32>
    %cst_236 = arith.constant 1.000000e+00 : f32
    %537 = vector.broadcast %cst_236 : f32 to vector<8x32xf32>
    %538 = arith.addf %537, %536 : vector<8x32xf32>
    %539 = arith.divf %537, %538 : vector<8x32xf32>
    %540 = arith.index_cast %530 : i32 to index
    %c0_237 = arith.constant 0 : index
    %541 = vector.load %arg14[%540, %c0_237] : memref<64x32xf32, #tpu.memory_space<vmem>>, vector<8x32xf32>
    %cst_238 = arith.constant dense<0.000000e+00> : vector<8x32xf32>
    %542 = tpu.matmul %529, %333, %cst_238 {dimension_numbers = #tpu.dot_dimension_numbers<[1], [0], [0], [1], [0, 0, 1, 1], [], []>} : vector<8x32xf32>, vector<32x32xf32>, vector<8x32xf32> -> vector<8x32xf32>
    %543 = arith.addf %541, %542 : vector<8x32xf32>
    %544 = arith.negf %543 : vector<8x32xf32>
    %545 = math.exp %544 : vector<8x32xf32>
    %cst_239 = arith.constant 1.000000e+00 : f32
    %546 = vector.broadcast %cst_239 : f32 to vector<8x32xf32>
    %547 = arith.addf %546, %545 : vector<8x32xf32>
    %548 = arith.divf %546, %547 : vector<8x32xf32>
    %549 = arith.index_cast %530 : i32 to index
    %c0_240 = arith.constant 0 : index
    %550 = vector.load %arg15[%549, %c0_240] : memref<64x32xf32, #tpu.memory_space<vmem>>, vector<8x32xf32>
    %cst_241 = arith.constant dense<0.000000e+00> : vector<8x32xf32>
    %551 = tpu.matmul %529, %335, %cst_241 {dimension_numbers = #tpu.dot_dimension_numbers<[1], [0], [0], [1], [0, 0, 1, 1], [], []>} : vector<8x32xf32>, vector<32x32xf32>, vector<8x32xf32> -> vector<8x32xf32>
    %552 = vector.broadcast %336 : vector<1x32xf32> to vector<8x32xf32>
    %553 = arith.addf %551, %552 : vector<8x32xf32>
    %554 = arith.mulf %539, %553 : vector<8x32xf32>
    %555 = arith.addf %550, %554 : vector<8x32xf32>
    %556 = math.tanh %555 : vector<8x32xf32>
    %cst_242 = arith.constant 1.000000e+00 : f32
    %557 = vector.broadcast %cst_242 : f32 to vector<8x32xf32>
    %558 = arith.subf %557, %548 : vector<8x32xf32>
    %559 = arith.mulf %558, %556 : vector<8x32xf32>
    %560 = arith.mulf %548, %529 : vector<8x32xf32>
    %561 = arith.addf %559, %560 : vector<8x32xf32>
    %c7_i32_243 = arith.constant 7 : i32
    %c8_i32_244 = arith.constant 8 : i32
    %562 = arith.muli %c7_i32_243, %c8_i32_244 : i32
    %563 = arith.index_cast %562 : i32 to index
    %c0_245 = arith.constant 0 : index
    %564 = vector.load %arg13[%563, %c0_245] : memref<64x32xf32, #tpu.memory_space<vmem>>, vector<8x32xf32>
    %cst_246 = arith.constant dense<0.000000e+00> : vector<8x32xf32>
    %565 = tpu.matmul %561, %331, %cst_246 {dimension_numbers = #tpu.dot_dimension_numbers<[1], [0], [0], [1], [0, 0, 1, 1], [], []>} : vector<8x32xf32>, vector<32x32xf32>, vector<8x32xf32> -> vector<8x32xf32>
    %566 = arith.addf %564, %565 : vector<8x32xf32>
    %567 = arith.negf %566 : vector<8x32xf32>
    %568 = math.exp %567 : vector<8x32xf32>
    %cst_247 = arith.constant 1.000000e+00 : f32
    %569 = vector.broadcast %cst_247 : f32 to vector<8x32xf32>
    %570 = arith.addf %569, %568 : vector<8x32xf32>
    %571 = arith.divf %569, %570 : vector<8x32xf32>
    %572 = arith.index_cast %562 : i32 to index
    %c0_248 = arith.constant 0 : index
    %573 = vector.load %arg14[%572, %c0_248] : memref<64x32xf32, #tpu.memory_space<vmem>>, vector<8x32xf32>
    %cst_249 = arith.constant dense<0.000000e+00> : vector<8x32xf32>
    %574 = tpu.matmul %561, %333, %cst_249 {dimension_numbers = #tpu.dot_dimension_numbers<[1], [0], [0], [1], [0, 0, 1, 1], [], []>} : vector<8x32xf32>, vector<32x32xf32>, vector<8x32xf32> -> vector<8x32xf32>
    %575 = arith.addf %573, %574 : vector<8x32xf32>
    %576 = arith.negf %575 : vector<8x32xf32>
    %577 = math.exp %576 : vector<8x32xf32>
    %cst_250 = arith.constant 1.000000e+00 : f32
    %578 = vector.broadcast %cst_250 : f32 to vector<8x32xf32>
    %579 = arith.addf %578, %577 : vector<8x32xf32>
    %580 = arith.divf %578, %579 : vector<8x32xf32>
    %581 = arith.index_cast %562 : i32 to index
    %c0_251 = arith.constant 0 : index
    %582 = vector.load %arg15[%581, %c0_251] : memref<64x32xf32, #tpu.memory_space<vmem>>, vector<8x32xf32>
    %cst_252 = arith.constant dense<0.000000e+00> : vector<8x32xf32>
    %583 = tpu.matmul %561, %335, %cst_252 {dimension_numbers = #tpu.dot_dimension_numbers<[1], [0], [0], [1], [0, 0, 1, 1], [], []>} : vector<8x32xf32>, vector<32x32xf32>, vector<8x32xf32> -> vector<8x32xf32>
    %584 = vector.broadcast %336 : vector<1x32xf32> to vector<8x32xf32>
    %585 = arith.addf %583, %584 : vector<8x32xf32>
    %586 = arith.mulf %571, %585 : vector<8x32xf32>
    %587 = arith.addf %582, %586 : vector<8x32xf32>
    %588 = math.tanh %587 : vector<8x32xf32>
    %cst_253 = arith.constant 1.000000e+00 : f32
    %589 = vector.broadcast %cst_253 : f32 to vector<8x32xf32>
    %590 = arith.subf %589, %580 : vector<8x32xf32>
    %591 = arith.mulf %590, %588 : vector<8x32xf32>
    %592 = arith.mulf %580, %561 : vector<8x32xf32>
    %593 = arith.addf %591, %592 : vector<8x32xf32>
    %c8_i32_254 = arith.constant 8 : i32
    %c0_255 = arith.constant 0 : index
    %c0_256 = arith.constant 0 : index
    %594 = vector.load %arg10[%c0_255, %c0_256] : memref<32x4xf32, #tpu.memory_space<vmem>>, vector<32x4xf32>
    %cst_257 = arith.constant dense<0.000000e+00> : vector<8x4xf32>
    %595 = tpu.matmul %593, %594, %cst_257 {dimension_numbers = #tpu.dot_dimension_numbers<[1], [0], [0], [1], [0, 0, 1, 1], [], []>} : vector<8x32xf32>, vector<32x4xf32>, vector<8x4xf32> -> vector<8x4xf32>
    %c0_258 = arith.constant 0 : index
    %c0_259 = arith.constant 0 : index
    %596 = vector.load %arg11[%c0_258, %c0_259] : memref<1x4xf32, #tpu.memory_space<vmem>>, vector<1x4xf32>
    %597 = vector.broadcast %596 : vector<1x4xf32> to vector<8x4xf32>
    %598 = arith.addf %595, %597 : vector<8x4xf32>
    %c0_260 = arith.constant 0 : index
    %c0_261 = arith.constant 0 : index
    %599 = vector.load %arg12[%c0_260, %c0_261] : memref<8x4xf32, #tpu.memory_space<vmem>>, vector<8x4xf32>
    tpu.vector_store %arg12[%c0_260, %c0_261], %598 {strides = array<i32>} : memref<8x4xf32, #tpu.memory_space<vmem>>, vector<8x4xf32>,
    return
  }
  func.func @transform_0(%arg0: i32) -> (i32, i32) {
    %c0_i32 = arith.constant 0 : i32
    %c0_i32_0 = arith.constant 0 : i32
    %c0_i32_1 = arith.constant 0 : i32
    return %c0_i32, %c0_i32_0 : i32, i32
  }
  func.func @transform_1(%arg0: i32) -> (i32, i32, i32) {
    %c0_i32 = arith.constant 0 : i32
    %c0_i32_0 = arith.constant 0 : i32
    %c0_i32_1 = arith.constant 0 : i32
    %c0_i32_2 = arith.constant 0 : i32
    return %c0_i32, %c0_i32_0, %c0_i32_1 : i32, i32, i32
  }
  func.func @transform_2(%arg0: i32) -> (i32, i32, i32) {
    %c0_i32 = arith.constant 0 : i32
    %c0_i32_0 = arith.constant 0 : i32
    %c0_i32_1 = arith.constant 0 : i32
    %c0_i32_2 = arith.constant 0 : i32
    return %c0_i32, %c0_i32_0, %c0_i32_1 : i32, i32, i32
  }
  func.func @transform_3(%arg0: i32) -> (i32, i32, i32) {
    %c0_i32 = arith.constant 0 : i32
    %c0_i32_0 = arith.constant 0 : i32
    %c0_i32_1 = arith.constant 0 : i32
    %c0_i32_2 = arith.constant 0 : i32
    return %c0_i32, %c0_i32_0, %c0_i32_1 : i32, i32, i32
  }
  func.func @transform_4(%arg0: i32) -> (i32, i32) {
    %c0_i32 = arith.constant 0 : i32
    %c0_i32_0 = arith.constant 0 : i32
    %c0_i32_1 = arith.constant 0 : i32
    return %c0_i32, %c0_i32_0 : i32, i32
  }
  func.func @transform_5(%arg0: i32) -> (i32, i32, i32) {
    %c0_i32 = arith.constant 0 : i32
    %c0_i32_0 = arith.constant 0 : i32
    %c0_i32_1 = arith.constant 0 : i32
    %c0_i32_2 = arith.constant 0 : i32
    return %c0_i32, %c0_i32_0, %c0_i32_1 : i32, i32, i32
  }
  func.func @transform_6(%arg0: i32) -> (i32, i32, i32) {
    %c0_i32 = arith.constant 0 : i32
    %c0_i32_0 = arith.constant 0 : i32
    %c0_i32_1 = arith.constant 0 : i32
    %c0_i32_2 = arith.constant 0 : i32
    return %c0_i32, %c0_i32_0, %c0_i32_1 : i32, i32, i32
  }
  func.func @transform_7(%arg0: i32) -> (i32, i32, i32) {
    %c0_i32 = arith.constant 0 : i32
    %c0_i32_0 = arith.constant 0 : i32
    %c0_i32_1 = arith.constant 0 : i32
    %c0_i32_2 = arith.constant 0 : i32
    return %c0_i32, %c0_i32_0, %c0_i32_1 : i32, i32, i32
  }
  func.func @transform_8(%arg0: i32) -> (i32, i32) {
    %c0_i32 = arith.constant 0 : i32
    %c0_i32_0 = arith.constant 0 : i32
    %c0_i32_1 = arith.constant 0 : i32
    return %c0_i32, %c0_i32_0 : i32, i32
  }
  func.func @transform_9(%arg0: i32) -> (i32, i32) {
    %c0_i32 = arith.constant 0 : i32
    %c0_i32_0 = arith.constant 0 : i32
    %c0_i32_1 = arith.constant 0 : i32
    return %c0_i32, %c0_i32_0 : i32, i32
  }
  func.func @transform_10(%arg0: i32) -> (i32, i32) {
    %c0_i32 = arith.constant 0 : i32
    %c0_i32_0 = arith.constant 0 : i32
    %c0_i32_1 = arith.constant 0 : i32
    return %c0_i32, %c0_i32_0 : i32, i32
  }
  func.func @transform_11(%arg0: i32) -> (i32, i32) {
    %c0_i32 = arith.constant 0 : i32
    %c0_i32_0 = arith.constant 0 : i32
    %c0_i32_1 = arith.constant 0 : i32
    return %c0_i32, %c0_i32_0 : i32, i32
  }
}

</mosaic_0001>

<bundles_post_ra>
// kernel: gru_model_forward.1
= control target key start
LH: loop header
LB: loop body
LE: loop exit
PB: predicated region body
PF: predicated region fallthrough
CT: control target
= control target key end

     0   :  { %vm55_vm0 = vcmask 130048   ;;  %v6396_v16 = vmov 0.0|0.0   ;;  %vm6397_vm1 = vmmov 0   ;;  %v6398_v32 = vmov 0.0   ;;  %s7212_s1 = inlined_call_operand.vmem [shape: f32[3,16,32], index: 1, kind: input, shape index: {}]   ;;  %s7213_s0 = inlined_call_operand.vmem [shape: f32[64,16], index: 0, kind: input, shape index: {}]   ;;  %s7214_s3 = inlined_call_operand.vmem [shape: f32[3,32,32], index: 3, kind: input, shape index: {}]   ;;  %s7215_s2 = inlined_call_operand.vmem [shape: f32[3,1,32], index: 2, kind: input, shape index: {}]   ;;  %s7216_s4 = inlined_call_operand.vmem [shape: f32[1,32], index: 4, kind: input, shape index: {}]   ;;  %s7217_s5 = inlined_call_operand.vmem [shape: f32[3,32,32], index: 5, kind: input, shape index: {}]   ;;  %s7218_s7 = inlined_call_operand.vmem [shape: f32[3,32,32], index: 7, kind: input, shape index: {}]   ;;  %s7219_s6 = inlined_call_operand.vmem [shape: f32[3,1,32], index: 6, kind: input, shape index: {}]   ;;  %s7220_s8 = inlined_call_operand.vmem [shape: f32[1,32], index: 8, kind: input, shape index: {}]   ;;  %s7221_s9 = inlined_call_operand.vmem [shape: f32[32,4], index: 9, kind: input, shape index: {}]   ;;  %s7222_s10 = inlined_call_operand.vmem [shape: f32[1,4], index: 10, kind: input, shape index: {}]   ;;  %s7223_s11 = inlined_call_operand.vmem [shape: f32[8,4], index: 11, kind: output, shape index: {}]  }
   0x1   :  { %v46_v0 = vld [vmem:[%s7212_s1] sm:$0xff]  ;;  %v47_v1 = vld [vmem:[%s7212_s1 + $0x8] sm:$0xff]  ;;  %v6468_v2 = vld [vmem:[%s7213_s0 + $0x30] sm:$0xff]  ;;  %vm185_vm2 = vcmask 261120   ;;  %vm4773_vm3 = vcmask 31744  }
   0x2   :  { %v5901_v3 = vpack.c.bf16 %v47_v1, %v46_v0  ;;  %5267 = vmatprep.mubr.msk.f32.mxu1 %vm55_vm0, %v6468_v2  ;;  %v4788_v4 = vld [vmem:[%s7212_s1 + $0x10] sm:$0xff]  ;;  %v4789_v5 = vld [vmem:[%s7212_s1 + $0x18] sm:$0xff]  ;;  %v38_v8 = vld [vmem:[%s7213_s0] sm:$0xff] }
   0x3   :  { %v5905_v6 = vpack.c.bf16 %v4789_v5, %v4788_v4  ;;  %v6481_v7 = vld [vmem:[%s7213_s0 + $0x38] sm:$0xff]  ;;  %v442_v9 = vld [vmem:[%s7214_s3] sm:$0xff]  ;;  %v443_v10 = vld [vmem:[%s7214_s3 + $0x8] sm:$0xff]  ;;  %5258 = vmatprep.mubr.msk.f32.mxu0 %vm55_vm0, %v38_v8 }
   0x4   :  { %6231 = vmatprep.subr.bf16.mxu1 %v5901_v3  ;;  %5902 = vmatprep.subr.bf16.mxu0 %v5901_v3  ;;  %v4800_v11 = vld [vmem:[%s7212_s1 + $0x20] sm:$0xff]  ;;  %v4801_v12 = vld [vmem:[%s7212_s1 + $0x28] sm:$0xff]  ;;  %v6506_v15 = vpack.c.bf16 %v443_v10, %v442_v9  ;;  %v40_v17 = vld [vmem:[%s7213_s0 + $0x10] sm:$0xff] }
   0x5   :  { %6232 = vmatpush3.bf16.msra.mxu1 %v5901_v3  ;;  %5904 = vmatpush3.bf16.msra.mxu0 %v5901_v3  ;;  %v39_v13 = vld [vmem:[%s7213_s0 + $0x8] sm:$0xff]  ;;  %v5909_v14 = vpack.c.bf16 %v4801_v12, %v4800_v11  ;;  %v444_v18 = vld [vmem:[%s7214_s3 + $0x10] sm:$0xff]  ;;  %v445_v19 = vld [vmem:[%s7214_s3 + $0x18] sm:$0xff] }
   0x6   :  { %5906 = vmatprep.subr.bf16.mxu1 %v5905_v6  ;;  %v41_v20 = vld [vmem:[%s7213_s0 + $0x18] sm:$0xff]  ;;  %v42_v21 = vld [vmem:[%s7213_s0 + $0x20] sm:$0xff]  ;;  %v6529_v22 = vpack.c.bf16 %v445_v19, %v444_v18  ;;  %v4817_v24 = vld [vmem:[%s7214_s3 + $0x48] sm:$0xff] }
   0x7   :  { %5910 = vmatprep.subr.bf16.mxu0 %v5909_v14  ;;  %v4816_v23 = vld [vmem:[%s7214_s3 + $0x40] sm:$0xff]  ;;  %v43_v25 = vld [vmem:[%s7213_s0 + $0x28] sm:$0xff]  ;;  %v4818_v27 = vld [vmem:[%s7214_s3 + $0x50] sm:$0xff] }
   0x8   :  { %5268 = vmatmul.mubr.msk.f32.vlgmr.msra.gmra.mrb[0].mxu1 %vm55_vm0, %v6481_v7  ;;  %5259 = vmatmul.mubr.msk.f32.vlgmr.msra.gmra.mrb[0].mxu0 %vm55_vm0, %v39_v13  ;;  %v6547_v26 = vpack.c.bf16 %v4817_v24, %v4816_v23  ;;  %v4819_v28 = vld [vmem:[%s7214_s3 + $0x58] sm:$0xff]  ;;  %v4812_v29 = vld [vmem:[%s7214_s3 + $0x20] sm:$0xff]  ;;  %v4813_v30 = vld [vmem:[%s7214_s3 + $0x28] sm:$0xff] }
   0x9   :  { %5908 = vmatpush3.bf16.msra.mxu1 %v5905_v6  ;;  %5274 = vmatprep.mubr.msk.f32.mxu1 %vm55_vm0, %v38_v8  ;;  %v6570_v31 = vpack.c.bf16 %v4819_v28, %v4818_v27  ;;  %v6577_v33 = vpack.c.bf16 %v4813_v30, %v4812_v29  ;;  %v4814_v34 = vld [vmem:[%s7214_s3 + $0x30] sm:$0xff]  ;;  %v4815_v35 = vld [vmem:[%s7214_s3 + $0x38] sm:$0xff]  ;;  %v4779_v37 = vld [vmem:[%s7215_s2] ss:$0 sm:$0xff] }
   0xa   :  { %5913 = vmatprep.subr.bf16.mxu1 %v6396_v16  ;;  %5912 = vmatpush3.bf16.msra.mxu0 %v5909_v14  ;;  %v6591_v36 = vpack.c.bf16 %v4815_v35, %v4814_v34  ;;  %v4791_v45 = vld [vmem:[%s7215_s2 + $0x1] ss:$0 sm:$0xff]  ;;  %v4803_v63 = vld [vmem:[%s7215_s2 + $0x2] ss:$0 sm:$0xff] }
   0xb   :  { %5261 = vmatprep.mubr.msk.f32.mxu0 %vm55_vm0, %v40_v17  ;;  %5925 = vmatprep.subr.bf16.mxu0 %v6396_v16 }
   0xc   :  { %5275 = vmatmul.mubr.msk.f32.vlgmr.msra.gmra.mrb[2].mxu1 %vm55_vm0, %v39_v13  ;;  %5262 = vmatmul.mubr.msk.f32.gmra.mrb[2].mxu0 %vm55_vm0, %v41_v20 }
   0xd   :  { %5915 = vmatpush3.bf16.msra.mxu1 %v6506_v15  ;;  %5277 = vmatprep.mubr.msk.f32.mxu1 %vm55_vm0, %v40_v17 }
   0xe   :  { %5916 = vmatprep.subr.bf16.mxu1 %v6396_v16  ;;  %5264 = vmatprep.mubr.msk.f32.mxu0 %vm55_vm0, %v42_v21 }
  0x10   :  { %5278 = vmatmul.mubr.msk.f32.gmra.mrb[4].mxu1 %vm55_vm0, %v41_v20  ;;  %5265 = vmatmul.mubr.msk.f32.gmra.mrb[4].mxu0 %vm55_vm0, %v43_v25 }
  0x11   :  { %5280 = vmatprep.mubr.msk.f32.mxu1 %vm55_vm0, %v42_v21  ;;  %5918 = vmatpush3.bf16.msra.mxu1 %v6529_v22 }
  0x12   :  { %5919 = vmatprep.subr.bf16.mxu1 %v6396_v16  ;;  %5290 = vmatprep.mubr.msk.f32.mxu0 %vm55_vm0, %v38_v8 }
  0x14   :  { %5281 = vmatmul.mubr.msk.f32.gmra.mrb[6].mxu1 %vm55_vm0, %v43_v25  ;;  %5291 = vmatmul.mubr.msk.f32.vlgmr.msra.gmra.mrb[6].mxu0 %vm55_vm0, %v39_v13 }
  0x15   :  { %5283 = vmatprep.mubr.msk.f32.mxu1 %vm55_vm0, %v6468_v2  ;;  %5927 = vmatpush3.bf16.msra.mxu0 %v6547_v26 }
  0x16   :  { %5293 = vmatprep.mubr.msk.f32.mxu0 %vm55_vm0, %v40_v17  ;;  %5928 = vmatprep.subr.bf16.mxu0 %v6396_v16 }
  0x18   :  { %5284 = vmatmul.mubr.msk.f32.gmra.mrb[8].mxu1 %vm55_vm0, %v6481_v7  ;;  %5294 = vmatmul.mubr.msk.f32.gmra.mrb[8].mxu0 %vm55_vm0, %v41_v20 }
  0x19   :  { %5310 = vmatprep.mubr.msk.f32.mxu1 %vm6397_vm1, %v6398_v32  ;;  %5296 = vmatprep.mubr.msk.f32.mxu0 %vm55_vm0, %v42_v21 }
  0x1a   :  { %5930 = vmatpush3.bf16.msra.mxu0 %v6570_v31 }
  0x1b   :  { %5937 = vmatprep.subr.bf16.mxu0 %v6396_v16 }
  0x1c   :  { %5311 = vmatmul.mubr.f32.vlgmr.msra.gmra.mrb[10].mxu1 %v6398_v32  ;;  %5297 = vmatmul.mubr.msk.f32.gmra.mrb[10].mxu0 %vm55_vm0, %v43_v25 }
  0x1d   :  { %5921 = vmatpush3.bf16.msra.mxu1 %v6577_v33  ;;  %5321 = vmatprep.mubr.msk.f32.mxu1 %vm6397_vm1, %v6398_v32 }
  0x1e   :  { %5922 = vmatprep.subr.bf16.mxu1 %v6396_v16  ;;  %5299 = vmatprep.mubr.msk.f32.mxu0 %vm55_vm0, %v6468_v2 }
  0x20   :  { %5300 = vmatmul.mubr.msk.f32.gmra.mrb[12].mxu0 %vm55_vm0, %v6481_v7 }
  0x21   :  { %5924 = vmatpush3.bf16.msra.mxu1 %v6591_v36  ;;  %5332 = vmatprep.mubr.msk.f32.mxu0 %vm6397_vm1, %v6398_v32 }
  0x22   :  { %5931 = vmatprep.subr.bf16.mxu1 %v6396_v16 }
  0x24   :  { %5322 = vmatmul.mubr.f32.vlgmr.msra.gmra.mrb[12].mxu1 %v6398_v32  ;;  %5333 = vmatmul.mubr.f32.vlgmr.msra.gmra.mrb[14].mxu0 %v6398_v32 }
  0x25   :  { %5933 = vmatpush3.bf16.msra.mxu1 %v6506_v15  ;;  %5939 = vmatpush3.bf16.msra.mxu0 %v6577_v33 }
  0x26   :  { %5934 = vmatprep.subr.bf16.mxu1 %v6396_v16  ;;  %5940 = vmatprep.subr.bf16.mxu0 %v6396_v16 }
  0x27   :  { %5343 = vmatprep.mubr.msk.f32.mxu1 %vm6397_vm1, %v6398_v32  ;;  %5354 = vmatprep.mubr.msk.f32.mxu0 %vm6397_vm1, %v6398_v32 }
  0x29   :  { %5936 = vmatpush3.bf16.msra.mxu1 %v6529_v22  ;;  %5942 = vmatpush3.bf16.msra.mxu0 %v6591_v36 }
  0x2a   :  { %5943 = vmatprep.subr.bf16.mxu1 %v6396_v16  ;;  %5949 = vmatprep.subr.bf16.mxu0 %v6396_v16 }
  0xdb   :  { %v5269_v38 = vpop.f32.mrb[0].mxu1  ;;  %v5260_v39 = vpop.f32.mrb[0].mxu0 }
  0xdc   :  { %v182_v40 = vadd.f32 %v5269_v38, %v4779_v37  ;;  %v176_v41 = vpop.f32.mrb[1].mxu1  ;;  %v152_v42 = vadd.f32 %v5260_v39, %v4779_v37  ;;  %v146_v43 = vpop.f32.mrb[1].mxu0 }
  0xdd   :  { %v177_v44 = vadd.f32 %v4779_v37, %v176_v41  ;;  %v147_v46 = vadd.f32 %v4779_v37, %v146_v43 }
  0xde   :  { %193 = vst.msk [vmem:[#allocation2 + $0x38] sm:$0xff] %vm185_vm2, %v182_v40  ;;  %187 = vst.msk [vmem:[#allocation2 + $0x8] sm:$0xff] %vm185_vm2, %v152_v42 }
  0xdf   :  { %192 = vst.msk [vmem:[#allocation2 + $0x30] sm:$0xff] %vm185_vm2, %v177_v44  ;;  %v5276_v47 = vpop.f32.mrb[2].mxu1  ;;  %186 = vst.msk [vmem:[#allocation2] sm:$0xff] %vm185_vm2, %v147_v46  ;;  %v5263_v48 = vpop.f32.mrb[2].mxu0  ;;  %v6654_v46 = vld [vmem:[%s7216_s4] ss:$0 sm:$0xff] }
  0xe0   :  { %v277_v49 = vadd.f32 %v5276_v47, %v4791_v45  ;;  %v271_v50 = vpop.f32.mrb[3].mxu1  ;;  %v162_v51 = vadd.f32 %v5263_v48, %v4779_v37  ;;  %v156_v52 = vpop.f32.mrb[3].mxu0 }
  0xe1   :  { %v272_v53 = vadd.f32 %v4791_v45, %v271_v50  ;;  %v157_v54 = vadd.f32 %v4779_v37, %v156_v52 }
  0xe2   :  { %311 = vst.msk [vmem:[#allocation3 + $0x8] sm:$0xff] %vm185_vm2, %v277_v49  ;;  %189 = vst.msk [vmem:[#allocation2 + $0x18] sm:$0xff] %vm185_vm2, %v162_v51 }
  0xe3   :  { %310 = vst.msk [vmem:[#allocation3] sm:$0xff] %vm185_vm2, %v272_v53  ;;  %v5279_v55 = vpop.f32.mrb[4].mxu1  ;;  %188 = vst.msk [vmem:[#allocation2 + $0x10] sm:$0xff] %vm185_vm2, %v157_v54  ;;  %v5266_v56 = vpop.f32.mrb[4].mxu0 }
  0xe4   :  { %v287_v57 = vadd.f32 %v5279_v55, %v4791_v45  ;;  %v281_v58 = vpop.f32.mrb[5].mxu1  ;;  %v172_v59 = vadd.f32 %v5266_v56, %v4779_v37  ;;  %v166_v60 = vpop.f32.mrb[5].mxu0 }
  0xe5   :  { %v282_v61 = vadd.f32 %v4791_v45, %v281_v58  ;;  %v167_v62 = vadd.f32 %v4779_v37, %v166_v60  ;;  %v701_v60 = vld [vmem:[#allocation2 + $0x8] sm:$0xff] }
  0xe6   :  { %313 = vst.msk [vmem:[#allocation3 + $0x18] sm:$0xff] %vm185_vm2, %v287_v57  ;;  %191 = vst.msk [vmem:[#allocation2 + $0x28] sm:$0xff] %vm185_vm2, %v172_v59  ;;  %v457_v17 = vld [vmem:[#allocation2] sm:$0xff] }
  0xe7   :  { %312 = vst.msk [vmem:[#allocation3 + $0x10] sm:$0xff] %vm185_vm2, %v282_v61  ;;  %v5282_v0 = vpop.f32.mrb[6].mxu1  ;;  %190 = vst.msk [vmem:[#allocation2 + $0x20] sm:$0xff] %vm185_vm2, %v167_v62  ;;  %v5292_v1 = vpop.f32.mrb[6].mxu0 }
  0xe8   :  { %v297_v2 = vadd.f32 %v5282_v0, %v4791_v45  ;;  %v291_v3 = vpop.f32.mrb[7].mxu1  ;;  %v401_v4 = vadd.f32 %v5292_v1, %v4803_v63  ;;  %v395_v5 = vpop.f32.mrb[7].mxu0 }
  0xe9   :  { %v292_v6 = vadd.f32 %v4791_v45, %v291_v3  ;;  %v396_v7 = vadd.f32 %v4803_v63, %v395_v5  ;;  %v782_v3 = vld [vmem:[#allocation3 + $0x8] sm:$0xff] }
  0xea   :  { %315 = vst.msk [vmem:[#allocation3 + $0x28] sm:$0xff] %vm185_vm2, %v297_v2  ;;  %435 = vst.msk [vmem:[#allocation4 + $0x8] sm:$0xff] %vm185_vm2, %v401_v4  ;;  %v538_v37 = vld [vmem:[#allocation3] sm:$0xff] }
  0xeb   :  { %314 = vst.msk [vmem:[#allocation3 + $0x20] sm:$0xff] %vm185_vm2, %v292_v6  ;;  %v5285_v8 = vpop.f32.mrb[8].mxu1  ;;  %434 = vst.msk [vmem:[#allocation4] sm:$0xff] %vm185_vm2, %v396_v7  ;;  %v5295_v9 = vpop.f32.mrb[8].mxu0 }
  0xec   :  { %v307_v10 = vadd.f32 %v5285_v8, %v4791_v45  ;;  %v301_v11 = vpop.f32.mrb[9].mxu1  ;;  %v411_v12 = vadd.f32 %v5295_v9, %v4803_v63  ;;  %v405_v13 = vpop.f32.mrb[9].mxu0 }
  0xed   :  { %v302_v14 = vadd.f32 %v4791_v45, %v301_v11  ;;  %v406_v18 = vadd.f32 %v4803_v63, %v405_v13 }
  0xee   :  { %317 = vst.msk [vmem:[#allocation3 + $0x38] sm:$0xff] %vm185_vm2, %v307_v10  ;;  %437 = vst.msk [vmem:[#allocation4 + $0x18] sm:$0xff] %vm185_vm2, %v411_v12 }
  0xef   :  { %316 = vst.msk [vmem:[#allocation3 + $0x30] sm:$0xff] %vm185_vm2, %v302_v14  ;;  %v527_v19 = vpop.f32.mrb[10].mxu1  ;;  %436 = vst.msk [vmem:[#allocation4 + $0x10] sm:$0xff] %vm185_vm2, %v406_v18  ;;  %v5298_v20 = vpop.f32.mrb[10].mxu0 }
  0xf0   :  { %v531_v21 = vadd.f32 %v527_v19, %v457_v17  ;;  %v5312_v23 = vpop.f32.mrb[11].mxu1  ;;  %v421_v24 = vadd.f32 %v5298_v20, %v4803_v63  ;;  %v415_v25 = vpop.f32.mrb[11].mxu0 }
  0xf1   :  { %v416_v27 = vadd.f32 %v4803_v63, %v415_v25  ;;  %v860_v17 = vld [vmem:[#allocation4 + $0x8] sm:$0xff] }
  0xf2   :  { %v4820_v28 = vmul.f32 -1.442695, %v531_v21  ;;  %439 = vst.msk [vmem:[#allocation4 + $0x28] sm:$0xff] %vm185_vm2, %v421_v24  ;;  %v616_v52 = vld [vmem:[#allocation4] sm:$0xff] }
  0xf3   :  { %438 = vst.msk [vmem:[#allocation4 + $0x20] sm:$0xff] %vm185_vm2, %v416_v27  ;;  %v5301_v29 = vpop.f32.mrb[12].mxu0  ;;  %v939_v27 = vld [vmem:[#allocation2 + $0x10] sm:$0xff] }
  0xf4   :  { %6236 = vpow2.f32 %v4820_v28  ;;  %v431_v30 = vadd.f32 %v5301_v29, %v4803_v63  ;;  %v425_v34 = vpop.f32.mrb[13].mxu0 }
  0xf5   :  { %v426_v35 = vadd.f32 %v4803_v63, %v425_v34 }
  0xf6   :  { %441 = vst.msk [vmem:[#allocation4 + $0x38] sm:$0xff] %vm185_vm2, %v431_v30 }
  0xf7   :  { %v605_v38 = vpop.f32.mrb[12].mxu1  ;;  %440 = vst.msk [vmem:[#allocation4 + $0x30] sm:$0xff] %vm185_vm2, %v426_v35  ;;  %v689_v39 = vpop.f32.mrb[14].mxu0 }
  0xf8   :  { %v609_v40 = vadd.f32 %v605_v38, %v538_v37  ;;  %v5323_v41 = vpop.f32.mrb[13].mxu1  ;;  %v5334_v42 = vpop.f32.mrb[15].mxu0  ;;  %v690_v49 = vadd.f32 %v6654_v46, %v689_v39  ;;  %v1020_v38 = vld [vmem:[#allocation3 + $0x10] sm:$0xff] }
  0xfa   :  { %v4821_v43 = vmul.f32 -1.442695, %v609_v40 }
  0xfc   :  { %6238 = vpow2.f32 %v4821_v43 }
  0xfe   :  { %v6237_v44 = vpop.eup %6236 }
  0xff   :  { %v535_v45 = vadd.f32 1.0, %v6237_v44 }
 0x101   :  { %6240 = vrcp.f32 %v535_v45 }
 0x106   :  { %v6239_v47 = vpop.eup %6238 }
 0x107   :  { %v613_v48 = vadd.f32 1.0, %v6239_v47 }
 0x109   :  { %6242 = vrcp.f32 %v613_v48 }
 0x10b   :  { %v6241_v50 = vpop.eup %6240 }
 0x10c   :  { %v693_v51 = vmul.f32 %v6241_v50, %v690_v49 }
 0x10e   :  { %v694_v53 = vadd.f32 %v693_v51, %v616_v52  ;;  %v1098_v51 = vld [vmem:[#allocation4 + $0x10] sm:$0xff] }
 0x110   :  { %6244 = vtanh.f32 %v694_v53 }
 0x113   :  { %v6243_v54 = vpop.eup %6242 }
 0x114   :  { %v696_v55 = vsub.f32 1.0, %v6243_v54  ;;  %v698_v58 = vmul.f32 0.0, %v6243_v54 }
 0x11a   :  { %v6245_v56 = vpop.eup %6244 }
 0x11b   :  { %v697_v57 = vmul.f32 %v6245_v56, %v696_v55 }
 0x11d   :  { %v699_v59 = vadd.f32 %v698_v58, %v697_v57 }
 0x11f   :  { %700 = vst.msk [vmem:[#allocation5] sm:$0xff] %vm185_vm2, %v699_v59  ;;  %5344 = vmatmul.mubr.msk.f32.vlgmr.msra.gmra.mrb[14].mxu1 %vm185_vm2, %v699_v59  ;;  %5355 = vmatmul.mubr.msk.f32.vlgmr.msra.gmra.mrb[16].mxu0 %vm185_vm2, %v699_v59 }
 0x120   :  { %5945 = vmatpush3.bf16.msra.mxu1 %v6547_v26  ;;  %5365 = vmatprep.mubr.msk.f32.mxu1 %vm6397_vm1, %v6398_v32 }
 0x121   :  { %5946 = vmatprep.subr.bf16.mxu1 %v6396_v16  ;;  %5951 = vmatpush3.bf16.msra.mxu0 %v6506_v15 }
 0x122   :  { %5952 = vmatprep.subr.bf16.mxu0 %v6396_v16  ;;  %5376 = vmatprep.mubr.msk.f32.mxu0 %vm6397_vm1, %v6398_v32 }
 0x124   :  { %5948 = vmatpush3.bf16.msra.mxu1 %v6570_v31 }
 0x125   :  { %5955 = vmatprep.subr.bf16.mxu1 %v6396_v16  ;;  %5954 = vmatpush3.bf16.msra.mxu0 %v6529_v22 }
 0x126   :  { %5961 = vmatprep.subr.bf16.mxu0 %v6396_v16 }
 0x127   :  { %5366 = vmatmul.mubr.msk.f32.vlgmr.msra.gmra.mrb[16].mxu1 %vm185_vm2, %v699_v59 }
 0x128   :  { %5957 = vmatpush3.bf16.msra.mxu1 %v6577_v33  ;;  %5387 = vmatprep.mubr.msk.f32.mxu1 %vm6397_vm1, %v6398_v32 }
 0x129   :  { %5958 = vmatprep.subr.bf16.mxu1 %v6396_v16 }
 0x12c   :  { %5960 = vmatpush3.bf16.msra.mxu1 %v6591_v36 }
 0x12d   :  { %5967 = vmatprep.subr.bf16.mxu1 %v6396_v16 }
 0x1f2   :  { %v771_v61 = vpop.f32.mrb[14].mxu1  ;;  %v849_v62 = vpop.f32.mrb[16].mxu0 }
 0x1f3   :  { %v775_v63 = vadd.f32 %v771_v61, %v701_v60  ;;  %v5345_v0 = vpop.f32.mrb[15].mxu1  ;;  %v5356_v1 = vpop.f32.mrb[17].mxu0  ;;  %v853_v4 = vadd.f32 %v849_v62, %v782_v3 }
 0x1f5   :  { %v4824_v2 = vmul.f32 -1.442695, %v775_v63  ;;  %v4826_v5 = vmul.f32 -1.442695, %v853_v4 }
 0x1f7   :  { %6246 = vpow2.f32 %v4824_v2  ;;  %v1258_v2 = vld [vmem:[#allocation3 + $0x18] sm:$0xff] }
 0x1f8   :  { %6248 = vpow2.f32 %v4826_v5 }
 0x1fa   :  { %v927_v6 = vpop.f32.mrb[16].mxu1 }
 0x1fb   :  { %v5367_v7 = vpop.f32.mrb[17].mxu1  ;;  %v928_v12 = vadd.f32 %v6654_v46, %v927_v6 }
 0x201   :  { %v6247_v8 = vpop.eup %6246 }
 0x202   :  { %v779_v9 = vadd.f32 1.0, %v6247_v8  ;;  %v6249_v10 = vpop.eup %6248 }
 0x203   :  { %v857_v11 = vadd.f32 1.0, %v6249_v10 }
 0x204   :  { %6250 = vrcp.f32 %v779_v9 }
 0x205   :  { %6252 = vrcp.f32 %v857_v11 }
 0x20e   :  { %v6251_v13 = vpop.eup %6250 }
 0x20f   :  { %v931_v14 = vmul.f32 %v6251_v13, %v928_v12  ;;  %v6253_v19 = vpop.eup %6252 }
 0x210   :  { %v934_v20 = vsub.f32 1.0, %v6253_v19  ;;  %v936_v24 = vmul.f32 %v6253_v19, %v699_v59  ;;  %v1177_v59 = vld [vmem:[#allocation2 + $0x18] sm:$0xff] }
 0x211   :  { %v932_v18 = vadd.f32 %v931_v14, %v860_v17  ;;  %v1336_v14 = vld [vmem:[#allocation4 + $0x18] sm:$0xff] }
 0x213   :  { %6254 = vtanh.f32 %v932_v18 }
 0x21d   :  { %v6255_v21 = vpop.eup %6254 }
 0x21e   :  { %v935_v23 = vmul.f32 %v6255_v21, %v934_v20 }
 0x220   :  { %v937_v25 = vadd.f32 %v936_v24, %v935_v23 }
 0x222   :  { %938 = vst.msk [vmem:[#allocation5 + $0x8] sm:$0xff] %vm185_vm2, %v937_v25  ;;  %5377 = vmatmul.mubr.msk.f32.vlgmr.msra.gmra.mrb[18].mxu0 %vm185_vm2, %v937_v25  ;;  %5388 = vmatmul.mubr.msk.f32.vlgmr.msra.gmra.mrb[18].mxu1 %vm185_vm2, %v937_v25 }
 0x223   :  { %5963 = vmatpush3.bf16.msra.mxu0 %v6547_v26  ;;  %5398 = vmatprep.mubr.msk.f32.mxu0 %vm6397_vm1, %v6398_v32 }
 0x224   :  { %5964 = vmatprep.subr.bf16.mxu0 %v6396_v16  ;;  %5969 = vmatpush3.bf16.msra.mxu1 %v6506_v15 }
 0x225   :  { %5970 = vmatprep.subr.bf16.mxu1 %v6396_v16  ;;  %5409 = vmatprep.mubr.msk.f32.mxu1 %vm6397_vm1, %v6398_v32 }
 0x227   :  { %5966 = vmatpush3.bf16.msra.mxu0 %v6570_v31 }
 0x228   :  { %5973 = vmatprep.subr.bf16.mxu0 %v6396_v16  ;;  %5972 = vmatpush3.bf16.msra.mxu1 %v6529_v22 }
 0x229   :  { %5979 = vmatprep.subr.bf16.mxu1 %v6396_v16 }
 0x22a   :  { %5399 = vmatmul.mubr.msk.f32.vlgmr.msra.gmra.mrb[20].mxu0 %vm185_vm2, %v937_v25 }
 0x22b   :  { %5975 = vmatpush3.bf16.msra.mxu0 %v6577_v33  ;;  %5420 = vmatprep.mubr.msk.f32.mxu0 %vm6397_vm1, %v6398_v32 }
 0x22c   :  { %5976 = vmatprep.subr.bf16.mxu0 %v6396_v16 }
 0x22f   :  { %5978 = vmatpush3.bf16.msra.mxu0 %v6591_v36 }
 0x230   :  { %5985 = vmatprep.subr.bf16.mxu0 %v6396_v16 }
 0x2f5   :  { %v1009_v28 = vpop.f32.mrb[18].mxu0  ;;  %v1087_v29 = vpop.f32.mrb[18].mxu1 }
 0x2f6   :  { %v1013_v30 = vadd.f32 %v1009_v28, %v939_v27  ;;  %v5378_v34 = vpop.f32.mrb[19].mxu0  ;;  %v5389_v35 = vpop.f32.mrb[19].mxu1  ;;  %v1091_v39 = vadd.f32 %v1087_v29, %v1020_v38 }
 0x2f8   :  { %v4829_v37 = vmul.f32 -1.442695, %v1013_v30  ;;  %v4831_v40 = vmul.f32 -1.442695, %v1091_v39 }
 0x2fa   :  { %6256 = vpow2.f32 %v4829_v37  ;;  %v1496_v37 = vld [vmem:[#allocation3 + $0x20] sm:$0xff] }
 0x2fb   :  { %6258 = vpow2.f32 %v4831_v40 }
 0x2fd   :  { %v1165_v41 = vpop.f32.mrb[20].mxu0 }
 0x2fe   :  { %v5400_v42 = vpop.f32.mrb[21].mxu0  ;;  %v1166_v48 = vadd.f32 %v6654_v46, %v1165_v41 }
 0x304   :  { %v6257_v43 = vpop.eup %6256 }
 0x305   :  { %v1017_v44 = vadd.f32 1.0, %v6257_v43  ;;  %v6259_v45 = vpop.eup %6258 }
 0x306   :  { %v1095_v47 = vadd.f32 1.0, %v6259_v45 }
 0x307   :  { %6260 = vrcp.f32 %v1017_v44 }
 0x308   :  { %6262 = vrcp.f32 %v1095_v47 }
 0x311   :  { %v6261_v49 = vpop.eup %6260 }
 0x312   :  { %v1169_v50 = vmul.f32 %v6261_v49, %v1166_v48  ;;  %v6263_v53 = vpop.eup %6262 }
 0x313   :  { %v1172_v54 = vsub.f32 1.0, %v6263_v53  ;;  %v1174_v57 = vmul.f32 %v6263_v53, %v937_v25  ;;  %v1415_v25 = vld [vmem:[#allocation2 + $0x20] sm:$0xff] }
 0x314   :  { %v1170_v52 = vadd.f32 %v1169_v50, %v1098_v51  ;;  %v1574_v50 = vld [vmem:[#allocation4 + $0x20] sm:$0xff] }
 0x316   :  { %6264 = vtanh.f32 %v1170_v52 }
 0x320   :  { %v6265_v55 = vpop.eup %6264 }
 0x321   :  { %v1173_v56 = vmul.f32 %v6265_v55, %v1172_v54 }
 0x323   :  { %v1175_v58 = vadd.f32 %v1174_v57, %v1173_v56 }
 0x325   :  { %1176 = vst.msk [vmem:[#allocation5 + $0x10] sm:$0xff] %vm185_vm2, %v1175_v58  ;;  %5410 = vmatmul.mubr.msk.f32.vlgmr.msra.gmra.mrb[20].mxu1 %vm185_vm2, %v1175_v58  ;;  %5421 = vmatmul.mubr.msk.f32.vlgmr.msra.gmra.mrb[22].mxu0 %vm185_vm2, %v1175_v58 }
 0x326   :  { %5981 = vmatpush3.bf16.msra.mxu1 %v6547_v26  ;;  %5431 = vmatprep.mubr.msk.f32.mxu1 %vm6397_vm1, %v6398_v32 }
 0x327   :  { %5982 = vmatprep.subr.bf16.mxu1 %v6396_v16  ;;  %5987 = vmatpush3.bf16.msra.mxu0 %v6506_v15 }
 0x328   :  { %5988 = vmatprep.subr.bf16.mxu0 %v6396_v16  ;;  %5442 = vmatprep.mubr.msk.f32.mxu0 %vm6397_vm1, %v6398_v32 }
 0x32a   :  { %5984 = vmatpush3.bf16.msra.mxu1 %v6570_v31 }
 0x32b   :  { %5991 = vmatprep.subr.bf16.mxu1 %v6396_v16  ;;  %5990 = vmatpush3.bf16.msra.mxu0 %v6529_v22 }
 0x32c   :  { %5997 = vmatprep.subr.bf16.mxu0 %v6396_v16 }
 0x32d   :  { %5432 = vmatmul.mubr.msk.f32.vlgmr.msra.gmra.mrb[22].mxu1 %vm185_vm2, %v1175_v58 }
 0x32e   :  { %5993 = vmatpush3.bf16.msra.mxu1 %v6577_v33  ;;  %5453 = vmatprep.mubr.msk.f32.mxu1 %vm6397_vm1, %v6398_v32 }
 0x32f   :  { %5994 = vmatprep.subr.bf16.mxu1 %v6396_v16 }
 0x332   :  { %5996 = vmatpush3.bf16.msra.mxu1 %v6591_v36 }
 0x333   :  { %6003 = vmatprep.subr.bf16.mxu1 %v6396_v16 }
 0x3f8   :  { %v1247_v60 = vpop.f32.mrb[20].mxu1  ;;  %v1325_v61 = vpop.f32.mrb[22].mxu0 }
 0x3f9   :  { %v1251_v62 = vadd.f32 %v1247_v60, %v1177_v59  ;;  %v5411_v63 = vpop.f32.mrb[21].mxu1  ;;  %v5422_v0 = vpop.f32.mrb[23].mxu0  ;;  %v1329_v3 = vadd.f32 %v1325_v61, %v1258_v2 }
 0x3fb   :  { %v4834_v1 = vmul.f32 -1.442695, %v1251_v62  ;;  %v4836_v4 = vmul.f32 -1.442695, %v1329_v3 }
 0x3fd   :  { %6266 = vpow2.f32 %v4834_v1  ;;  %v1734_v1 = vld [vmem:[#allocation3 + $0x28] sm:$0xff] }
 0x3fe   :  { %6268 = vpow2.f32 %v4836_v4 }
 0x400   :  { %v1403_v5 = vpop.f32.mrb[22].mxu1 }
 0x401   :  { %v5433_v6 = vpop.f32.mrb[23].mxu1  ;;  %v1404_v11 = vadd.f32 %v6654_v46, %v1403_v5 }
 0x407   :  { %v6267_v7 = vpop.eup %6266 }
 0x408   :  { %v1255_v8 = vadd.f32 1.0, %v6267_v7  ;;  %v6269_v9 = vpop.eup %6268 }
 0x409   :  { %v1333_v10 = vadd.f32 1.0, %v6269_v9 }
 0x40a   :  { %6270 = vrcp.f32 %v1255_v8 }
 0x40b   :  { %6272 = vrcp.f32 %v1333_v10 }
 0x414   :  { %v6271_v12 = vpop.eup %6270 }
 0x415   :  { %v1407_v13 = vmul.f32 %v6271_v12, %v1404_v11  ;;  %v6273_v18 = vpop.eup %6272 }
 0x416   :  { %v1410_v19 = vsub.f32 1.0, %v6273_v18  ;;  %v1412_v23 = vmul.f32 %v6273_v18, %v1175_v58  ;;  %v1653_v58 = vld [vmem:[#allocation2 + $0x28] sm:$0xff] }
 0x417   :  { %v1408_v17 = vadd.f32 %v1407_v13, %v1336_v14  ;;  %v1812_v13 = vld [vmem:[#allocation4 + $0x28] sm:$0xff] }
 0x419   :  { %6274 = vtanh.f32 %v1408_v17 }
 0x423   :  { %v6275_v20 = vpop.eup %6274 }
 0x424   :  { %v1411_v21 = vmul.f32 %v6275_v20, %v1410_v19 }
 0x426   :  { %v1413_v24 = vadd.f32 %v1412_v23, %v1411_v21 }
 0x428   :  { %1414 = vst.msk [vmem:[#allocation5 + $0x18] sm:$0xff] %vm185_vm2, %v1413_v24  ;;  %5443 = vmatmul.mubr.msk.f32.vlgmr.msra.gmra.mrb[24].mxu0 %vm185_vm2, %v1413_v24  ;;  %5454 = vmatmul.mubr.msk.f32.vlgmr.msra.gmra.mrb[24].mxu1 %vm185_vm2, %v1413_v24 }
 0x429   :  { %5999 = vmatpush3.bf16.msra.mxu0 %v6547_v26  ;;  %5464 = vmatprep.mubr.msk.f32.mxu0 %vm6397_vm1, %v6398_v32 }
 0x42a   :  { %6000 = vmatprep.subr.bf16.mxu0 %v6396_v16  ;;  %6005 = vmatpush3.bf16.msra.mxu1 %v6506_v15 }
 0x42b   :  { %6006 = vmatprep.subr.bf16.mxu1 %v6396_v16  ;;  %5475 = vmatprep.mubr.msk.f32.mxu1 %vm6397_vm1, %v6398_v32 }
 0x42d   :  { %6002 = vmatpush3.bf16.msra.mxu0 %v6570_v31 }
 0x42e   :  { %6009 = vmatprep.subr.bf16.mxu0 %v6396_v16  ;;  %6008 = vmatpush3.bf16.msra.mxu1 %v6529_v22 }
 0x42f   :  { %6015 = vmatprep.subr.bf16.mxu1 %v6396_v16 }
 0x430   :  { %5465 = vmatmul.mubr.msk.f32.vlgmr.msra.gmra.mrb[26].mxu0 %vm185_vm2, %v1413_v24 }
 0x431   :  { %6011 = vmatpush3.bf16.msra.mxu0 %v6577_v33  ;;  %5486 = vmatprep.mubr.msk.f32.mxu0 %vm6397_vm1, %v6398_v32 }
 0x432   :  { %6012 = vmatprep.subr.bf16.mxu0 %v6396_v16 }
 0x435   :  { %6014 = vmatpush3.bf16.msra.mxu0 %v6591_v36 }
 0x436   :  { %6021 = vmatprep.subr.bf16.mxu0 %v6396_v16 }
 0x4fb   :  { %v1485_v27 = vpop.f32.mrb[24].mxu0  ;;  %v1563_v28 = vpop.f32.mrb[24].mxu1 }
 0x4fc   :  { %v1489_v29 = vadd.f32 %v1485_v27, %v1415_v25  ;;  %v5444_v30 = vpop.f32.mrb[25].mxu0  ;;  %v5455_v34 = vpop.f32.mrb[25].mxu1  ;;  %v1567_v38 = vadd.f32 %v1563_v28, %v1496_v37  ;;  %v1891_v25 = vld [vmem:[#allocation2 + $0x30] sm:$0xff] }
 0x4fe   :  { %v4839_v35 = vmul.f32 -1.442695, %v1489_v29  ;;  %v4841_v39 = vmul.f32 -1.442695, %v1567_v38 }
 0x500   :  { %6276 = vpow2.f32 %v4839_v35  ;;  %v1972_v35 = vld [vmem:[#allocation3 + $0x30] sm:$0xff] }
 0x501   :  { %6278 = vpow2.f32 %v4841_v39 }
 0x503   :  { %v1641_v40 = vpop.f32.mrb[26].mxu0 }
 0x504   :  { %v5466_v41 = vpop.f32.mrb[27].mxu0  ;;  %v1642_v47 = vadd.f32 %v6654_v46, %v1641_v40 }
 0x50a   :  { %v6277_v42 = vpop.eup %6276 }
 0x50b   :  { %v1493_v43 = vadd.f32 1.0, %v6277_v42  ;;  %v6279_v44 = vpop.eup %6278 }
 0x50c   :  { %v1571_v45 = vadd.f32 1.0, %v6279_v44 }
 0x50d   :  { %6280 = vrcp.f32 %v1493_v43 }
 0x50e   :  { %6282 = vrcp.f32 %v1571_v45 }
 0x517   :  { %v6281_v48 = vpop.eup %6280 }
 0x518   :  { %v1645_v49 = vmul.f32 %v6281_v48, %v1642_v47  ;;  %v6283_v52 = vpop.eup %6282  ;;  %v2050_v48 = vld [vmem:[#allocation4 + $0x30] sm:$0xff] }
 0x519   :  { %v1648_v53 = vsub.f32 1.0, %v6283_v52  ;;  %v1650_v56 = vmul.f32 %v6283_v52, %v1413_v24 }
 0x51a   :  { %v1646_v51 = vadd.f32 %v1645_v49, %v1574_v50 }
 0x51c   :  { %6284 = vtanh.f32 %v1646_v51 }
 0x526   :  { %v6285_v54 = vpop.eup %6284 }
 0x527   :  { %v1649_v55 = vmul.f32 %v6285_v54, %v1648_v53 }
 0x529   :  { %v1651_v57 = vadd.f32 %v1650_v56, %v1649_v55  ;;  %v2377_v55 = vld [vmem:[%s7217_s5 + $0x10] sm:$0xff]  ;;  %v2378_v56 = vld [vmem:[%s7217_s5 + $0x18] sm:$0xff] }
 0x52b   :  { %1652 = vst.msk [vmem:[#allocation5 + $0x20] sm:$0xff] %vm185_vm2, %v1651_v57  ;;  %5476 = vmatmul.mubr.msk.f32.vlgmr.msra.gmra.mrb[26].mxu1 %vm185_vm2, %v1651_v57  ;;  %5487 = vmatmul.mubr.msk.f32.vlgmr.msra.gmra.mrb[28].mxu0 %vm185_vm2, %v1651_v57 }
 0x52c   :  { %6017 = vmatpush3.bf16.msra.mxu1 %v6547_v26  ;;  %5497 = vmatprep.mubr.msk.f32.mxu1 %vm6397_vm1, %v6398_v32 }
 0x52d   :  { %6018 = vmatprep.subr.bf16.mxu1 %v6396_v16  ;;  %6023 = vmatpush3.bf16.msra.mxu0 %v6506_v15 }
 0x52e   :  { %6024 = vmatprep.subr.bf16.mxu0 %v6396_v16  ;;  %5508 = vmatprep.mubr.msk.f32.mxu0 %vm6397_vm1, %v6398_v32 }
 0x530   :  { %6020 = vmatpush3.bf16.msra.mxu1 %v6570_v31 }
 0x531   :  { %6027 = vmatprep.subr.bf16.mxu1 %v6396_v16  ;;  %6026 = vmatpush3.bf16.msra.mxu0 %v6529_v22 }
 0x532   :  { %6033 = vmatprep.subr.bf16.mxu0 %v6396_v16 }
 0x533   :  { %5498 = vmatmul.mubr.msk.f32.vlgmr.msra.gmra.mrb[28].mxu1 %vm185_vm2, %v1651_v57 }
 0x534   :  { %6029 = vmatpush3.bf16.msra.mxu1 %v6577_v33  ;;  %5519 = vmatprep.mubr.msk.f32.mxu1 %vm6397_vm1, %v6398_v32 }
 0x535   :  { %6030 = vmatprep.subr.bf16.mxu1 %v6396_v16 }
 0x538   :  { %6032 = vmatpush3.bf16.msra.mxu1 %v6591_v36 }
 0x539   :  { %6039 = vmatprep.subr.bf16.mxu1 %v6396_v16 }
 0x5fe   :  { %v1723_v59 = vpop.f32.mrb[26].mxu1  ;;  %v1801_v60 = vpop.f32.mrb[28].mxu0 }
 0x5ff   :  { %v1727_v61 = vadd.f32 %v1723_v59, %v1653_v58  ;;  %v5477_v62 = vpop.f32.mrb[27].mxu1  ;;  %v5488_v63 = vpop.f32.mrb[29].mxu0  ;;  %v1805_v2 = vadd.f32 %v1801_v60, %v1734_v1  ;;  %v6061_v58 = vpack.c.bf16 %v2378_v56, %v2377_v55  ;;  %v4867_v59 = vld [vmem:[%s7217_s5 + $0x20] sm:$0xff]  ;;  %v4868_v60 = vld [vmem:[%s7217_s5 + $0x28] sm:$0xff] }
 0x600   :  { %v6065_v62 = vpack.c.bf16 %v4868_v60, %v4867_v59  ;;  %v4869_v63 = vld [vmem:[%s7217_s5 + $0x30] sm:$0xff]  ;;  %v6835_v1 = vld [vmem:[#allocation5 + $0x8] sm:$0xff] }
 0x601   :  { %v4844_v0 = vmul.f32 -1.442695, %v1727_v61  ;;  %v4846_v3 = vmul.f32 -1.442695, %v1805_v2  ;;  %v6821_v61 = vld [vmem:[#allocation5] sm:$0xff]  ;;  %v6841_v2 = vld [vmem:[#allocation5 + $0x10] sm:$0xff] }
 0x603   :  { %6286 = vpow2.f32 %v4844_v0 }
 0x604   :  { %6288 = vpow2.f32 %v4846_v3  ;;  %v6851_v3 = vld [vmem:[#allocation5 + $0x20] sm:$0xff] }
 0x606   :  { %v1879_v4 = vpop.f32.mrb[28].mxu1 }
 0x607   :  { %v5499_v5 = vpop.f32.mrb[29].mxu1  ;;  %v1880_v10 = vadd.f32 %v6654_v46, %v1879_v4 }
 0x60d   :  { %v6287_v6 = vpop.eup %6286 }
 0x60e   :  { %v1731_v7 = vadd.f32 1.0, %v6287_v6  ;;  %v6289_v8 = vpop.eup %6288  ;;  %v4881_v6 = vld [vmem:[%s7217_s5 + $0x40] sm:$0xff] }
 0x60f   :  { %v1809_v9 = vadd.f32 1.0, %v6289_v8  ;;  %v2775_v8 = vld [vmem:[%s7218_s7] sm:$0xff] }
 0x610   :  { %6290 = vrcp.f32 %v1731_v7  ;;  %v4882_v7 = vld [vmem:[%s7217_s5 + $0x48] sm:$0xff] }
 0x611   :  { %6292 = vrcp.f32 %v1809_v9  ;;  %v2776_v9 = vld [vmem:[%s7218_s7 + $0x8] sm:$0xff] }
 0x61a   :  { %v6291_v11 = vpop.eup %6290 }
 0x61b   :  { %v1883_v12 = vmul.f32 %v6291_v11, %v1880_v10  ;;  %v6293_v17 = vpop.eup %6292  ;;  %v6073_v10 = vpack.c.bf16 %v4882_v7, %v4881_v6  ;;  %v2777_v11 = vld [vmem:[%s7218_s7 + $0x10] sm:$0xff] }
 0x61c   :  { %v1886_v18 = vsub.f32 1.0, %v6293_v17  ;;  %v1888_v21 = vmul.f32 %v6293_v17, %v1651_v57  ;;  %v4883_v17 = vld [vmem:[%s7217_s5 + $0x50] sm:$0xff] }
 0x61d   :  { %v1884_v14 = vadd.f32 %v1883_v12, %v1812_v13  ;;  %v6891_v12 = vpack.c.bf16 %v2776_v9, %v2775_v8  ;;  %v2778_v13 = vld [vmem:[%s7218_s7 + $0x18] sm:$0xff] }
 0x61f   :  { %6294 = vtanh.f32 %v1884_v14  ;;  %v6897_v14 = vpack.c.bf16 %v2778_v13, %v2777_v11 }
 0x629   :  { %v6295_v19 = vpop.eup %6294 }
 0x62a   :  { %v1887_v20 = vmul.f32 %v6295_v19, %v1886_v18  ;;  %v4884_v18 = vld [vmem:[%s7217_s5 + $0x58] sm:$0xff] }
 0x62b   :  { %v6077_v19 = vpack.c.bf16 %v4884_v18, %v4883_v17 }
 0x62c   :  { %v1889_v23 = vadd.f32 %v1888_v21, %v1887_v20  ;;  %v2129_v20 = vld [vmem:[#allocation2 + $0x38] sm:$0xff] }
 0x62e   :  { %1890 = vst.msk [vmem:[#allocation5 + $0x28] sm:$0xff] %vm185_vm2, %v1889_v23  ;;  %5509 = vmatmul.mubr.msk.f32.vlgmr.msra.gmra.mrb[30].mxu0 %vm185_vm2, %v1889_v23  ;;  %5520 = vmatmul.mubr.msk.f32.vlgmr.msra.gmra.mrb[30].mxu1 %vm185_vm2, %v1889_v23 }
 0x62f   :  { %6035 = vmatpush3.bf16.msra.mxu0 %v6547_v26  ;;  %5530 = vmatprep.mubr.msk.f32.mxu0 %vm6397_vm1, %v6398_v32 }
 0x630   :  { %6036 = vmatprep.subr.bf16.mxu0 %v6396_v16  ;;  %6041 = vmatpush3.bf16.msra.mxu1 %v6506_v15  ;;  %v2375_v15 = vld [vmem:[%s7217_s5] sm:$0xff] }
 0x631   :  { %6042 = vmatprep.subr.bf16.mxu1 %v6396_v16  ;;  %5541 = vmatprep.mubr.msk.f32.mxu1 %vm6397_vm1, %v6398_v32 }
 0x633   :  { %6038 = vmatpush3.bf16.msra.mxu0 %v6570_v31 }
 0x634   :  { %6045 = vmatprep.subr.bf16.mxu0 %v6396_v16  ;;  %6044 = vmatpush3.bf16.msra.mxu1 %v6529_v22  ;;  %v2376_v22 = vld [vmem:[%s7217_s5 + $0x8] sm:$0xff] }
 0x635   :  { %6051 = vmatprep.subr.bf16.mxu1 %v6396_v16  ;;  %v6057_v24 = vpack.c.bf16 %v2376_v22, %v2375_v15  ;;  %v6856_v4 = vld [vmem:[#allocation5 + $0x28] sm:$0xff] }
 0x636   :  { %5531 = vmatmul.mubr.msk.f32.vlgmr.msra.gmra.mrb[32].mxu0 %vm185_vm2, %v1889_v23 }
 0x637   :  { %6047 = vmatpush3.bf16.msra.mxu0 %v6577_v33  ;;  %5552 = vmatprep.mubr.msk.f32.mxu0 %vm6397_vm1, %v6398_v32 }
 0x638   :  { %6048 = vmatprep.subr.bf16.mxu0 %v6396_v16 }
 0x63b   :  { %6050 = vmatpush3.bf16.msra.mxu0 %v6591_v36 }
 0x63c   :  { %6058 = vmatprep.subr.bf16.mxu0 %v6057_v24 }
 0x701   :  { %v1961_v27 = vpop.f32.mrb[30].mxu0  ;;  %v2039_v33 = vpop.f32.mrb[30].mxu1 }
 0x702   :  { %v1965_v28 = vadd.f32 %v1961_v27, %v1891_v25  ;;  %v5510_v29 = vpop.f32.mrb[31].mxu0  ;;  %v5521_v30 = vpop.f32.mrb[31].mxu1  ;;  %v2043_v37 = vadd.f32 %v2039_v33, %v1972_v35  ;;  %v2210_v27 = vld [vmem:[#allocation3 + $0x38] sm:$0xff] }
 0x704   :  { %v4849_v34 = vmul.f32 -1.442695, %v1965_v28  ;;  %v4851_v36 = vmul.f32 -1.442695, %v2043_v37  ;;  %v6912_v28 = vld [vmem:[%s7219_s6] ss:$0 sm:$0xff] }
 0x706   :  { %6296 = vpow2.f32 %v4849_v34 }
 0x707   :  { %6298 = vpow2.f32 %v4851_v36 }
 0x709   :  { %v2117_v38 = vpop.f32.mrb[32].mxu0 }
 0x70a   :  { %v5532_v39 = vpop.f32.mrb[33].mxu0  ;;  %v2118_v44 = vadd.f32 %v6654_v46, %v2117_v38 }
 0x710   :  { %v6297_v40 = vpop.eup %6296 }
 0x711   :  { %v1969_v41 = vadd.f32 1.0, %v6297_v40  ;;  %v6299_v42 = vpop.eup %6298 }
 0x712   :  { %v2047_v43 = vadd.f32 1.0, %v6299_v42 }
 0x713   :  { %6300 = vrcp.f32 %v1969_v41 }
 0x714   :  { %6302 = vrcp.f32 %v2047_v43  ;;  %v6923_v43 = vld [vmem:[%s7219_s6 + $0x1] ss:$0 sm:$0xff] }
 0x71d   :  { %v6301_v45 = vpop.eup %6300 }
 0x71e   :  { %v2121_v47 = vmul.f32 %v6301_v45, %v2118_v44  ;;  %v6303_v50 = vpop.eup %6302 }
 0x71f   :  { %v2124_v51 = vsub.f32 1.0, %v6303_v50  ;;  %v2126_v54 = vmul.f32 %v6303_v50, %v1889_v23 }
 0x720   :  { %v2122_v49 = vadd.f32 %v2121_v47, %v2050_v48 }
 0x722   :  { %6304 = vtanh.f32 %v2122_v49 }
 0x72c   :  { %v6305_v52 = vpop.eup %6304 }
 0x72d   :  { %v2125_v53 = vmul.f32 %v6305_v52, %v2124_v51 }
 0x72f   :  { %v6806_v57 = vadd.f32 %v2126_v54, %v2125_v53 }
 0x731   :  { %2128 = vst.msk [vmem:[#allocation5 + $0x30] sm:$0xff] %vm185_vm2, %v6806_v57  ;;  %5542 = vmatmul.mubr.msk.f32.vlgmr.msra.gmra.mrb[32].mxu1 %vm185_vm2, %v6806_v57  ;;  %5553 = vmatmul.mubr.msk.f32.vlgmr.msra.gmra.mrb[34].mxu0 %vm185_vm2, %v6806_v57 }
 0x732   :  { %6053 = vmatpush3.bf16.msra.mxu1 %v6547_v26  ;;  %6060 = vmatpush3.bf16.msra.mxu0 %v6057_v24  ;;  %v4870_v26 = vld [vmem:[%s7217_s5 + $0x38] sm:$0xff] }
 0x733   :  { %5574 = vmatprep.mubr.msk.f32.mxu0 %vm185_vm2, %v6821_v61  ;;  %6054 = vmatprep.subr.bf16.mxu1 %v6396_v16  ;;  %v6069_v0 = vpack.c.bf16 %v4870_v26, %v4869_v63 }
 0x734   :  { %6062 = vmatprep.subr.bf16.mxu0 %v6061_v58  ;;  %5563 = vmatprep.mubr.msk.f32.mxu1 %vm6397_vm1, %v6398_v32 }
 0x736   :  { %6056 = vmatpush3.bf16.msra.mxu1 %v6570_v31  ;;  %6064 = vmatpush3.bf16.msra.mxu0 %v6061_v58  ;;  %v6847_v31 = vld [vmem:[#allocation5 + $0x18] sm:$0xff] }
 0x737   :  { %6066 = vmatprep.subr.bf16.mxu1 %v6065_v62  ;;  %6074 = vmatprep.subr.bf16.mxu0 %v6073_v10 }
 0x738   :  { %v6862_v5 = vld [vmem:[#allocation5 + $0x30] sm:$0xff] }
 0x739   :  { %5564 = vmatmul.mubr.msk.f32.vlgmr.msra.gmra.mrb[34].mxu1 %vm185_vm2, %v6806_v57  ;;  %5575 = vmatmul.mubr.msk.f32.vlgmr.msra.gmra.mrb[36].mxu0 %vm185_vm2, %v6835_v1 }
 0x73a   :  { %5577 = vmatprep.mubr.msk.f32.mxu0 %vm185_vm2, %v6841_v2  ;;  %6068 = vmatpush3.bf16.msra.mxu1 %v6065_v62 }
 0x73b   :  { %5594 = vmatprep.mubr.msk.f32.mxu1 %vm185_vm2, %v6821_v61  ;;  %6070 = vmatprep.subr.bf16.mxu1 %v6069_v0 }
 0x73c   :  { %6076 = vmatpush3.bf16.msra.mxu0 %v6073_v10  ;;  %v2288_v10 = vld [vmem:[#allocation4 + $0x38] sm:$0xff] }
 0x73d   :  { %5578 = vmatmul.mubr.msk.f32.gmra.mrb[38].mxu0 %vm185_vm2, %v6847_v31  ;;  %6078 = vmatprep.subr.bf16.mxu0 %v6077_v19 }
 0x73e   :  { %5580 = vmatprep.mubr.msk.f32.mxu0 %vm185_vm2, %v6851_v3  ;;  %6072 = vmatpush3.bf16.msra.mxu1 %v6069_v0 }
 0x73f   :  { %6081 = vmatprep.subr.bf16.mxu1 %v6396_v16 }
 0x740   :  { %6080 = vmatpush3.bf16.msra.mxu0 %v6077_v19 }
 0x741   :  { %5581 = vmatmul.mubr.msk.f32.gmra.mrb[40].mxu0 %vm185_vm2, %v6856_v4  ;;  %5595 = vmatmul.mubr.msk.f32.vlgmr.msra.gmra.mrb[36].mxu1 %vm185_vm2, %v6835_v1 }
 0x742   :  { %5583 = vmatprep.mubr.msk.f32.mxu0 %vm185_vm2, %v6862_v5  ;;  %5597 = vmatprep.mubr.msk.f32.mxu1 %vm185_vm2, %v6841_v2 }
 0x743   :  { %6083 = vmatpush3.bf16.msra.mxu1 %v6891_v12  ;;  %6093 = vmatprep.subr.bf16.mxu0 %v6396_v16 }
 0x744   :  { %6084 = vmatprep.subr.bf16.mxu1 %v6396_v16 }
 0x745   :  { %5598 = vmatmul.mubr.msk.f32.gmra.mrb[38].mxu1 %vm185_vm2, %v6847_v31 }
 0x746   :  { %5600 = vmatprep.mubr.msk.f32.mxu1 %vm185_vm2, %v6851_v3 }
 0x747   :  { %6086 = vmatpush3.bf16.msra.mxu1 %v6897_v14 }
 0x748   :  { %6087 = vmatprep.subr.bf16.mxu1 %v6396_v16 }
 0x749   :  { %5601 = vmatmul.mubr.msk.f32.gmra.mrb[40].mxu1 %vm185_vm2, %v6856_v4 }
 0x74a   :  { %5603 = vmatprep.mubr.msk.f32.mxu1 %vm185_vm2, %v6862_v5 }
 0x804   :  { %v2199_v21 = vpop.f32.mrb[32].mxu1  ;;  %v2277_v23 = vpop.f32.mrb[34].mxu0 }
 0x805   :  { %v2203_v15 = vadd.f32 %v2199_v21, %v2129_v20  ;;  %v5543_v22 = vpop.f32.mrb[33].mxu1  ;;  %v5554_v24 = vpop.f32.mrb[35].mxu0  ;;  %v2281_v33 = vadd.f32 %v2277_v23, %v2210_v27  ;;  %v4896_v23 = vld [vmem:[%s7218_s7 + $0x28] sm:$0xff]  ;;  %v4898_v27 = vld [vmem:[%s7218_s7 + $0x38] sm:$0xff] }
 0x806   :  { %v4900_v22 = vld [vmem:[%s7218_s7 + $0x48] sm:$0xff] }
 0x807   :  { %v4854_v25 = vmul.f32 -1.442695, %v2203_v15  ;;  %v4856_v29 = vmul.f32 -1.442695, %v2281_v33 }
 0x809   :  { %6306 = vpow2.f32 %v4854_v25  ;;  %v4897_v25 = vld [vmem:[%s7218_s7 + $0x30] sm:$0xff] }
 0x80a   :  { %6308 = vpow2.f32 %v4856_v29  ;;  %v4902_v29 = vld [vmem:[%s7218_s7 + $0x58] sm:$0xff] }
 0x80c   :  { %v2355_v30 = vpop.f32.mrb[34].mxu1  ;;  %v5576_v34 = vpop.f32.mrb[36].mxu0 }
 0x80d   :  { %v2482_v35 = vadd.f32 %v5576_v34, %v6912_v28  ;;  %v5565_v37 = vpop.f32.mrb[35].mxu1  ;;  %v2476_v36 = vpop.f32.mrb[37].mxu0  ;;  %v2356_v7 = vadd.f32 %v6654_v46, %v2355_v30  ;;  %v4895_v46 = vld [vmem:[%s7218_s7 + $0x20] sm:$0xff]  ;;  %v6986_v30 = vpack.c.bf16 %v4898_v27, %v4897_v25 }
 0x80e   :  { %v2477_v38 = vadd.f32 %v6912_v28, %v2476_v36  ;;  %v6964_v24 = vpack.c.bf16 %v4896_v23, %v4895_v46  ;;  %v4886_v36 = vld [vmem:[%s7219_s6 + $0x2] ss:$0 sm:$0xff] }
 0x80f   :  { %2516 = vst.msk [vmem:[#allocation2 + $0x8] sm:$0xff] %vm185_vm2, %v2482_v35 }
 0x810   :  { %2515 = vst.msk [vmem:[#allocation2] sm:$0xff] %vm185_vm2, %v2477_v38  ;;  %v5579_v39 = vpop.f32.mrb[38].mxu0 }
 0x811   :  { %v2492_v40 = vadd.f32 %v5579_v39, %v6912_v28  ;;  %v2486_v41 = vpop.f32.mrb[39].mxu0 }
 0x812   :  { %v2487_v42 = vadd.f32 %v6912_v28, %v2486_v41 }
 0x813   :  { %v6307_v44 = vpop.eup %6306  ;;  %2518 = vst.msk [vmem:[#allocation2 + $0x18] sm:$0xff] %vm185_vm2, %v2492_v40 }
 0x814   :  { %v2207_v45 = vadd.f32 1.0, %v6307_v44  ;;  %2517 = vst.msk [vmem:[#allocation2 + $0x10] sm:$0xff] %vm185_vm2, %v2487_v42  ;;  %v5582_v47 = vpop.f32.mrb[40].mxu0  ;;  %v5596_v48 = vpop.f32.mrb[36].mxu1 }
 0x815   :  { %v2502_v49 = vadd.f32 %v5582_v47, %v6912_v28  ;;  %v2608_v50 = vadd.f32 %v5596_v48, %v6923_v43  ;;  %v2496_v51 = vpop.f32.mrb[41].mxu0  ;;  %v2602_v52 = vpop.f32.mrb[37].mxu1 }
 0x816   :  { %6310 = vrcp.f32 %v2207_v45  ;;  %v2497_v53 = vadd.f32 %v6912_v28, %v2496_v51  ;;  %v2603_v54 = vadd.f32 %v6923_v43, %v2602_v52  ;;  %v6309_v59 = vpop.eup %6308  ;;  %v3030_v27 = vld [vmem:[#allocation2 + $0x8] sm:$0xff] }
 0x817   :  { %2520 = vst.msk [vmem:[#allocation2 + $0x28] sm:$0xff] %vm185_vm2, %v2502_v49  ;;  %2642 = vst.msk [vmem:[#allocation3 + $0x8] sm:$0xff] %vm185_vm2, %v2608_v50  ;;  %v2285_v63 = vadd.f32 1.0, %v6309_v59  ;;  %v2790_v39 = vld [vmem:[#allocation2] sm:$0xff] }
 0x818   :  { %2519 = vst.msk [vmem:[#allocation2 + $0x20] sm:$0xff] %vm185_vm2, %v2497_v53  ;;  %2641 = vst.msk [vmem:[#allocation3] sm:$0xff] %vm185_vm2, %v2603_v54  ;;  %v5599_v55 = vpop.f32.mrb[38].mxu1 }
 0x819   :  { %v2618_v56 = vadd.f32 %v5599_v55, %v6923_v43  ;;  %v2612_v58 = vpop.f32.mrb[39].mxu1  ;;  %6312 = vrcp.f32 %v2285_v63 }
 0x81a   :  { %v2613_v60 = vadd.f32 %v6923_v43, %v2612_v58 }
 0x81b   :  { %2644 = vst.msk [vmem:[#allocation3 + $0x18] sm:$0xff] %vm185_vm2, %v2618_v56 }
 0x81c   :  { %2643 = vst.msk [vmem:[#allocation3 + $0x10] sm:$0xff] %vm185_vm2, %v2613_v60  ;;  %v5602_v62 = vpop.f32.mrb[40].mxu1 }
 0x81d   :  { %v2628_v26 = vadd.f32 %v5602_v62, %v6923_v43  ;;  %v2622_v0 = vpop.f32.mrb[41].mxu1 }
 0x81e   :  { %v2623_v6 = vadd.f32 %v6923_v43, %v2622_v0 }
 0x81f   :  { %2646 = vst.msk [vmem:[#allocation3 + $0x28] sm:$0xff] %vm185_vm2, %v2628_v26  ;;  %v2868_v51 = vld [vmem:[#allocation3] sm:$0xff] }
 0x820   :  { %v6311_v8 = vpop.eup %6310  ;;  %2645 = vst.msk [vmem:[#allocation3 + $0x20] sm:$0xff] %vm185_vm2, %v2623_v6 }
 0x821   :  { %v2359_v9 = vmul.f32 %v6311_v8, %v2356_v7 }
 0x823   :  { %v2360_v11 = vadd.f32 %v2359_v9, %v2288_v10  ;;  %v6313_v13 = vpop.eup %6312  ;;  %v7046_v10 = vld [vmem:[%s7220_s8] ss:$0 sm:$0xff] }
 0x824   :  { %v2362_v17 = vsub.f32 1.0, %v6313_v13  ;;  %v2364_v19 = vmul.f32 %v6313_v13, %v6806_v57  ;;  %v4899_v57 = vld [vmem:[%s7218_s7 + $0x40] sm:$0xff] }
 0x825   :  { %6314 = vtanh.f32 %v2360_v11  ;;  %v6972_v33 = vpack.c.bf16 %v4900_v22, %v4899_v57 }
 0x82f   :  { %v6315_v18 = vpop.eup %6314 }
 0x830   :  { %v2363_v20 = vmul.f32 %v6315_v18, %v2362_v17 }
 0x832   :  { %v2365_v21 = vadd.f32 %v2364_v19, %v2363_v20 }
 0x834   :  { %2366 = vst.msk [vmem:[#allocation5 + $0x38] sm:$0xff] %vm185_vm2, %v2365_v21 }
 0x83b   :  { %v2374_v15 = vld [vmem:[#allocation5 + $0x38] sm:$0xff] }
 0x83c   :  { %5584 = vmatmul.mubr.msk.f32.gmra.mrb[42].mxu0 %vm185_vm2, %v2374_v15  ;;  %5604 = vmatmul.mubr.msk.f32.gmra.mrb[42].mxu1 %vm185_vm2, %v2374_v15 }
 0x83d   :  { %5614 = vmatprep.mubr.msk.f32.mxu0 %vm185_vm2, %v6821_v61  ;;  %5634 = vmatprep.mubr.msk.f32.mxu1 %vm6397_vm1, %v6398_v32  ;;  %v4901_v61 = vld [vmem:[%s7218_s7 + $0x50] sm:$0xff] }
 0x840   :  { %5615 = vmatmul.mubr.msk.f32.vlgmr.msra.gmra.mrb[44].mxu0 %vm185_vm2, %v6835_v1  ;;  %5635 = vmatmul.mubr.f32.vlgmr.msra.gmra.mrb[44].mxu1 %v6398_v32  ;;  %v6992_v1 = vpack.c.bf16 %v4902_v29, %v4901_v61 }
 0x841   :  { %6089 = vmatpush3.bf16.msra.mxu1 %v6964_v24  ;;  %5617 = vmatprep.mubr.msk.f32.mxu0 %vm185_vm2, %v6841_v2 }
 0x842   :  { %6090 = vmatprep.subr.bf16.mxu1 %v6396_v16  ;;  %5645 = vmatprep.mubr.msk.f32.mxu1 %vm6397_vm1, %v6398_v32 }
 0x843   :  { %6095 = vmatpush3.bf16.msra.mxu0 %v6972_v33 }
 0x844   :  { %5618 = vmatmul.mubr.msk.f32.gmra.mrb[46].mxu0 %vm185_vm2, %v6847_v31  ;;  %6096 = vmatprep.subr.bf16.mxu0 %v6396_v16 }
 0x845   :  { %6092 = vmatpush3.bf16.msra.mxu1 %v6986_v30  ;;  %5620 = vmatprep.mubr.msk.f32.mxu0 %vm185_vm2, %v6851_v3 }
 0x846   :  { %6099 = vmatprep.subr.bf16.mxu1 %v6396_v16 }
 0x847   :  { %6098 = vmatpush3.bf16.msra.mxu0 %v6992_v1 }
 0x848   :  { %5646 = vmatmul.mubr.f32.vlgmr.msra.gmra.mrb[46].mxu1 %v6398_v32  ;;  %5621 = vmatmul.mubr.msk.f32.gmra.mrb[48].mxu0 %vm185_vm2, %v6856_v4 }
 0x849   :  { %5623 = vmatprep.mubr.msk.f32.mxu0 %vm185_vm2, %v6862_v5  ;;  %6101 = vmatpush3.bf16.msra.mxu1 %v6891_v12 }
 0x84a   :  { %6105 = vmatprep.subr.bf16.mxu0 %v6396_v16  ;;  %6102 = vmatprep.subr.bf16.mxu1 %v6396_v16 }
 0x84b   :  { %5667 = vmatprep.mubr.msk.f32.mxu1 %vm6397_vm1, %v6398_v32 }
 0x84c   :  { %5624 = vmatmul.mubr.msk.f32.gmra.mrb[50].mxu0 %vm185_vm2, %v2374_v15 }
 0x84d   :  { %5656 = vmatprep.mubr.msk.f32.mxu0 %vm6397_vm1, %v6398_v32  ;;  %6104 = vmatpush3.bf16.msra.mxu1 %v6897_v14 }
 0x84e   :  { %6111 = vmatprep.subr.bf16.mxu1 %v6396_v16 }
 0x850   :  { %5657 = vmatmul.mubr.f32.vlgmr.msra.gmra.mrb[52].mxu0 %v6398_v32 }
 0x851   :  { %6107 = vmatpush3.bf16.msra.mxu0 %v6964_v24  ;;  %5678 = vmatprep.mubr.msk.f32.mxu0 %vm6397_vm1, %v6398_v32 }
 0x852   :  { %6108 = vmatprep.subr.bf16.mxu0 %v6396_v16 }
 0x855   :  { %6110 = vmatpush3.bf16.msra.mxu0 %v6986_v30 }
 0x856   :  { %6117 = vmatprep.subr.bf16.mxu0 %v6396_v16 }
 0x90f   :  { %v5585_v2 = vpop.f32.mrb[42].mxu0  ;;  %v5605_v31 = vpop.f32.mrb[42].mxu1 }
 0x910   :  { %v2512_v3 = vadd.f32 %v5585_v2, %v6912_v28  ;;  %v2638_v4 = vadd.f32 %v5605_v31, %v6923_v43  ;;  %v2506_v5 = vpop.f32.mrb[43].mxu0  ;;  %v2632_v34 = vpop.f32.mrb[43].mxu1 }
 0x911   :  { %v2507_v35 = vadd.f32 %v6912_v28, %v2506_v5  ;;  %v2633_v37 = vadd.f32 %v6923_v43, %v2632_v34  ;;  %v3111_v5 = vld [vmem:[#allocation3 + $0x8] sm:$0xff] }
 0x912   :  { %2522 = vst.msk [vmem:[#allocation2 + $0x38] sm:$0xff] %vm185_vm2, %v2512_v3  ;;  %2648 = vst.msk [vmem:[#allocation3 + $0x38] sm:$0xff] %vm185_vm2, %v2638_v4 }
 0x913   :  { %2521 = vst.msk [vmem:[#allocation2 + $0x30] sm:$0xff] %vm185_vm2, %v2507_v35  ;;  %2647 = vst.msk [vmem:[#allocation3 + $0x30] sm:$0xff] %vm185_vm2, %v2633_v37  ;;  %v5616_v38 = vpop.f32.mrb[44].mxu0  ;;  %v2857_v40 = vpop.f32.mrb[44].mxu1 }
 0x914   :  { %v2734_v41 = vadd.f32 %v5616_v38, %v4886_v36  ;;  %v2861_v42 = vadd.f32 %v2857_v40, %v2790_v39  ;;  %v2728_v28 = vpop.f32.mrb[45].mxu0  ;;  %v5636_v44 = vpop.f32.mrb[45].mxu1 }
 0x915   :  { %v2729_v43 = vadd.f32 %v4886_v36, %v2728_v28 }
 0x916   :  { %2768 = vst.msk [vmem:[#allocation4 + $0x8] sm:$0xff] %vm185_vm2, %v2734_v41  ;;  %v4903_v45 = vmul.f32 -1.442695, %v2861_v42 }
 0x917   :  { %2767 = vst.msk [vmem:[#allocation4] sm:$0xff] %vm185_vm2, %v2729_v43  ;;  %v5619_v47 = vpop.f32.mrb[46].mxu0 }
 0x918   :  { %6316 = vpow2.f32 %v4903_v45  ;;  %v2744_v48 = vadd.f32 %v5619_v47, %v4886_v36  ;;  %v2738_v49 = vpop.f32.mrb[47].mxu0 }
 0x919   :  { %v2739_v50 = vadd.f32 %v4886_v36, %v2738_v49 }
 0x91a   :  { %2770 = vst.msk [vmem:[#allocation4 + $0x18] sm:$0xff] %vm185_vm2, %v2744_v48 }
 0x91b   :  { %2769 = vst.msk [vmem:[#allocation4 + $0x10] sm:$0xff] %vm185_vm2, %v2739_v50  ;;  %v2935_v52 = vpop.f32.mrb[46].mxu1  ;;  %v5622_v53 = vpop.f32.mrb[48].mxu0 }
 0x91c   :  { %v2939_v54 = vadd.f32 %v2935_v52, %v2868_v51  ;;  %v2754_v55 = vadd.f32 %v5622_v53, %v4886_v36  ;;  %v2748_v56 = vpop.f32.mrb[49].mxu0  ;;  %v5647_v58 = vpop.f32.mrb[47].mxu1  ;;  %v3267_v53 = vld [vmem:[#allocation2 + $0x10] sm:$0xff] }
 0x91d   :  { %v2749_v59 = vadd.f32 %v4886_v36, %v2748_v56  ;;  %v3189_v43 = vld [vmem:[#allocation4 + $0x8] sm:$0xff] }
 0x91e   :  { %v4904_v60 = vmul.f32 -1.442695, %v2939_v54  ;;  %2772 = vst.msk [vmem:[#allocation4 + $0x28] sm:$0xff] %vm185_vm2, %v2754_v55  ;;  %v2946_v20 = vld [vmem:[#allocation4] sm:$0xff] }
 0x91f   :  { %2771 = vst.msk [vmem:[#allocation4 + $0x20] sm:$0xff] %vm185_vm2, %v2749_v59  ;;  %v5625_v62 = vpop.f32.mrb[50].mxu0 }
 0x920   :  { %6318 = vpow2.f32 %v4904_v60  ;;  %v2764_v63 = vadd.f32 %v5625_v62, %v4886_v36  ;;  %v2758_v26 = vpop.f32.mrb[51].mxu0  ;;  %v3348_v62 = vld [vmem:[#allocation3 + $0x10] sm:$0xff] }
 0x921   :  { %v2759_v0 = vadd.f32 %v4886_v36, %v2758_v26 }
 0x922   :  { %v6317_v6 = vpop.eup %6316  ;;  %2774 = vst.msk [vmem:[#allocation4 + $0x38] sm:$0xff] %vm185_vm2, %v2764_v63 }
 0x923   :  { %v2865_v7 = vadd.f32 1.0, %v6317_v6  ;;  %2773 = vst.msk [vmem:[#allocation4 + $0x30] sm:$0xff] %vm185_vm2, %v2759_v0  ;;  %v3019_v8 = vpop.f32.mrb[52].mxu0 }
 0x924   :  { %v5658_v9 = vpop.f32.mrb[53].mxu0  ;;  %v3020_v17 = vadd.f32 %v7046_v10, %v3019_v8 }
 0x925   :  { %6320 = vrcp.f32 %v2865_v7 }
 0x92a   :  { %v6319_v11 = vpop.eup %6318 }
 0x92b   :  { %v2943_v13 = vadd.f32 1.0, %v6319_v11 }
 0x92d   :  { %6322 = vrcp.f32 %v2943_v13 }
 0x92f   :  { %v6321_v18 = vpop.eup %6320 }
 0x930   :  { %v3023_v19 = vmul.f32 %v6321_v18, %v3020_v17 }
 0x932   :  { %v3024_v21 = vadd.f32 %v3023_v19, %v2946_v20  ;;  %v3426_v19 = vld [vmem:[#allocation4 + $0x10] sm:$0xff] }
 0x934   :  { %6324 = vtanh.f32 %v3024_v21 }
 0x937   :  { %v6323_v46 = vpop.eup %6322 }
 0x938   :  { %v3026_v23 = vsub.f32 1.0, %v6323_v46  ;;  %v3028_v22 = vmul.f32 0.0, %v6323_v46 }
 0x93e   :  { %v6325_v15 = vpop.eup %6324 }
 0x93f   :  { %v3027_v57 = vmul.f32 %v6325_v15, %v3026_v23 }
 0x941   :  { %v3029_v25 = vadd.f32 %v3028_v22, %v3027_v57 }
 0x943   :  { %5668 = vmatmul.mubr.msk.f32.vlgmr.msra.gmra.mrb[48].mxu1 %vm185_vm2, %v3029_v25  ;;  %5679 = vmatmul.mubr.msk.f32.vlgmr.msra.gmra.mrb[54].mxu0 %vm185_vm2, %v3029_v25 }
 0x944   :  { %6113 = vmatpush3.bf16.msra.mxu1 %v6972_v33  ;;  %5689 = vmatprep.mubr.msk.f32.mxu1 %vm6397_vm1, %v6398_v32 }
 0x945   :  { %6114 = vmatprep.subr.bf16.mxu1 %v6396_v16  ;;  %6119 = vmatpush3.bf16.msra.mxu0 %v6891_v12 }
 0x946   :  { %6120 = vmatprep.subr.bf16.mxu0 %v6396_v16  ;;  %5700 = vmatprep.mubr.msk.f32.mxu0 %vm6397_vm1, %v6398_v32 }
 0x948   :  { %6116 = vmatpush3.bf16.msra.mxu1 %v6992_v1 }
 0x949   :  { %6123 = vmatprep.subr.bf16.mxu1 %v6396_v16  ;;  %6122 = vmatpush3.bf16.msra.mxu0 %v6897_v14 }
 0x94a   :  { %6129 = vmatprep.subr.bf16.mxu0 %v6396_v16 }
 0x94b   :  { %5690 = vmatmul.mubr.msk.f32.vlgmr.msra.gmra.mrb[50].mxu1 %vm185_vm2, %v3029_v25 }
 0x94c   :  { %6125 = vmatpush3.bf16.msra.mxu1 %v6964_v24  ;;  %5711 = vmatprep.mubr.msk.f32.mxu1 %vm6397_vm1, %v6398_v32 }
 0x94d   :  { %6126 = vmatprep.subr.bf16.mxu1 %v6396_v16 }
 0x950   :  { %6128 = vmatpush3.bf16.msra.mxu1 %v6986_v30 }
 0x951   :  { %6135 = vmatprep.subr.bf16.mxu1 %v6396_v16 }
 0xa16   :  { %v3100_v61 = vpop.f32.mrb[48].mxu1  ;;  %v3178_v29 = vpop.f32.mrb[54].mxu0 }
 0xa17   :  { %v3104_v2 = vadd.f32 %v3100_v61, %v3030_v27  ;;  %v5669_v31 = vpop.f32.mrb[49].mxu1  ;;  %v5680_v3 = vpop.f32.mrb[55].mxu0  ;;  %v3182_v34 = vadd.f32 %v3178_v29, %v3111_v5 }
 0xa19   :  { %v4907_v4 = vmul.f32 -1.442695, %v3104_v2  ;;  %v4909_v35 = vmul.f32 -1.442695, %v3182_v34 }
 0xa1b   :  { %6326 = vpow2.f32 %v4907_v4  ;;  %v3585_v4 = vld [vmem:[#allocation3 + $0x18] sm:$0xff] }
 0xa1c   :  { %6328 = vpow2.f32 %v4909_v35 }
 0xa1e   :  { %v3256_v37 = vpop.f32.mrb[50].mxu1 }
 0xa1f   :  { %v5691_v36 = vpop.f32.mrb[51].mxu1  ;;  %v3257_v42 = vadd.f32 %v7046_v10, %v3256_v37 }
 0xa25   :  { %v6327_v38 = vpop.eup %6326 }
 0xa26   :  { %v3108_v39 = vadd.f32 1.0, %v6327_v38  ;;  %v6329_v40 = vpop.eup %6328 }
 0xa27   :  { %v3186_v41 = vadd.f32 1.0, %v6329_v40 }
 0xa28   :  { %6330 = vrcp.f32 %v3108_v39 }
 0xa29   :  { %6332 = vrcp.f32 %v3186_v41 }
 0xa32   :  { %v6331_v28 = vpop.eup %6330 }
 0xa33   :  { %v3260_v44 = vmul.f32 %v6331_v28, %v3257_v42  ;;  %v6333_v47 = vpop.eup %6332 }
 0xa34   :  { %v3263_v48 = vsub.f32 1.0, %v6333_v47  ;;  %v3265_v51 = vmul.f32 %v6333_v47, %v3029_v25  ;;  %v3504_v25 = vld [vmem:[#allocation2 + $0x18] sm:$0xff] }
 0xa35   :  { %v3261_v45 = vadd.f32 %v3260_v44, %v3189_v43  ;;  %v3663_v44 = vld [vmem:[#allocation4 + $0x18] sm:$0xff] }
 0xa37   :  { %6334 = vtanh.f32 %v3261_v45 }
 0xa41   :  { %v6335_v49 = vpop.eup %6334 }
 0xa42   :  { %v3264_v50 = vmul.f32 %v6335_v49, %v3263_v48 }
 0xa44   :  { %v3266_v52 = vadd.f32 %v3265_v51, %v3264_v50 }
 0xa46   :  { %5701 = vmatmul.mubr.msk.f32.vlgmr.msra.gmra.mrb[56].mxu0 %vm185_vm2, %v3266_v52  ;;  %5712 = vmatmul.mubr.msk.f32.vlgmr.msra.gmra.mrb[52].mxu1 %vm185_vm2, %v3266_v52 }
 0xa47   :  { %6131 = vmatpush3.bf16.msra.mxu0 %v6972_v33  ;;  %5722 = vmatprep.mubr.msk.f32.mxu0 %vm6397_vm1, %v6398_v32 }
 0xa48   :  { %6132 = vmatprep.subr.bf16.mxu0 %v6396_v16  ;;  %6137 = vmatpush3.bf16.msra.mxu1 %v6891_v12 }
 0xa49   :  { %6138 = vmatprep.subr.bf16.mxu1 %v6396_v16  ;;  %5733 = vmatprep.mubr.msk.f32.mxu1 %vm6397_vm1, %v6398_v32 }
 0xa4b   :  { %6134 = vmatpush3.bf16.msra.mxu0 %v6992_v1 }
 0xa4c   :  { %6141 = vmatprep.subr.bf16.mxu0 %v6396_v16  ;;  %6140 = vmatpush3.bf16.msra.mxu1 %v6897_v14 }
 0xa4d   :  { %6147 = vmatprep.subr.bf16.mxu1 %v6396_v16 }
 0xa4e   :  { %5723 = vmatmul.mubr.msk.f32.vlgmr.msra.gmra.mrb[58].mxu0 %vm185_vm2, %v3266_v52 }
 0xa4f   :  { %6143 = vmatpush3.bf16.msra.mxu0 %v6964_v24  ;;  %5744 = vmatprep.mubr.msk.f32.mxu0 %vm6397_vm1, %v6398_v32 }
 0xa50   :  { %6144 = vmatprep.subr.bf16.mxu0 %v6396_v16 }
 0xa53   :  { %6146 = vmatpush3.bf16.msra.mxu0 %v6986_v30 }
 0xa54   :  { %6153 = vmatprep.subr.bf16.mxu0 %v6396_v16 }
 0xb19   :  { %v3337_v54 = vpop.f32.mrb[56].mxu0  ;;  %v3415_v55 = vpop.f32.mrb[52].mxu1 }
 0xb1a   :  { %v3341_v56 = vadd.f32 %v3337_v54, %v3267_v53  ;;  %v5702_v58 = vpop.f32.mrb[57].mxu0  ;;  %v5713_v59 = vpop.f32.mrb[53].mxu1  ;;  %v3419_v63 = vadd.f32 %v3415_v55, %v3348_v62 }
 0xb1c   :  { %v4912_v60 = vmul.f32 -1.442695, %v3341_v56  ;;  %v4914_v26 = vmul.f32 -1.442695, %v3419_v63 }
 0xb1e   :  { %6336 = vpow2.f32 %v4912_v60  ;;  %v3822_v60 = vld [vmem:[#allocation3 + $0x20] sm:$0xff] }
 0xb1f   :  { %6338 = vpow2.f32 %v4914_v26 }
 0xb21   :  { %v3493_v0 = vpop.f32.mrb[58].mxu0 }
 0xb22   :  { %v5724_v6 = vpop.f32.mrb[59].mxu0  ;;  %v3494_v13 = vadd.f32 %v7046_v10, %v3493_v0 }
 0xb28   :  { %v6337_v7 = vpop.eup %6336 }
 0xb29   :  { %v3345_v8 = vadd.f32 1.0, %v6337_v7  ;;  %v6339_v9 = vpop.eup %6338 }
 0xb2a   :  { %v3423_v11 = vadd.f32 1.0, %v6339_v9 }
 0xb2b   :  { %6340 = vrcp.f32 %v3345_v8 }
 0xb2c   :  { %6342 = vrcp.f32 %v3423_v11 }
 0xb35   :  { %v6341_v17 = vpop.eup %6340 }
 0xb36   :  { %v3497_v18 = vmul.f32 %v6341_v17, %v3494_v13  ;;  %v6343_v21 = vpop.eup %6342 }
 0xb37   :  { %v3500_v46 = vsub.f32 1.0, %v6343_v21  ;;  %v3502_v57 = vmul.f32 %v6343_v21, %v3266_v52  ;;  %v3741_v52 = vld [vmem:[#allocation2 + $0x20] sm:$0xff] }
 0xb38   :  { %v3498_v20 = vadd.f32 %v3497_v18, %v3426_v19  ;;  %v3900_v18 = vld [vmem:[#allocation4 + $0x20] sm:$0xff] }
 0xb3a   :  { %6344 = vtanh.f32 %v3498_v20 }
 0xb44   :  { %v6345_v23 = vpop.eup %6344 }
 0xb45   :  { %v3501_v15 = vmul.f32 %v6345_v23, %v3500_v46 }
 0xb47   :  { %v3503_v22 = vadd.f32 %v3502_v57, %v3501_v15 }
 0xb49   :  { %5734 = vmatmul.mubr.msk.f32.vlgmr.msra.gmra.mrb[54].mxu1 %vm185_vm2, %v3503_v22  ;;  %5745 = vmatmul.mubr.msk.f32.vlgmr.msra.gmra.mrb[60].mxu0 %vm185_vm2, %v3503_v22 }
 0xb4a   :  { %6149 = vmatpush3.bf16.msra.mxu1 %v6972_v33  ;;  %5755 = vmatprep.mubr.msk.f32.mxu1 %vm6397_vm1, %v6398_v32 }
 0xb4b   :  { %6150 = vmatprep.subr.bf16.mxu1 %v6396_v16  ;;  %6155 = vmatpush3.bf16.msra.mxu0 %v6891_v12 }
 0xb4c   :  { %6156 = vmatprep.subr.bf16.mxu0 %v6396_v16  ;;  %5766 = vmatprep.mubr.msk.f32.mxu0 %vm6397_vm1, %v6398_v32 }
 0xb4e   :  { %6152 = vmatpush3.bf16.msra.mxu1 %v6992_v1 }
 0xb4f   :  { %6159 = vmatprep.subr.bf16.mxu1 %v6396_v16  ;;  %6158 = vmatpush3.bf16.msra.mxu0 %v6897_v14 }
 0xb50   :  { %6165 = vmatprep.subr.bf16.mxu0 %v6396_v16 }
 0xb51   :  { %5756 = vmatmul.mubr.msk.f32.vlgmr.msra.gmra.mrb[56].mxu1 %vm185_vm2, %v3503_v22 }
 0xb52   :  { %6161 = vmatpush3.bf16.msra.mxu1 %v6964_v24  ;;  %5777 = vmatprep.mubr.msk.f32.mxu1 %vm6397_vm1, %v6398_v32 }
 0xb53   :  { %6162 = vmatprep.subr.bf16.mxu1 %v6396_v16 }
 0xb56   :  { %6164 = vmatpush3.bf16.msra.mxu1 %v6986_v30 }
 0xb57   :  { %6171 = vmatprep.subr.bf16.mxu1 %v6396_v16 }
 0xc1c   :  { %v3574_v27 = vpop.f32.mrb[54].mxu1  ;;  %v3652_v61 = vpop.f32.mrb[60].mxu0 }
 0xc1d   :  { %v3578_v29 = vadd.f32 %v3574_v27, %v3504_v25  ;;  %v5735_v2 = vpop.f32.mrb[55].mxu1  ;;  %v5746_v31 = vpop.f32.mrb[61].mxu0  ;;  %v3656_v5 = vadd.f32 %v3652_v61, %v3585_v4 }
 0xc1f   :  { %v4917_v3 = vmul.f32 -1.442695, %v3578_v29  ;;  %v4919_v34 = vmul.f32 -1.442695, %v3656_v5 }
 0xc21   :  { %6346 = vpow2.f32 %v4917_v3  ;;  %v4059_v3 = vld [vmem:[#allocation3 + $0x28] sm:$0xff] }
 0xc22   :  { %6348 = vpow2.f32 %v4919_v34 }
 0xc24   :  { %v3730_v35 = vpop.f32.mrb[56].mxu1 }
 0xc25   :  { %v5757_v37 = vpop.f32.mrb[57].mxu1  ;;  %v3731_v41 = vadd.f32 %v7046_v10, %v3730_v35 }
 0xc2b   :  { %v6347_v36 = vpop.eup %6346 }
 0xc2c   :  { %v3582_v38 = vadd.f32 1.0, %v6347_v36  ;;  %v6349_v39 = vpop.eup %6348 }
 0xc2d   :  { %v3660_v40 = vadd.f32 1.0, %v6349_v39 }
 0xc2e   :  { %6350 = vrcp.f32 %v3582_v38 }
 0xc2f   :  { %6352 = vrcp.f32 %v3660_v40 }
 0xc38   :  { %v6351_v42 = vpop.eup %6350 }
 0xc39   :  { %v3734_v28 = vmul.f32 %v6351_v42, %v3731_v41  ;;  %v6353_v45 = vpop.eup %6352 }
 0xc3a   :  { %v3737_v47 = vsub.f32 1.0, %v6353_v45  ;;  %v3739_v50 = vmul.f32 %v6353_v45, %v3503_v22  ;;  %v3978_v22 = vld [vmem:[#allocation2 + $0x28] sm:$0xff] }
 0xc3b   :  { %v3735_v43 = vadd.f32 %v3734_v28, %v3663_v44  ;;  %v4137_v28 = vld [vmem:[#allocation4 + $0x28] sm:$0xff] }
 0xc3d   :  { %6354 = vtanh.f32 %v3735_v43 }
 0xc47   :  { %v6355_v48 = vpop.eup %6354 }
 0xc48   :  { %v3738_v49 = vmul.f32 %v6355_v48, %v3737_v47 }
 0xc4a   :  { %v3740_v51 = vadd.f32 %v3739_v50, %v3738_v49 }
 0xc4c   :  { %5767 = vmatmul.mubr.msk.f32.vlgmr.msra.gmra.mrb[62].mxu0 %vm185_vm2, %v3740_v51  ;;  %5778 = vmatmul.mubr.msk.f32.vlgmr.msra.gmra.mrb[58].mxu1 %vm185_vm2, %v3740_v51 }
 0xc4d   :  { %6167 = vmatpush3.bf16.msra.mxu0 %v6972_v33  ;;  %5788 = vmatprep.mubr.msk.f32.mxu0 %vm6397_vm1, %v6398_v32 }
 0xc4e   :  { %6168 = vmatprep.subr.bf16.mxu0 %v6396_v16  ;;  %6173 = vmatpush3.bf16.msra.mxu1 %v6891_v12 }
 0xc4f   :  { %6174 = vmatprep.subr.bf16.mxu1 %v6396_v16  ;;  %5799 = vmatprep.mubr.msk.f32.mxu1 %vm6397_vm1, %v6398_v32 }
 0xc51   :  { %6170 = vmatpush3.bf16.msra.mxu0 %v6992_v1 }
 0xc52   :  { %6177 = vmatprep.subr.bf16.mxu0 %v6396_v16  ;;  %6176 = vmatpush3.bf16.msra.mxu1 %v6897_v14 }
 0xc53   :  { %6183 = vmatprep.subr.bf16.mxu1 %v6396_v16 }
 0xc54   :  { %5789 = vmatmul.mubr.msk.f32.vlgmr.msra.gmra.mrb[64].mxu0 %vm185_vm2, %v3740_v51 }
 0xc55   :  { %6179 = vmatpush3.bf16.msra.mxu0 %v6964_v24  ;;  %5810 = vmatprep.mubr.msk.f32.mxu0 %vm6397_vm1, %v6398_v32 }
 0xc56   :  { %6180 = vmatprep.subr.bf16.mxu0 %v6396_v16 }
 0xc59   :  { %6182 = vmatpush3.bf16.msra.mxu0 %v6986_v30 }
 0xc5a   :  { %6189 = vmatprep.subr.bf16.mxu0 %v6396_v16 }
 0xd1f   :  { %v3811_v53 = vpop.f32.mrb[62].mxu0  ;;  %v3889_v54 = vpop.f32.mrb[58].mxu1 }
 0xd20   :  { %v3815_v55 = vadd.f32 %v3811_v53, %v3741_v52  ;;  %v5768_v56 = vpop.f32.mrb[63].mxu0  ;;  %v5779_v58 = vpop.f32.mrb[59].mxu1  ;;  %v3893_v62 = vadd.f32 %v3889_v54, %v3822_v60 }
 0xd21   :  { %v4296_v56 = vld [vmem:[#allocation3 + $0x30] sm:$0xff] }
 0xd22   :  { %v4922_v59 = vmul.f32 -1.442695, %v3815_v55  ;;  %v4924_v63 = vmul.f32 -1.442695, %v3893_v62 }
 0xd24   :  { %6356 = vpow2.f32 %v4922_v59 }
 0xd25   :  { %6358 = vpow2.f32 %v4924_v63 }
 0xd27   :  { %v3967_v26 = vpop.f32.mrb[64].mxu0 }
 0xd28   :  { %v5790_v0 = vpop.f32.mrb[65].mxu0  ;;  %v3968_v11 = vadd.f32 %v7046_v10, %v3967_v26 }
 0xd2e   :  { %v6357_v6 = vpop.eup %6356 }
 0xd2f   :  { %v3819_v7 = vadd.f32 1.0, %v6357_v6  ;;  %v6359_v8 = vpop.eup %6358 }
 0xd30   :  { %v3897_v9 = vadd.f32 1.0, %v6359_v8  ;;  %v4374_v8 = vld [vmem:[#allocation4 + $0x30] sm:$0xff] }
 0xd31   :  { %6360 = vrcp.f32 %v3819_v7 }
 0xd32   :  { %6362 = vrcp.f32 %v3897_v9 }
 0xd3b   :  { %v6361_v13 = vpop.eup %6360 }
 0xd3c   :  { %v3971_v17 = vmul.f32 %v6361_v13, %v3968_v11  ;;  %v6363_v20 = vpop.eup %6362 }
 0xd3d   :  { %v3974_v21 = vsub.f32 1.0, %v6363_v20  ;;  %v3976_v15 = vmul.f32 %v6363_v20, %v3740_v51 }
 0xd3e   :  { %v3972_v19 = vadd.f32 %v3971_v17, %v3900_v18 }
 0xd40   :  { %6364 = vtanh.f32 %v3972_v19 }
 0xd4a   :  { %v6365_v46 = vpop.eup %6364 }
 0xd4b   :  { %v3975_v23 = vmul.f32 %v6365_v46, %v3974_v21  ;;  %v4689_v21 = vld [vmem:[%s7221_s9] sm:$0xff]  ;;  %v4691_v46 = vld [vmem:[%s7221_s9 + $0x10] sm:$0xff] }
 0xd4d   :  { %v3977_v57 = vadd.f32 %v3976_v15, %v3975_v23  ;;  %v4452_v15 = vld [vmem:[#allocation2 + $0x38] sm:$0xff] }
 0xd4f   :  { %5800 = vmatmul.mubr.msk.f32.vlgmr.msra.gmra.mrb[60].mxu1 %vm185_vm2, %v3977_v57  ;;  %5811 = vmatmul.mubr.msk.f32.vlgmr.msra.gmra.mrb[66].mxu0 %vm185_vm2, %v3977_v57 }
 0xd50   :  { %6185 = vmatpush3.bf16.msra.mxu1 %v6972_v33  ;;  %5821 = vmatprep.mubr.msk.f32.mxu1 %vm6397_vm1, %v6398_v32 }
 0xd51   :  { %6186 = vmatprep.subr.bf16.mxu1 %v6396_v16  ;;  %6191 = vmatpush3.bf16.msra.mxu0 %v6891_v12 }
 0xd52   :  { %6192 = vmatprep.subr.bf16.mxu0 %v6396_v16  ;;  %5832 = vmatprep.mubr.msk.f32.mxu0 %vm6397_vm1, %v6398_v32 }
 0xd54   :  { %6188 = vmatpush3.bf16.msra.mxu1 %v6992_v1 }
 0xd55   :  { %6195 = vmatprep.subr.bf16.mxu1 %v6396_v16  ;;  %6194 = vmatpush3.bf16.msra.mxu0 %v6897_v14 }
 0xd56   :  { %6201 = vmatprep.subr.bf16.mxu0 %v6396_v16 }
 0xd57   :  { %5822 = vmatmul.mubr.msk.f32.vlgmr.msra.gmra.mrb[62].mxu1 %vm185_vm2, %v3977_v57 }
 0xd58   :  { %6197 = vmatpush3.bf16.msra.mxu1 %v6964_v24  ;;  %5843 = vmatprep.mubr.msk.f32.mxu1 %vm6397_vm1, %v6398_v32 }
 0xd59   :  { %6198 = vmatprep.subr.bf16.mxu1 %v6396_v16 }
 0xd5c   :  { %6200 = vmatpush3.bf16.msra.mxu1 %v6986_v30 }
 0xd5d   :  { %6207 = vmatprep.subr.bf16.mxu1 %v6396_v16 }
 0xe22   :  { %v4048_v25 = vpop.f32.mrb[60].mxu1  ;;  %v4126_v27 = vpop.f32.mrb[66].mxu0 }
 0xe23   :  { %v4052_v61 = vadd.f32 %v4048_v25, %v3978_v22  ;;  %v5801_v29 = vpop.f32.mrb[61].mxu1  ;;  %v5812_v2 = vpop.f32.mrb[67].mxu0  ;;  %v4130_v4 = vadd.f32 %v4126_v27, %v4059_v3 }
 0xe24   :  { %v4533_v2 = vld [vmem:[#allocation3 + $0x38] sm:$0xff] }
 0xe25   :  { %v4927_v31 = vmul.f32 -1.442695, %v4052_v61  ;;  %v4929_v5 = vmul.f32 -1.442695, %v4130_v4 }
 0xe27   :  { %6366 = vpow2.f32 %v4927_v31 }
 0xe28   :  { %6368 = vpow2.f32 %v4929_v5 }
 0xe2a   :  { %v4204_v34 = vpop.f32.mrb[62].mxu1 }
 0xe2b   :  { %v5823_v35 = vpop.f32.mrb[63].mxu1  ;;  %v4205_v40 = vadd.f32 %v7046_v10, %v4204_v34 }
 0xe31   :  { %v6367_v37 = vpop.eup %6366 }
 0xe32   :  { %v4056_v36 = vadd.f32 1.0, %v6367_v37  ;;  %v6369_v38 = vpop.eup %6368 }
 0xe33   :  { %v4134_v39 = vadd.f32 1.0, %v6369_v38 }
 0xe34   :  { %6370 = vrcp.f32 %v4056_v36 }
 0xe35   :  { %6372 = vrcp.f32 %v4134_v39 }
 0xe3e   :  { %v6371_v41 = vpop.eup %6370 }
 0xe3f   :  { %v4208_v42 = vmul.f32 %v6371_v41, %v4205_v40  ;;  %v6373_v43 = vpop.eup %6372  ;;  %v4611_v40 = vld [vmem:[#allocation4 + $0x38] sm:$0xff] }
 0xe40   :  { %v4211_v45 = vsub.f32 1.0, %v6373_v43  ;;  %v4213_v49 = vmul.f32 %v6373_v43, %v3977_v57 }
 0xe41   :  { %v4209_v44 = vadd.f32 %v4208_v42, %v4137_v28 }
 0xe43   :  { %6374 = vtanh.f32 %v4209_v44 }
 0xe4d   :  { %v6375_v47 = vpop.eup %6374 }
 0xe4e   :  { %v4212_v48 = vmul.f32 %v6375_v47, %v4211_v45 }
 0xe50   :  { %v4214_v50 = vadd.f32 %v4213_v49, %v4212_v48  ;;  %v4941_v48 = vld [vmem:[%s7222_s10] ss:$0 sm:$0xff] }
 0xe52   :  { %5833 = vmatmul.mubr.msk.f32.vlgmr.msra.gmra.mrb[68].mxu0 %vm185_vm2, %v4214_v50  ;;  %5844 = vmatmul.mubr.msk.f32.vlgmr.msra.gmra.mrb[64].mxu1 %vm185_vm2, %v4214_v50 }
 0xe53   :  { %6203 = vmatpush3.bf16.msra.mxu0 %v6972_v33  ;;  %5854 = vmatprep.mubr.msk.f32.mxu0 %vm6397_vm1, %v6398_v32 }
 0xe54   :  { %6204 = vmatprep.subr.bf16.mxu0 %v6396_v16  ;;  %6209 = vmatpush3.bf16.msra.mxu1 %v6891_v12  ;;  %v4215_v12 = vld [vmem:[#allocation2 + $0x30] sm:$0xff] }
 0xe55   :  { %6210 = vmatprep.subr.bf16.mxu1 %v6396_v16  ;;  %5865 = vmatprep.mubr.msk.f32.mxu1 %vm6397_vm1, %v6398_v32 }
 0xe57   :  { %6206 = vmatpush3.bf16.msra.mxu0 %v6992_v1 }
 0xe58   :  { %6213 = vmatprep.subr.bf16.mxu0 %v6396_v16  ;;  %6212 = vmatpush3.bf16.msra.mxu1 %v6897_v14 }
 0xe59   :  { %6219 = vmatprep.subr.bf16.mxu1 %v6396_v16 }
 0xe5a   :  { %5855 = vmatmul.mubr.msk.f32.vlgmr.msra.gmra.mrb[70].mxu0 %vm185_vm2, %v4214_v50 }
 0xe5b   :  { %6215 = vmatpush3.bf16.msra.mxu0 %v6964_v24  ;;  %5876 = vmatprep.mubr.msk.f32.mxu0 %vm6397_vm1, %v6398_v32 }
 0xe5c   :  { %6216 = vmatprep.subr.bf16.mxu0 %v6396_v16 }
 0xe5f   :  { %6218 = vmatpush3.bf16.msra.mxu0 %v6986_v30 }
 0xe60   :  { %6225 = vmatprep.subr.bf16.mxu0 %v6396_v16 }
 0xf25   :  { %v4285_v51 = vpop.f32.mrb[68].mxu0  ;;  %v4363_v52 = vpop.f32.mrb[64].mxu1 }
 0xf26   :  { %v4289_v53 = vadd.f32 %v4285_v51, %v4215_v12  ;;  %v5834_v14 = vpop.f32.mrb[69].mxu0  ;;  %v5845_v54 = vpop.f32.mrb[65].mxu1  ;;  %v4367_v58 = vadd.f32 %v4363_v52, %v4296_v56 }
 0xf28   :  { %v4932_v55 = vmul.f32 -1.442695, %v4289_v53  ;;  %v4934_v24 = vmul.f32 -1.442695, %v4367_v58 }
 0xf2a   :  { %6376 = vpow2.f32 %v4932_v55 }
 0xf2b   :  { %6378 = vpow2.f32 %v4934_v24 }
 0xf2d   :  { %v4441_v59 = vpop.f32.mrb[70].mxu0 }
 0xf2e   :  { %v5856_v60 = vpop.f32.mrb[71].mxu0  ;;  %v4442_v0 = vadd.f32 %v7046_v10, %v4441_v59 }
 0xf34   :  { %v6377_v62 = vpop.eup %6376 }
 0xf35   :  { %v4293_v63 = vadd.f32 1.0, %v6377_v62  ;;  %v6379_v30 = vpop.eup %6378 }
 0xf36   :  { %v4371_v26 = vadd.f32 1.0, %v6379_v30 }
 0xf37   :  { %6380 = vrcp.f32 %v4293_v63 }
 0xf38   :  { %6382 = vrcp.f32 %v4371_v26 }
 0xf41   :  { %v6381_v6 = vpop.eup %6380 }
 0xf42   :  { %v4445_v7 = vmul.f32 %v6381_v6, %v4442_v0  ;;  %v6383_v11 = vpop.eup %6382 }
 0xf43   :  { %v4448_v13 = vsub.f32 1.0, %v6383_v11  ;;  %v4450_v19 = vmul.f32 %v6383_v11, %v4214_v50 }
 0xf44   :  { %v4446_v9 = vadd.f32 %v4445_v7, %v4374_v8 }
 0xf46   :  { %6384 = vtanh.f32 %v4446_v9 }
 0xf50   :  { %v6385_v17 = vpop.eup %6384 }
 0xf51   :  { %v4449_v18 = vmul.f32 %v6385_v17, %v4448_v13 }
 0xf53   :  { %v4451_v20 = vadd.f32 %v4450_v19, %v4449_v18 }
 0xf55   :  { %5866 = vmatmul.mubr.msk.f32.vlgmr.msra.gmra.mrb[66].mxu1 %vm185_vm2, %v4451_v20  ;;  %5877 = vmatmul.mubr.msk.f32.vlgmr.msra.gmra.mrb[72].mxu0 %vm185_vm2, %v4451_v20 }
 0xf56   :  { %6221 = vmatpush3.bf16.msra.mxu1 %v6972_v33  ;;  %5887 = vmatprep.mubr.msk.f32.mxu1 %vm6397_vm1, %v6398_v32  ;;  %v4690_v33 = vld [vmem:[%s7221_s9 + $0x8] sm:$0xff] }
 0xf57   :  { %6222 = vmatprep.subr.bf16.mxu1 %v6396_v16  ;;  %5898 = vmatprep.mubr.msk.f32.mxu0 %vm6397_vm1, %v6398_v32  ;;  %v6226_v23 = vpack.c.bf16 %v4690_v33, %v4689_v21  ;;  %v4692_v32 = vld [vmem:[%s7221_s9 + $0x18] sm:$0xff] }
 0xf59   :  { %6227 = vmatpush3.bf16.msra.mxu0 %v6226_v23 }
 0xf5a   :  { %6224 = vmatpush3.bf16.msra.mxu1 %v6992_v1  ;;  %v6229_v1 = vpack.c.bf16 %v4692_v32, %v4691_v46  ;;  %6228 = vmatprep.subr.bf16.mxu0 %v6396_v16 }
 0xf5d   :  { %5888 = vmatmul.mubr.msk.f32.vlgmr.msra.gmra.mrb[68].mxu1 %vm185_vm2, %v4451_v20  ;;  %6230 = vmatpush3.bf16.msra.mxu0 %v6229_v1 }
0x1028   :  { %v4522_v57 = vpop.f32.mrb[66].mxu1  ;;  %v4600_v22 = vpop.f32.mrb[72].mxu0 }
0x1029   :  { %v4526_v25 = vadd.f32 %v4522_v57, %v4452_v15  ;;  %v5867_v27 = vpop.f32.mrb[67].mxu1  ;;  %v5878_v61 = vpop.f32.mrb[73].mxu0  ;;  %v4604_v31 = vadd.f32 %v4600_v22, %v4533_v2 }
0x102b   :  { %v4937_v29 = vmul.f32 -1.442695, %v4526_v25  ;;  %v4939_v3 = vmul.f32 -1.442695, %v4604_v31 }
0x102d   :  { %6386 = vpow2.f32 %v4937_v29 }
0x102e   :  { %6388 = vpow2.f32 %v4939_v3 }
0x1030   :  { %v4678_v4 = vpop.f32.mrb[68].mxu1 }
0x1031   :  { %v5889_v5 = vpop.f32.mrb[69].mxu1  ;;  %v4679_v36 = vadd.f32 %v7046_v10, %v4678_v4 }
0x1037   :  { %v6387_v34 = vpop.eup %6386 }
0x1038   :  { %v4530_v35 = vadd.f32 1.0, %v6387_v34  ;;  %v6389_v37 = vpop.eup %6388 }
0x1039   :  { %v4608_v16 = vadd.f32 1.0, %v6389_v37 }
0x103a   :  { %6390 = vrcp.f32 %v4530_v35 }
0x103b   :  { %6392 = vrcp.f32 %v4608_v16 }
0x1044   :  { %v6391_v38 = vpop.eup %6390 }
0x1045   :  { %v4682_v39 = vmul.f32 %v6391_v38, %v4679_v36  ;;  %v6393_v42 = vpop.eup %6392 }
0x1046   :  { %v4685_v28 = vsub.f32 1.0, %v6393_v42  ;;  %v4687_v45 = vmul.f32 %v6393_v42, %v4451_v20 }
0x1047   :  { %v4683_v41 = vadd.f32 %v4682_v39, %v4611_v40 }
0x1049   :  { %6394 = vtanh.f32 %v4683_v41 }
0x1053   :  { %v6395_v44 = vpop.eup %6394 }
0x1054   :  { %v4686_v43 = vmul.f32 %v6395_v44, %v4685_v28 }
0x1056   :  { %v4688_v47 = vadd.f32 %v4687_v45, %v4686_v43 }
0x1058   :  { %5899 = vmatmul.mubr.msk.f32.vlgmr.msra.gmra.mrb[74].mxu0 %vm185_vm2, %v4688_v47 }
0x112b   :  { %v4769_v49 = vpop.f32.mrb[74].mxu0 }
0x112c   :  { %v4770_v10 = vadd.f32 %v4941_v48, %v4769_v49  ;;  %v5900_v50 = vpop.f32.mrb[75].mxu0 }
0x112e   :  { %4774 = vst.msk [vmem:[%s7223_s11] sm:$0xff] %vm4773_vm3, %v4770_v10 }

</bundles_post_ra>
